<compile_context>
chip_gen: v7x
topology: tpu7x:2x2x1
jax: 0.10.0
libtpu: 0.0.40
codegen_flags: <defaults>
</compile_context>

<pallas_src>
import numpy as np
import jax
import jax.numpy as jnp
from jax.experimental import pallas as pl
from jax.experimental.pallas import tpu as pltpu

_NEG_SLOPE = 0.01   # nn.LeakyReLU default
_BN_EPS = 1e-5      # nn.BatchNorm2d default


def _mm(a, b):
    # default precision: single-pass MXU (bf16 multiply, f32 accumulate)
    return jnp.dot(a, b, preferred_element_type=jnp.float32)


def _leaky(v):
    return jnp.where(v >= 0, v, _NEG_SLOPE * v)


def _deepconvnet_kernel(x_ref,
                        w1_ref, b1_ref, se1_ref,
                        w2_ref, b2_ref, se2_ref,
                        w3_ref, b3_ref, se3_ref,
                        w4_ref, b4_ref, se4_ref,
                        w5_ref, b5_ref,
                        out_ref):
    x = x_ref[0]                                        # (C, T)

    def im2row(p):
        # (Cin, W) -> (5*Cin, W-4); row k*Cin + i holds p[i, k:k+W-4]
        wout = p.shape[1] - 4
        return jnp.concatenate([p[:, k:k + wout] for k in range(5)], axis=0)

    def conv_bn_pool_act(p, w_ref, b_ref, se_ref):
        # conv (BN pre-folded into w/b) -> MaxPool(1,2) -> LeakyReLU
        u = _mm(w_ref[...], im2row(p)) + b_ref[...]     # (Cout, W)
        m = jnp.maximum(u[:, :-1], u[:, 1:])            # neighbor max, (Cout, W-1)
        pooled = jnp.dot(m.astype(jnp.bfloat16), se_ref[...],   # even-column select
                         preferred_element_type=jnp.float32)
        return _leaky(pooled)                           # LeakyReLU after pool (monotone)

    # l1: fused Conv2d(1,25,(1,5)) ∘ Conv2d(25,25,(C,1)) + folded BN1 + pool + LReLU
    p = conv_bn_pool_act(x, w1_ref, b1_ref, se1_ref)    # (25, 373)
    # l2..l4: Conv(1,5) + folded BN + pool + LReLU
    p = conv_bn_pool_act(p, w2_ref, b2_ref, se2_ref)    # (50, 184)
    p = conv_bn_pool_act(p, w3_ref, b3_ref, se3_ref)    # (50, 90)
    p = conv_bn_pool_act(p, w4_ref, b4_ref, se4_ref)    # (50, 43)

    # l5: Flatten + Linear(50*1*43, 2)
    t0 = jnp.sum(w5_ref[0] * p, axis=1, keepdims=True)  # (50, 1)
    t1 = jnp.sum(w5_ref[1] * p, axis=1, keepdims=True)  # (50, 1)
    t = jnp.concatenate([t0, t1], axis=1)               # (50, 2)
    y = jnp.sum(t, axis=0, keepdims=True) + b5_ref[...] # (1, 2)
    out_ref[...] = y.reshape(1, 1, 2)


def make_even_select(conv_width):
    """bf16 0/1 matrix (W-1, W//2) selecting even columns of the neighbor-max tensor."""
    pooled = conv_width // 2
    i = np.arange(conv_width - 1)[:, None]
    j = np.arange(pooled)[None, :]
    return jnp.asarray((i == 2 * j).astype(np.float32), dtype=jnp.bfloat16)


def init_params(key, C):
    """Deterministic synthetic parameters with the module's shapes (PyTorch layout)."""
    channels = [25, 25, 50, 50, 50]
    keys = jax.random.split(key, 32)
    it = iter(keys)

    def uniform(shape, fan_in):
        bound = 1.0 / np.sqrt(fan_in)
        return jax.random.uniform(next(it), shape, jnp.float32, -bound, bound)

    p = {}
    p['w1a'] = uniform((channels[0], 1, 1, 5), 5)
    p['b1a'] = uniform((channels[0],), 5)
    p['w1b'] = uniform((channels[1], channels[0], C, 1), channels[0] * C)
    p['b1b'] = uniform((channels[1],), channels[0] * C)
    for idx, (co, ci) in [(2, (channels[2], channels[1])),
                          (3, (channels[3], channels[2])),
                          (4, (channels[4], channels[3]))]:
        p[f'w{idx}'] = uniform((co, ci, 1, 5), ci * 5)
        p[f'b{idx}'] = uniform((co,), ci * 5)
    for idx, ch in [(1, channels[1]), (2, channels[2]), (3, channels[3]), (4, channels[4])]:
        p[f'g{idx}'] = jax.random.uniform(next(it), (ch,), jnp.float32, 0.5, 1.5)
        p[f'be{idx}'] = 0.1 * jax.random.normal(next(it), (ch,), jnp.float32)
        p[f'm{idx}'] = 0.1 * jax.random.normal(next(it), (ch,), jnp.float32)
        p[f'v{idx}'] = jax.random.uniform(next(it), (ch,), jnp.float32, 0.5, 1.5)
    p['w5'] = uniform((2, channels[4] * 1 * 43), channels[4] * 43)
    p['b5'] = uniform((2,), channels[4] * 43)
    return p


def deepconvnet_forward(x_nchw, params):
    N, one, C, T = x_nchw.shape
    assert one == 1
    x = x_nchw.reshape(N, C, T).astype(jnp.float32)

    # width bookkeeping — must end at 43 to match nn.Linear(50*1*43, 2)
    w1c = T - 4; p1 = w1c // 2
    w2c = p1 - 4; p2 = w2c // 2
    w3c = p2 - 4; p3 = w3c // 2
    w4c = p3 - 4; p4 = w4c // 2
    assert p4 == 43, f"T={T} gives flatten width {p4}; the module hardcodes 43"

    def bn_fold(g, b, m, v):
        scale = g / jnp.sqrt(v + _BN_EPS)
        shift = b - m * scale
        return scale, shift

    # --- layer 1: fuse Conv(1,25,(1,5)) ∘ Conv(25,25,(C,1)), then fold BN1 ---
    w1a = params['w1a'][:, 0, 0, :]                  # (25, 5)
    b1a = params['b1a']                              # (25,)
    w1b = params['w1b'][:, :, :, 0]                  # (25out, 25in, C)
    b1b = params['b1b']                              # (25,)
    w_eff = jnp.einsum('oic,ik->okc', w1b, w1a).reshape(25, 5 * C)   # col = k*C + c
    b_eff = jnp.einsum('oic,i->o', w1b, b1a) + b1b
    s1, sh1 = bn_fold(params['g1'], params['be1'], params['m1'], params['v1'])
    w1 = s1[:, None] * w_eff
    b1 = (s1 * b_eff + sh1).reshape(-1, 1)

    # --- layers 2-4: im2row-stacked 1x5 conv weights with BN folded in ---
    def fold_conv(idx):
        w = params[f'w{idx}']; b = params[f'b{idx}']
        Cout, Cin = w.shape[0], w.shape[1]
        w_st = jnp.transpose(w[:, :, 0, :], (0, 2, 1)).reshape(Cout, 5 * Cin)  # col = k*Cin+i
        s, sh = bn_fold(params[f'g{idx}'], params[f'be{idx}'],
                        params[f'm{idx}'], params[f'v{idx}'])
        return s[:, None] * w_st, (s * b + sh).reshape(-1, 1)

    w2, b2 = fold_conv(2)
    w3, b3 = fold_conv(3)
    w4, b4 = fold_conv(4)

    se1 = make_even_select(w1c)
    se2 = make_even_select(w2c)
    se3 = make_even_select(w3c)
    se4 = make_even_select(w4c)

    w5 = params['w5'].reshape(2, 50, 43)             # flatten order: (chan, time)
    b5 = params['b5'].reshape(1, 2)

    operands = (x, w1, b1, se1, w2, b2, se2, w3, b3, se3, w4, b4, se4, w5, b5)

    def const_map(ndim):
        return lambda n: (0,) * ndim

    in_specs = [pl.BlockSpec((1, C, T), lambda n: (n, 0, 0))]
    for op in operands[1:]:
        in_specs.append(pl.BlockSpec(op.shape, const_map(op.ndim)))

    out = pl.pallas_call(
        _deepconvnet_kernel,
        grid=(N,),
        out_shape=jax.ShapeDtypeStruct((N, 1, 2), jnp.float32),
        in_specs=in_specs,
        out_specs=pl.BlockSpec((1, 1, 2), lambda n: (n, 0, 0)),
        compiler_params=pltpu.CompilerParams(
            dimension_semantics=("parallel",),
            vmem_limit_bytes=16 * 1024 * 1024),
    )(*operands)
    return out.reshape(N, 2)                         # (N, 2), like the PyTorch module


def reference_forward(x_nchw, p):
    """Pure-JAX (non-Pallas) eval-mode reference for validation."""
    prec = jax.lax.Precision.HIGHEST

    def conv(x, w, b):
        y = jax.lax.conv_general_dilated(
            x, w, window_strides=(1, 1), padding='VALID',
            dimension_numbers=('NCHW', 'OIHW', 'NCHW'), precision=prec)
        return y + b.reshape(1, -1, 1, 1)

    def bn(x, g, b, m, v):
        scale = g.reshape(1, -1, 1, 1) / jnp.sqrt(v.reshape(1, -1, 1, 1) + _BN_EPS)
        return (x - m.reshape(1, -1, 1, 1)) * scale + b.reshape(1, -1, 1, 1)

    def lrelu(x):
        return jnp.where(x >= 0, x, _NEG_SLOPE * x)

    def pool(x):
        half = x.shape[-1] // 2
        return jnp.maximum(x[..., 0:2 * half:2], x[..., 1:2 * half:2])

    h = conv(x_nchw, p['w1a'], p['b1a'])
    h = conv(h, p['w1b'], p['b1b'])
    h = pool(lrelu(bn(h, p['g1'], p['be1'], p['m1'], p['v1'])))
    h = conv(h, p['w2'], p['b2'])
    h = pool(lrelu(bn(h, p['g2'], p['be2'], p['m2'], p['v2'])))
    h = conv(h, p['w3'], p['b3'])
    h = pool(lrelu(bn(h, p['g3'], p['be3'], p['m3'], p['v3'])))
    h = conv(h, p['w4'], p['b4'])
    h = pool(lrelu(bn(h, p['g4'], p['be4'], p['m4'], p['v4'])))
    h = h.reshape(h.shape[0], -1)
    return h @ p['w5'].T + p['b5']


if __name__ == "__main__":
    # smallest shapes consistent with the module: batch=2, C=2 EEG channels,
    # T=750 time samples (the Linear(50*1*43, 2) implies T=750).
    N, C, T = 2, 2, 750
    key = jax.random.PRNGKey(0)
    kx, kp = jax.random.split(key)
    x = jax.random.normal(kx, (N, 1, C, T), jnp.float32)
    params = init_params(kp, C)

    y = jax.block_until_ready(deepconvnet_forward(x, params))
    y_ref = jax.block_until_ready(reference_forward(x, params))

    assert y.shape == (N, 2)
    if not np.allclose(np.asarray(y), np.asarray(y_ref), rtol=2e-2, atol=2e-2):
        raise AssertionError("Pallas kernel output mismatch vs JAX reference")
    print("KERNEL_OK")
</pallas_src>

<mosaic_0001>
module attributes {stable_mosaic.version = 11 : i64} {
  func.func @_deepconvnet_kernel(%arg0: i32, %arg1: memref<1x2x750xf32, #tpu.memory_space<vmem>>, %arg2: memref<25x10xf32, #tpu.memory_space<vmem>>, %arg3: memref<25x1xf32, #tpu.memory_space<vmem>>, %arg4: memref<745x373xbf16, #tpu.memory_space<vmem>>, %arg5: memref<50x125xf32, #tpu.memory_space<vmem>>, %arg6: memref<50x1xf32, #tpu.memory_space<vmem>>, %arg7: memref<368x184xbf16, #tpu.memory_space<vmem>>, %arg8: memref<50x250xf32, #tpu.memory_space<vmem>>, %arg9: memref<50x1xf32, #tpu.memory_space<vmem>>, %arg10: memref<179x90xbf16, #tpu.memory_space<vmem>>, %arg11: memref<50x250xf32, #tpu.memory_space<vmem>>, %arg12: memref<50x1xf32, #tpu.memory_space<vmem>>, %arg13: memref<85x43xbf16, #tpu.memory_space<vmem>>, %arg14: memref<2x50x43xf32, #tpu.memory_space<vmem>>, %arg15: memref<1x2xf32, #tpu.memory_space<vmem>>, %arg16: memref<1x1x2xf32, #tpu.memory_space<vmem>>) attributes {dimension_semantics = [#tpu.dimension_semantics<parallel>], iteration_bounds = array<i64: 2>, scalar_prefetch = 0 : i64, scratch_operands = 0 : i64, tpu.core_type = #tpu.core_type<tc>, window_params = [{transform_indices = @transform_0, window_bounds = array<i64: 1, 2, 750>}, {pipeline_mode = #tpu.pipeline_mode<synchronous>, transform_indices = @transform_1, window_bounds = array<i64: 25, 10>}, {pipeline_mode = #tpu.pipeline_mode<synchronous>, transform_indices = @transform_2, window_bounds = array<i64: 25, 1>}, {pipeline_mode = #tpu.pipeline_mode<synchronous>, transform_indices = @transform_3, window_bounds = array<i64: 745, 373>}, {pipeline_mode = #tpu.pipeline_mode<synchronous>, transform_indices = @transform_4, window_bounds = array<i64: 50, 125>}, {pipeline_mode = #tpu.pipeline_mode<synchronous>, transform_indices = @transform_5, window_bounds = array<i64: 50, 1>}, {pipeline_mode = #tpu.pipeline_mode<synchronous>, transform_indices = @transform_6, window_bounds = array<i64: 368, 184>}, {pipeline_mode = #tpu.pipeline_mode<synchronous>, transform_indices = @transform_7, window_bounds = array<i64: 50, 250>}, {pipeline_mode = #tpu.pipeline_mode<synchronous>, transform_indices = @transform_8, window_bounds = array<i64: 50, 1>}, {pipeline_mode = #tpu.pipeline_mode<synchronous>, transform_indices = @transform_9, window_bounds = array<i64: 179, 90>}, {pipeline_mode = #tpu.pipeline_mode<synchronous>, transform_indices = @transform_10, window_bounds = array<i64: 50, 250>}, {pipeline_mode = #tpu.pipeline_mode<synchronous>, transform_indices = @transform_11, window_bounds = array<i64: 50, 1>}, {pipeline_mode = #tpu.pipeline_mode<synchronous>, transform_indices = @transform_12, window_bounds = array<i64: 85, 43>}, {pipeline_mode = #tpu.pipeline_mode<synchronous>, transform_indices = @transform_13, window_bounds = array<i64: 2, 50, 43>}, {pipeline_mode = #tpu.pipeline_mode<synchronous>, transform_indices = @transform_14, window_bounds = array<i64: 1, 2>}, {transform_indices = @transform_15, window_bounds = array<i64: 1, 1, 2>}]} {
    %c0 = arith.constant 0 : index
    %c0_0 = arith.constant 0 : index
    %c0_1 = arith.constant 0 : index
    %0 = vector.load %arg1[%c0, %c0_0, %c0_1] : memref<1x2x750xf32, #tpu.memory_space<vmem>>, vector<1x2x750xf32>
    %1 = vector.shape_cast %0 : vector<1x2x750xf32> to vector<2x750xf32>
    %c0_2 = arith.constant 0 : index
    %c0_3 = arith.constant 0 : index
    %2 = vector.load %arg2[%c0_2, %c0_3] : memref<25x10xf32, #tpu.memory_space<vmem>>, vector<25x10xf32>
    %3 = vector.extract_strided_slice %1 {offsets = [0, 0], sizes = [2, 746], strides = [1, 1]} : vector<2x750xf32> to vector<2x746xf32>
    %4 = vector.extract_strided_slice %1 {offsets = [0, 1], sizes = [2, 746], strides = [1, 1]} : vector<2x750xf32> to vector<2x746xf32>
    %5 = vector.extract_strided_slice %1 {offsets = [0, 2], sizes = [2, 746], strides = [1, 1]} : vector<2x750xf32> to vector<2x746xf32>
    %6 = vector.extract_strided_slice %1 {offsets = [0, 3], sizes = [2, 746], strides = [1, 1]} : vector<2x750xf32> to vector<2x746xf32>
    %7 = vector.extract_strided_slice %1 {offsets = [0, 4], sizes = [2, 746], strides = [1, 1]} : vector<2x750xf32> to vector<2x746xf32>
    %8 = tpu.concatenate %3, %4, %5, %6, %7 in 0 : vector<2x746xf32>, vector<2x746xf32>, vector<2x746xf32>, vector<2x746xf32>, vector<2x746xf32> -> vector<10x746xf32>
    %cst = arith.constant dense<0.000000e+00> : vector<25x746xf32>
    %9 = tpu.matmul %2, %8, %cst {dimension_numbers = #tpu.dot_dimension_numbers<[1], [0], [0], [1], [0, 0, 1, 1], [], []>} : vector<25x10xf32>, vector<10x746xf32>, vector<25x746xf32> -> vector<25x746xf32>
    %c0_4 = arith.constant 0 : index
    %c0_5 = arith.constant 0 : index
    %10 = vector.load %arg3[%c0_4, %c0_5] : memref<25x1xf32, #tpu.memory_space<vmem>>, vector<25x1xf32>
    %11 = vector.broadcast %10 : vector<25x1xf32> to vector<25x746xf32>
    %12 = arith.addf %9, %11 : vector<25x746xf32>
    %13 = vector.extract_strided_slice %12 {offsets = [0, 0], sizes = [25, 745], strides = [1, 1]} : vector<25x746xf32> to vector<25x745xf32>
    %14 = vector.extract_strided_slice %12 {offsets = [0, 1], sizes = [25, 745], strides = [1, 1]} : vector<25x746xf32> to vector<25x745xf32>
    %15 = arith.maximumf %13, %14 : vector<25x745xf32>
    %16 = arith.truncf %15 : vector<25x745xf32> to vector<25x745xbf16>
    %c0_6 = arith.constant 0 : index
    %c0_7 = arith.constant 0 : index
    %17 = vector.load %arg4[%c0_6, %c0_7] : memref<745x373xbf16, #tpu.memory_space<vmem>>, vector<745x373xbf16>
    %cst_8 = arith.constant dense<0.000000e+00> : vector<25x373xf32>
    %18 = tpu.matmul %16, %17, %cst_8 {dimension_numbers = #tpu.dot_dimension_numbers<[1], [0], [0], [1], [0, 0, 1, 1], [], []>} : vector<25x745xbf16>, vector<745x373xbf16>, vector<25x373xf32> -> vector<25x373xf32>
    %cst_9 = arith.constant 0.000000e+00 : f32
    %19 = vector.broadcast %cst_9 : f32 to vector<25x373xf32>
    %20 = arith.cmpf oge, %18, %19 : vector<25x373xf32>
    %cst_10 = arith.constant 0.00999999977 : f32
    %21 = vector.broadcast %cst_10 : f32 to vector<25x373xf32>
    %22 = arith.mulf %21, %18 : vector<25x373xf32>
    %23 = arith.select %20, %18, %22 : vector<25x373xi1>, vector<25x373xf32>
    %c0_11 = arith.constant 0 : index
    %c0_12 = arith.constant 0 : index
    %24 = vector.load %arg5[%c0_11, %c0_12] : memref<50x125xf32, #tpu.memory_space<vmem>>, vector<50x125xf32>
    %25 = vector.extract_strided_slice %23 {offsets = [0, 0], sizes = [25, 369], strides = [1, 1]} : vector<25x373xf32> to vector<25x369xf32>
    %26 = vector.extract_strided_slice %23 {offsets = [0, 1], sizes = [25, 369], strides = [1, 1]} : vector<25x373xf32> to vector<25x369xf32>
    %27 = vector.extract_strided_slice %23 {offsets = [0, 2], sizes = [25, 369], strides = [1, 1]} : vector<25x373xf32> to vector<25x369xf32>
    %28 = vector.extract_strided_slice %23 {offsets = [0, 3], sizes = [25, 369], strides = [1, 1]} : vector<25x373xf32> to vector<25x369xf32>
    %29 = vector.extract_strided_slice %23 {offsets = [0, 4], sizes = [25, 369], strides = [1, 1]} : vector<25x373xf32> to vector<25x369xf32>
    %30 = tpu.concatenate %25, %26, %27, %28, %29 in 0 : vector<25x369xf32>, vector<25x369xf32>, vector<25x369xf32>, vector<25x369xf32>, vector<25x369xf32> -> vector<125x369xf32>
    %cst_13 = arith.constant dense<0.000000e+00> : vector<50x369xf32>
    %31 = tpu.matmul %24, %30, %cst_13 {dimension_numbers = #tpu.dot_dimension_numbers<[1], [0], [0], [1], [0, 0, 1, 1], [], []>} : vector<50x125xf32>, vector<125x369xf32>, vector<50x369xf32> -> vector<50x369xf32>
    %c0_14 = arith.constant 0 : index
    %c0_15 = arith.constant 0 : index
    %32 = vector.load %arg6[%c0_14, %c0_15] : memref<50x1xf32, #tpu.memory_space<vmem>>, vector<50x1xf32>
    %33 = vector.broadcast %32 : vector<50x1xf32> to vector<50x369xf32>
    %34 = arith.addf %31, %33 : vector<50x369xf32>
    %35 = vector.extract_strided_slice %34 {offsets = [0, 0], sizes = [50, 368], strides = [1, 1]} : vector<50x369xf32> to vector<50x368xf32>
    %36 = vector.extract_strided_slice %34 {offsets = [0, 1], sizes = [50, 368], strides = [1, 1]} : vector<50x369xf32> to vector<50x368xf32>
    %37 = arith.maximumf %35, %36 : vector<50x368xf32>
    %38 = arith.truncf %37 : vector<50x368xf32> to vector<50x368xbf16>
    %c0_16 = arith.constant 0 : index
    %c0_17 = arith.constant 0 : index
    %39 = vector.load %arg7[%c0_16, %c0_17] : memref<368x184xbf16, #tpu.memory_space<vmem>>, vector<368x184xbf16>
    %cst_18 = arith.constant dense<0.000000e+00> : vector<50x184xf32>
    %40 = tpu.matmul %38, %39, %cst_18 {dimension_numbers = #tpu.dot_dimension_numbers<[1], [0], [0], [1], [0, 0, 1, 1], [], []>} : vector<50x368xbf16>, vector<368x184xbf16>, vector<50x184xf32> -> vector<50x184xf32>
    %cst_19 = arith.constant 0.000000e+00 : f32
    %41 = vector.broadcast %cst_19 : f32 to vector<50x184xf32>
    %42 = arith.cmpf oge, %40, %41 : vector<50x184xf32>
    %cst_20 = arith.constant 0.00999999977 : f32
    %43 = vector.broadcast %cst_20 : f32 to vector<50x184xf32>
    %44 = arith.mulf %43, %40 : vector<50x184xf32>
    %45 = arith.select %42, %40, %44 : vector<50x184xi1>, vector<50x184xf32>
    %c0_21 = arith.constant 0 : index
    %c0_22 = arith.constant 0 : index
    %46 = vector.load %arg8[%c0_21, %c0_22] : memref<50x250xf32, #tpu.memory_space<vmem>>, vector<50x250xf32>
    %47 = vector.extract_strided_slice %45 {offsets = [0, 0], sizes = [50, 180], strides = [1, 1]} : vector<50x184xf32> to vector<50x180xf32>
    %48 = vector.extract_strided_slice %45 {offsets = [0, 1], sizes = [50, 180], strides = [1, 1]} : vector<50x184xf32> to vector<50x180xf32>
    %49 = vector.extract_strided_slice %45 {offsets = [0, 2], sizes = [50, 180], strides = [1, 1]} : vector<50x184xf32> to vector<50x180xf32>
    %50 = vector.extract_strided_slice %45 {offsets = [0, 3], sizes = [50, 180], strides = [1, 1]} : vector<50x184xf32> to vector<50x180xf32>
    %51 = vector.extract_strided_slice %45 {offsets = [0, 4], sizes = [50, 180], strides = [1, 1]} : vector<50x184xf32> to vector<50x180xf32>
    %52 = tpu.concatenate %47, %48, %49, %50, %51 in 0 : vector<50x180xf32>, vector<50x180xf32>, vector<50x180xf32>, vector<50x180xf32>, vector<50x180xf32> -> vector<250x180xf32>
    %cst_23 = arith.constant dense<0.000000e+00> : vector<50x180xf32>
    %53 = tpu.matmul %46, %52, %cst_23 {dimension_numbers = #tpu.dot_dimension_numbers<[1], [0], [0], [1], [0, 0, 1, 1], [], []>} : vector<50x250xf32>, vector<250x180xf32>, vector<50x180xf32> -> vector<50x180xf32>
    %c0_24 = arith.constant 0 : index
    %c0_25 = arith.constant 0 : index
    %54 = vector.load %arg9[%c0_24, %c0_25] : memref<50x1xf32, #tpu.memory_space<vmem>>, vector<50x1xf32>
    %55 = vector.broadcast %54 : vector<50x1xf32> to vector<50x180xf32>
    %56 = arith.addf %53, %55 : vector<50x180xf32>
    %57 = vector.extract_strided_slice %56 {offsets = [0, 0], sizes = [50, 179], strides = [1, 1]} : vector<50x180xf32> to vector<50x179xf32>
    %58 = vector.extract_strided_slice %56 {offsets = [0, 1], sizes = [50, 179], strides = [1, 1]} : vector<50x180xf32> to vector<50x179xf32>
    %59 = arith.maximumf %57, %58 : vector<50x179xf32>
    %60 = arith.truncf %59 : vector<50x179xf32> to vector<50x179xbf16>
    %c0_26 = arith.constant 0 : index
    %c0_27 = arith.constant 0 : index
    %61 = vector.load %arg10[%c0_26, %c0_27] : memref<179x90xbf16, #tpu.memory_space<vmem>>, vector<179x90xbf16>
    %cst_28 = arith.constant dense<0.000000e+00> : vector<50x90xf32>
    %62 = tpu.matmul %60, %61, %cst_28 {dimension_numbers = #tpu.dot_dimension_numbers<[1], [0], [0], [1], [0, 0, 1, 1], [], []>} : vector<50x179xbf16>, vector<179x90xbf16>, vector<50x90xf32> -> vector<50x90xf32>
    %cst_29 = arith.constant 0.000000e+00 : f32
    %63 = vector.broadcast %cst_29 : f32 to vector<50x90xf32>
    %64 = arith.cmpf oge, %62, %63 : vector<50x90xf32>
    %cst_30 = arith.constant 0.00999999977 : f32
    %65 = vector.broadcast %cst_30 : f32 to vector<50x90xf32>
    %66 = arith.mulf %65, %62 : vector<50x90xf32>
    %67 = arith.select %64, %62, %66 : vector<50x90xi1>, vector<50x90xf32>
    %c0_31 = arith.constant 0 : index
    %c0_32 = arith.constant 0 : index
    %68 = vector.load %arg11[%c0_31, %c0_32] : memref<50x250xf32, #tpu.memory_space<vmem>>, vector<50x250xf32>
    %69 = vector.extract_strided_slice %67 {offsets = [0, 0], sizes = [50, 86], strides = [1, 1]} : vector<50x90xf32> to vector<50x86xf32>
    %70 = vector.extract_strided_slice %67 {offsets = [0, 1], sizes = [50, 86], strides = [1, 1]} : vector<50x90xf32> to vector<50x86xf32>
    %71 = vector.extract_strided_slice %67 {offsets = [0, 2], sizes = [50, 86], strides = [1, 1]} : vector<50x90xf32> to vector<50x86xf32>
    %72 = vector.extract_strided_slice %67 {offsets = [0, 3], sizes = [50, 86], strides = [1, 1]} : vector<50x90xf32> to vector<50x86xf32>
    %73 = vector.extract_strided_slice %67 {offsets = [0, 4], sizes = [50, 86], strides = [1, 1]} : vector<50x90xf32> to vector<50x86xf32>
    %74 = tpu.concatenate %69, %70, %71, %72, %73 in 0 : vector<50x86xf32>, vector<50x86xf32>, vector<50x86xf32>, vector<50x86xf32>, vector<50x86xf32> -> vector<250x86xf32>
    %cst_33 = arith.constant dense<0.000000e+00> : vector<50x86xf32>
    %75 = tpu.matmul %68, %74, %cst_33 {dimension_numbers = #tpu.dot_dimension_numbers<[1], [0], [0], [1], [0, 0, 1, 1], [], []>} : vector<50x250xf32>, vector<250x86xf32>, vector<50x86xf32> -> vector<50x86xf32>
    %c0_34 = arith.constant 0 : index
    %c0_35 = arith.constant 0 : index
    %76 = vector.load %arg12[%c0_34, %c0_35] : memref<50x1xf32, #tpu.memory_space<vmem>>, vector<50x1xf32>
    %77 = vector.broadcast %76 : vector<50x1xf32> to vector<50x86xf32>
    %78 = arith.addf %75, %77 : vector<50x86xf32>
    %79 = vector.extract_strided_slice %78 {offsets = [0, 0], sizes = [50, 85], strides = [1, 1]} : vector<50x86xf32> to vector<50x85xf32>
    %80 = vector.extract_strided_slice %78 {offsets = [0, 1], sizes = [50, 85], strides = [1, 1]} : vector<50x86xf32> to vector<50x85xf32>
    %81 = arith.maximumf %79, %80 : vector<50x85xf32>
    %82 = arith.truncf %81 : vector<50x85xf32> to vector<50x85xbf16>
    %c0_36 = arith.constant 0 : index
    %c0_37 = arith.constant 0 : index
    %83 = vector.load %arg13[%c0_36, %c0_37] : memref<85x43xbf16, #tpu.memory_space<vmem>>, vector<85x43xbf16>
    %cst_38 = arith.constant dense<0.000000e+00> : vector<50x43xf32>
    %84 = tpu.matmul %82, %83, %cst_38 {dimension_numbers = #tpu.dot_dimension_numbers<[1], [0], [0], [1], [0, 0, 1, 1], [], []>} : vector<50x85xbf16>, vector<85x43xbf16>, vector<50x43xf32> -> vector<50x43xf32>
    %cst_39 = arith.constant 0.000000e+00 : f32
    %85 = vector.broadcast %cst_39 : f32 to vector<50x43xf32>
    %86 = arith.cmpf oge, %84, %85 : vector<50x43xf32>
    %cst_40 = arith.constant 0.00999999977 : f32
    %87 = vector.broadcast %cst_40 : f32 to vector<50x43xf32>
    %88 = arith.mulf %87, %84 : vector<50x43xf32>
    %89 = arith.select %86, %84, %88 : vector<50x43xi1>, vector<50x43xf32>
    %c0_41 = arith.constant 0 : index
    %c0_42 = arith.constant 0 : index
    %c0_43 = arith.constant 0 : index
    %90 = vector.load %arg14[%c0_41, %c0_42, %c0_43] : memref<2x50x43xf32, #tpu.memory_space<vmem>>, vector<1x50x43xf32>
    %91 = vector.shape_cast %90 : vector<1x50x43xf32> to vector<50x43xf32>
    %92 = arith.mulf %91, %89 : vector<50x43xf32>
    %cst_44 = arith.constant dense<0.000000e+00> : vector<50xf32>
    %93 = vector.multi_reduction <add>, %92, %cst_44 [1] : vector<50x43xf32> to vector<50xf32>
    %94 = vector.shape_cast %93 : vector<50xf32> to vector<50x1xf32>
    %c1 = arith.constant 1 : index
    %c0_45 = arith.constant 0 : index
    %c0_46 = arith.constant 0 : index
    %95 = vector.load %arg14[%c1, %c0_45, %c0_46] : memref<2x50x43xf32, #tpu.memory_space<vmem>>, vector<1x50x43xf32>
    %96 = vector.shape_cast %95 : vector<1x50x43xf32> to vector<50x43xf32>
    %97 = arith.mulf %96, %89 : vector<50x43xf32>
    %cst_47 = arith.constant dense<0.000000e+00> : vector<50xf32>
    %98 = vector.multi_reduction <add>, %97, %cst_47 [1] : vector<50x43xf32> to vector<50xf32>
    %99 = vector.shape_cast %98 : vector<50xf32> to vector<50x1xf32>
    %100 = tpu.concatenate %94, %99 in 1 : vector<50x1xf32>, vector<50x1xf32> -> vector<50x2xf32>
    %cst_48 = arith.constant dense<0.000000e+00> : vector<2xf32>
    %101 = vector.multi_reduction <add>, %100, %cst_48 [0] : vector<50x2xf32> to vector<2xf32>
    %102 = vector.shape_cast %101 : vector<2xf32> to vector<1x2xf32>
    %c0_49 = arith.constant 0 : index
    %c0_50 = arith.constant 0 : index
    %103 = vector.load %arg15[%c0_49, %c0_50] : memref<1x2xf32, #tpu.memory_space<vmem>>, vector<1x2xf32>
    %104 = arith.addf %102, %103 : vector<1x2xf32>
    %105 = vector.shape_cast %104 : vector<1x2xf32> to vector<1x1x2xf32>
    %c0_51 = arith.constant 0 : index
    %c0_52 = arith.constant 0 : index
    %c0_53 = arith.constant 0 : index
    %106 = vector.load %arg16[%c0_51, %c0_52, %c0_53] : memref<1x1x2xf32, #tpu.memory_space<vmem>>, vector<1x1x2xf32>
    tpu.vector_store %arg16[%c0_51, %c0_52, %c0_53], %105 {strides = array<i32>} : memref<1x1x2xf32, #tpu.memory_space<vmem>>, vector<1x1x2xf32>,
    return
  }
  func.func @transform_0(%arg0: i32) -> (i32, i32, i32) {
    %c0_i32 = arith.constant 0 : i32
    %c0_i32_0 = arith.constant 0 : i32
    %c0_i32_1 = arith.constant 0 : i32
    return %arg0, %c0_i32, %c0_i32_0 : i32, i32, i32
  }
  func.func @transform_1(%arg0: i32) -> (i32, i32) {
    %c0_i32 = arith.constant 0 : i32
    %c0_i32_0 = arith.constant 0 : i32
    %c0_i32_1 = arith.constant 0 : i32
    return %c0_i32, %c0_i32_0 : i32, i32
  }
  func.func @transform_2(%arg0: i32) -> (i32, i32) {
    %c0_i32 = arith.constant 0 : i32
    %c0_i32_0 = arith.constant 0 : i32
    %c0_i32_1 = arith.constant 0 : i32
    return %c0_i32, %c0_i32_0 : i32, i32
  }
  func.func @transform_3(%arg0: i32) -> (i32, i32) {
    %c0_i32 = arith.constant 0 : i32
    %c0_i32_0 = arith.constant 0 : i32
    %c0_i32_1 = arith.constant 0 : i32
    return %c0_i32, %c0_i32_0 : i32, i32
  }
  func.func @transform_4(%arg0: i32) -> (i32, i32) {
    %c0_i32 = arith.constant 0 : i32
    %c0_i32_0 = arith.constant 0 : i32
    %c0_i32_1 = arith.constant 0 : i32
    return %c0_i32, %c0_i32_0 : i32, i32
  }
  func.func @transform_5(%arg0: i32) -> (i32, i32) {
    %c0_i32 = arith.constant 0 : i32
    %c0_i32_0 = arith.constant 0 : i32
    %c0_i32_1 = arith.constant 0 : i32
    return %c0_i32, %c0_i32_0 : i32, i32
  }
  func.func @transform_6(%arg0: i32) -> (i32, i32) {
    %c0_i32 = arith.constant 0 : i32
    %c0_i32_0 = arith.constant 0 : i32
    %c0_i32_1 = arith.constant 0 : i32
    return %c0_i32, %c0_i32_0 : i32, i32
  }
  func.func @transform_7(%arg0: i32) -> (i32, i32) {
    %c0_i32 = arith.constant 0 : i32
    %c0_i32_0 = arith.constant 0 : i32
    %c0_i32_1 = arith.constant 0 : i32
    return %c0_i32, %c0_i32_0 : i32, i32
  }
  func.func @transform_8(%arg0: i32) -> (i32, i32) {
    %c0_i32 = arith.constant 0 : i32
    %c0_i32_0 = arith.constant 0 : i32
    %c0_i32_1 = arith.constant 0 : i32
    return %c0_i32, %c0_i32_0 : i32, i32
  }
  func.func @transform_9(%arg0: i32) -> (i32, i32) {
    %c0_i32 = arith.constant 0 : i32
    %c0_i32_0 = arith.constant 0 : i32
    %c0_i32_1 = arith.constant 0 : i32
    return %c0_i32, %c0_i32_0 : i32, i32
  }
  func.func @transform_10(%arg0: i32) -> (i32, i32) {
    %c0_i32 = arith.constant 0 : i32
    %c0_i32_0 = arith.constant 0 : i32
    %c0_i32_1 = arith.constant 0 : i32
    return %c0_i32, %c0_i32_0 : i32, i32
  }
  func.func @transform_11(%arg0: i32) -> (i32, i32) {
    %c0_i32 = arith.constant 0 : i32
    %c0_i32_0 = arith.constant 0 : i32
    %c0_i32_1 = arith.constant 0 : i32
    return %c0_i32, %c0_i32_0 : i32, i32
  }
  func.func @transform_12(%arg0: i32) -> (i32, i32) {
    %c0_i32 = arith.constant 0 : i32
    %c0_i32_0 = arith.constant 0 : i32
    %c0_i32_1 = arith.constant 0 : i32
    return %c0_i32, %c0_i32_0 : i32, i32
  }
  func.func @transform_13(%arg0: i32) -> (i32, i32, i32) {
    %c0_i32 = arith.constant 0 : i32
    %c0_i32_0 = arith.constant 0 : i32
    %c0_i32_1 = arith.constant 0 : i32
    %c0_i32_2 = arith.constant 0 : i32
    return %c0_i32, %c0_i32_0, %c0_i32_1 : i32, i32, i32
  }
  func.func @transform_14(%arg0: i32) -> (i32, i32) {
    %c0_i32 = arith.constant 0 : i32
    %c0_i32_0 = arith.constant 0 : i32
    %c0_i32_1 = arith.constant 0 : i32
    return %c0_i32, %c0_i32_0 : i32, i32
  }
  func.func @transform_15(%arg0: i32) -> (i32, i32, i32) {
    %c0_i32 = arith.constant 0 : i32
    %c0_i32_0 = arith.constant 0 : i32
    %c0_i32_1 = arith.constant 0 : i32
    return %arg0, %c0_i32, %c0_i32_0 : i32, i32, i32
  }
}

</mosaic_0001>

<bundles_post_ra>
// kernel: tpu_custom_call.1
= control target key start
LH: loop header
LB: loop body
LE: loop exit
PB: predicated region body
PF: predicated region fallthrough
CT: control target
= control target key end

     0   :  { %s9424_s0 = inlined_call_operand.vmem [shape: f32[2,2,750], index: 0, kind: input, shape index: {}]   ;;  %s9425_s1 = inlined_call_operand.vmem [shape: f32[25,10], index: 1, kind: input, shape index: {}]   ;;  %s9426_s2 = inlined_call_operand.vmem [shape: f32[25,1], index: 2, kind: input, shape index: {}]   ;;  %s9427_s3 = inlined_call_operand.vmem [shape: bf16[745,373], index: 3, kind: input, shape index: {}]   ;;  %s9428_s4 = inlined_call_operand.hbm [shape: f32[50,125], index: 4, kind: input, shape index: {}]   ;;  %s9429_s5 = inlined_call_operand.vmem [shape: f32[50,1], index: 5, kind: input, shape index: {}]   ;;  %s9430_s6 = inlined_call_operand.vmem [shape: bf16[368,184], index: 6, kind: input, shape index: {}]   ;;  %s9431_s7 = inlined_call_operand.hbm [shape: f32[50,250], index: 7, kind: input, shape index: {}]   ;;  %s9432_s8 = inlined_call_operand.vmem [shape: f32[50,1], index: 8, kind: input, shape index: {}]   ;;  %s9433_s9 = inlined_call_operand.hbm [shape: bf16[179,90], index: 9, kind: input, shape index: {}]   ;;  %s9434_s10 = inlined_call_operand.hbm [shape: f32[50,250], index: 10, kind: input, shape index: {}]   ;;  %s9435_s11 = inlined_call_operand.vmem [shape: f32[50,1], index: 11, kind: input, shape index: {}]   ;;  %s9436_s12 = inlined_call_operand.vmem [shape: bf16[85,43], index: 12, kind: input, shape index: {}]   ;;  %s9437_s13 = inlined_call_operand.vmem [shape: f32[2,50,43], index: 13, kind: input, shape index: {}]   ;;  %s9438_s14 = inlined_call_operand.vmem [shape: f32[1,2], index: 14, kind: input, shape index: {}]   ;;  %s9439_s15 = inlined_call_operand.hbm [shape: f32[2,1,2], index: 15, kind: output, shape index: {}]  }
   0x1   :  { %9456 = sst [smem:[#allocation23_spill]] %s9431_s7 }
   0x2   :  { %9457 = sst [smem:[#allocation24_spill]] %s9438_s14 }
   0x3   :  { %9458 = sst [smem:[#allocation25_spill]] %s9439_s15 }
   0x4   :  { %20 = vsyncpa [#allocation3], 0 }
   0x5   :  { %21 = vsyncpa [#allocation6], 0 }
   0x6   :  { %22 = vsyncpa [#allocation9], 0 }
   0x7   :  { %23 = vsyncpa [#allocation4], 0 }
   0x8   :  { %25 = vsyncpa [#allocation4 + $0x1], 0  ;;  %s7057_s18 = smov 0   ;;  %s7059_s19 = smov 0  }
   0x9   :  { %s7061_s20 = smov 0   ;;  %s7063_s21 = smov 0  }
   0xa LB: > { %9459 = sst [smem:[#allocation15_spill]] %s6941_s18  ;;  %s7078_s22 = sadd.s32 4294967295, %s6953_s21   ;;  %s6953_s21 = sphi %s7063_s21, %s9515_s21   ;;  %s6949_s20 = sphi %s7061_s20, %s9518_s20   ;;  %s6945_s19 = sphi %s7059_s19, %s9517_s19   ;;  %s6941_s18 = sphi %s7057_s18, %s9516_s18  }
   0xb   : > { %9460 = sst [smem:[#allocation16_spill]] %s6945_s19  ;;  %s5134_s23 = sadd.s32 4294967294, %s6953_s21  }
   0xc   : > { %9461 = sst [smem:[#allocation17_spill]] %s6949_s20  ;;  %s7082_s24 = sadd.s32 1, %s6953_s21  }
   0xd   : > { %9462 = sst [smem:[#allocation18_spill]] %s6953_s21  ;;  %s358_s25 = sadd.s32 1, %s6949_s20 }
   0xe   : > { %9463 = sst [smem:[#allocation19_spill]] %s7082_s24  ;;  %s355_s26 = ssub.s32 %s6953_s21, %s7082_s24 }
   0xf   : > { %p368_p0 = scmp.ne.s32.totalorder %s6949_s20, %s6945_s19  ;;  %p356_p1 = scmp.eq.s32.totalorder %s355_s26, 0 }
  0x10   : > { %p369_p2 = scmp.eq.s32.totalorder %s7078_s22, 1  ;;  %p374_p3 = scmp.ne.s32.totalorder %s6945_s19, %s6941_s18 }
  0x11   : > { %p375_p4 = scmp.eq.s32.totalorder %s5134_s23, 1  ;;  %p5135_p7 = scmp.ge.s32.totalorder %s6953_s21, 1 }
  0x12   : > { %s7093_s27 = scalar_select %p356_p1, %s6949_s20, %s358_s25  }
  0x13   : > { %p7095_p5 = por %p369_p2, %p368_p0  ;;  %p7099_p6 = por %p375_p4, %p374_p3 }
  0x14   : > { %9464 = sst [smem:[#allocation20_spill]] %s7093_s27  ;;  %p382_p8 = scmp.lt.s32.totalorder %s6953_s21, 3 }
  0x15   : > { %s9465_s28 = scalar_select %p7095_p5, 1, 0 }
  0x16   : > { %s9467_s29 = scalar_select %p7099_p6, 1, 0 }
  0x17   : > { %9466 = sst [smem:[#allocation21_spill]] %s9465_s28  ;;  %p9446_p9 = scmp.eq.s32.totalorder %s7078_s22, 0 }
  0x18   : > { %9468 = sst [smem:[#allocation22_spill]] %s9467_s29  ;;  %p7106_p10 = pnand %p5135_p7, %p382_p8 }
  0x19   : > { %s6955_s16 = smov [#allocation5]   ;;  %s6956_s25 = smov [#allocation2]  }
  0x1a   : > { %s9469_s30 = scalar_select %p7106_p10, 1, 0 }
  0x1b   : > { %s422_s17 = sshll.u32 %s6955_s16, 4  ;;  %p5888_p11 = pneg %p7106_p10  ;;  %s423_s17 = int_to_ptr.vmem [resolvable:$true] %s422_s17 }
  0x1c   : > { %s403_s26 = sshll.u32 %s6956_s25, 4  ;;  %s9471_s7 = sld [smem:[#allocation23_spill]]  ;;  %s7118_s26 = int_to_ptr.vmem [resolvable:$true] %s403_s26 }
  0x1d   : > { %p7114_p12 = pnand %p9446_p9, %p5888_p11 }
  0x1f   : > { %p7128_p0 = pneg %p7114_p12 }
  0x22   : > { %s6767_s24 = scalar_lea.hbm %s9471_s7, 1792 }
  0x23   : > { %p6768_p13 = scmp.ne.s32.totalorder %s9471_s7, %s6767_s24  ;;  %p6774_p3 = scmp.lt.u32.totalorder %s6767_s24, %s9471_s7 }
  0x25   : > { %p6770_p1 = pnand %p7128_p0, %p6768_p13 }
  0x27   : > { %p6771_p2 = pneg %p6770_p1 }
  0x29   : > { %p6776_p4 = pnand %p6774_p3, %p6771_p2 }
  0x2b   : > { %6779 = shalt.err (!%p6776_p4)
}
  0x2c   : > { %s6780_s20 = scalar_lea.vmem %s423_s17, 1792  ;;  %p6788_p9 = scmp.lt.s32.totalorder %s423_s17, %s423_s17 }
  0x2d   : > { %p6781_p7 = scmp.ne.s32.totalorder %s423_s17, %s6780_s20  ;;  %p6789_p6 = scmp.lt.s32.totalorder %s6780_s20, %s6780_s20 }
  0x2f   : > { %p6783_p8 = pnand %p6781_p7, %p7128_p0  ;;  %p6790_p5 = por %p6789_p6, %p6788_p9 }
  0x31   : > { %p6784_p11 = pneg %p6783_p8 }
  0x33   : > { %p6791_p10 = pnand %p6790_p5, %p6784_p11 }
  0x35   : > { %6794 = shalt.err (!%p6791_p10)
}
  0x36   : > { %s9453_s18 = smov 256   ;;  %s9454_s27 = smov 16  }
  0x37   : > { %5894 = dma.hbm_to_vmem [thread:$0]  (!%p7114_p12), %s9471_s7, 1792, %s423_s17, [#allocation6], %s9453_s18, %s9453_s18, %s9454_s27  }
  0x38   : > { %s6795_s15 = scalar_lea.hbm %s9428_s4, 896 }
  0x39   : > { %p6796_p5 = scmp.ne.s32.totalorder %s9428_s4, %s6795_s15  ;;  %p6802_p10 = scmp.lt.u32.totalorder %s6795_s15, %s9428_s4 }
  0x3b   : > { %p6798_p6 = pnand %p6796_p5, %p7128_p0 }
  0x3d   : > { %p6799_p9 = pneg %p6798_p6 }
  0x3f   : > { %p6804_p13 = pnand %p6802_p10, %p6799_p9 }
  0x41   : > { %6807 = shalt.err (!%p6804_p13)
}
  0x42   : > { %s6808_s17 = scalar_lea.vmem %s7118_s26, 896  ;;  %p6816_p4 = scmp.lt.s32.totalorder %s7118_s26, %s7118_s26 }
  0x43   : > { %p6809_p1 = scmp.ne.s32.totalorder %s7118_s26, %s6808_s17  ;;  %p6817_p7 = scmp.lt.s32.totalorder %s6808_s17, %s6808_s17 }
  0x45   : > { %p6811_p2 = pnand %p6809_p1, %p7128_p0  ;;  %p6818_p8 = por %p6817_p7, %p6816_p4 }
  0x47   : > { %p6812_p3 = pneg %p6811_p2 }
  0x49   : > { %p6819_p11 = pnand %p6818_p8, %p6812_p3 }
  0x4b   : > { %6822 = shalt.err (!%p6819_p11)
}
  0x4c   : > { %s6959_s14 = smov 128   ;;  %s6960_s15 = smov 8  }
  0x4d   : > { %5891 = dma.hbm_to_vmem [thread:$0]  (!%p7114_p12), %s9428_s4, 896, %s7118_s26, [#allocation3], %s6959_s14, %s6959_s14, %s6960_s15  }
  0x4e   : > { %s6961_s21 = smov [#allocation7]   ;;  %s6823_s20 = scalar_lea.hbm %s9433_s9, 1472 }
  0x4f   : > { %s438_s24 = sshll.u32 %s6961_s21, 4  ;;  %p6824_p5 = scmp.ne.s32.totalorder %s9433_s9, %s6823_s20  ;;  %s439_s24 = int_to_ptr.vmem [resolvable:$true] %s438_s24 }
  0x50   : > { %p6830_p10 = scmp.lt.u32.totalorder %s6823_s20, %s9433_s9 }
  0x51   : > { %p6826_p6 = pnand %p6824_p5, %p7128_p0 }
  0x53   : > { %p6827_p9 = pneg %p6826_p6 }
  0x55   : > { %p6832_p13 = pnand %p6830_p10, %p6827_p9 }
  0x57   : > { %6835 = shalt.err (!%p6832_p13)
}
  0x58   : > { %s6836_s26 = scalar_lea.vmem %s439_s24, 1472  ;;  %p6844_p4 = scmp.lt.s32.totalorder %s439_s24, %s439_s24 }
  0x59   : > { %p6837_p1 = scmp.ne.s32.totalorder %s439_s24, %s6836_s26  ;;  %p6845_p7 = scmp.lt.s32.totalorder %s6836_s26, %s6836_s26 }
  0x5b   : > { %p6839_p2 = pnand %p6837_p1, %p7128_p0  ;;  %p6846_p8 = por %p6845_p7, %p6844_p4 }
  0x5d   : > { %p6840_p3 = pneg %p6839_p2 }
  0x5f   : > { %p6847_p11 = pnand %p6846_p8, %p6840_p3 }
  0x61   : > { %6850 = shalt.err (!%p6847_p11)
}
  0x62   : > { %s6962_s18 = smov 64   ;;  %s6963_s14 = smov 4  }
  0x63   : > { %5897 = dma.hbm_to_vmem [thread:$0]  (!%p7114_p12), %s9433_s9, 1472, %s439_s24, [#allocation6], %s6962_s18, %s6962_s18, %s6963_s14  }
  0x64   : > { %s6964_s15 = smov [#allocation8]   ;;  %s6851_s29 = scalar_lea.hbm %s9434_s10, 1792 }
  0x65   : > { %s451_s19 = sshll.u32 %s6964_s15, 4  ;;  %p6852_p5 = scmp.ne.s32.totalorder %s9434_s10, %s6851_s29  ;;  %s452_s19 = int_to_ptr.vmem [resolvable:$true] %s451_s19 }
  0x66   : > { %p6858_p10 = scmp.lt.u32.totalorder %s6851_s29, %s9434_s10 }
  0x67   : > { %p6854_p6 = pnand %p6852_p5, %p7128_p0 }
  0x69   : > { %p6855_p9 = pneg %p6854_p6 }
  0x6b   : > { %p6860_p13 = pnand %p6858_p10, %p6855_p9 }
  0x6d   : > { %6863 = shalt.err (!%p6860_p13)
}
  0x6e   : > { %s6864_s24 = scalar_lea.vmem %s452_s19, 1792  ;;  %p6872_p4 = scmp.lt.s32.totalorder %s452_s19, %s452_s19 }
  0x6f   : > { %p6865_p1 = scmp.ne.s32.totalorder %s452_s19, %s6864_s24  ;;  %p6873_p7 = scmp.lt.s32.totalorder %s6864_s24, %s6864_s24 }
  0x71   : > { %p6867_p2 = pnand %p6865_p1, %p7128_p0  ;;  %p6874_p8 = por %p6873_p7, %p6872_p4 }
  0x73   : > { %p6868_p3 = pneg %p6867_p2 }
  0x75   : > { %p6875_p11 = pnand %p6874_p8, %p6868_p3 }
  0x77   : > { %6878 = shalt.err (!%p6875_p11)
}
  0x78   : > { %s9473_s18 = smov 16   ;;  %s9474_s14 = smov 256  }
  0x79   : > { %5900 = dma.hbm_to_vmem [thread:$0]  (!%p7114_p12), %s9434_s10, 1792, %s452_s19, [#allocation9], %s9474_s14, %s9474_s14, %s9473_s18  }
  0x7a   : > { %p9475_p5 = scmp.ne.s32.totalorder %s9469_s30, 0 }
  0x7b   : > { %p9476_p0 = scmp.eq.s32.totalorder (!%p9475_p5), %s7078_s22, 0 }
  0x7c   : > { %487 = sbr.rel (%p9475_p5) target bundleno = 3469 (0xd8d), region = 80 }
  0x83   : > { %6924 = dma.done.wait (%p9476_p0), [#allocation3], 896   ;;  %p9477_p6 = pmov %p9476_p0 }
  0x84   : > { %p9478_p9 = pmov %p9476_p0 }
  0x85   : > { %6926 = vsyncadd (%p9477_p6), [#allocation3], 4294966400 }
  0x86   : > { %6928 = dma.done.wait (%p9478_p9), [#allocation6], 3264   ;;  %p9479_p10 = pmov %p9476_p0 }
  0x87   : > { %p9480_p13 = pmov %p9476_p0 }
  0x88   : > { %6930 = vsyncadd (%p9479_p10), [#allocation6], 4294964032 }
  0x89   : > { %6932 = dma.done.wait (%p9480_p13), [#allocation9], 1792   ;;  %p9481_p12 = pmov %p9476_p0 }
  0x8a   : > { %p546_p1 = scmp.lt.s32.totalorder %s7078_s22, 1  ;;  %v564_v0 = vlaneseq  ;;  %v6965_v1 = vmov 1983009808   ;;  %s6966_s28 = smov 127   ;;  %v6970_v31 = vmov 0.0   ;;  %v725_v35 = vld [vmem:[%s9426_s2] sm:$0xff] }
  0x8b   : > { %6934 = vsyncadd (%p9481_p12), [#allocation9], 4294965504  ;;  %v562_v2 = vunpack.c.l.s4 %v6965_v1  ;;  %s6967_s21 = smov 126   ;;  %s6968_s29 = smov 125   ;;  %838 = vmatprep.mubr.f32.mxu0 %v6970_v31  ;;  %927 = vmatprep.mubr.f32.mxu1 %v6970_v31  ;;  %v726_v36 = vld [vmem:[%s9426_s2 + $0x8] sm:$0xff]  ;;  %v6971_v37 = vmov 0  }
  0x8c   : > { %s547_s30 = scalar_select %p546_p1, %s7078_s22, 1  ;;  %v565_v3 = vshrl.u32 %v564_v0, 7  ;;  %6007 = vset.pattern.permute.xlu0 %v6971_v37  ;;  %6008 = vset.pattern.permute.xlu1 %v6971_v37  ;;  %v728_v38 = vld [vmem:[%s9426_s2 + $0x18] sm:$0x1]  ;;  %v727_v39 = vld [vmem:[%s9426_s2 + $0x10] sm:$0xff]  ;;  %vm621_vm0 = vcmask 1039360  }
  0x8d   : > { %v563_v4 = vunpack.c.0.s8 %v562_v2  ;;  %s6969_s25 = smov 124   ;;  %vm648_vm1 = vcmask 1031168   ;;  %vm704_vm2 = vcmask 1041408   ;;  %vm711_vm3 = vcmask 1043456   ;;  %s9505_s14 = sld [smem:[#allocation16_spill]] }
  0x8e   : > { %s5869_s23 = smul.u32 12, %s547_s30  ;;  %vm674_vm4 = vcmask 1022976   ;;  %vm698_vm5 = vcmask 1014784   ;;  %vm9455_vm6 = vcmask 1045504   ;;  %vm6972_vm7 = vmmov 1   ;;  %s9506_s27 = sld [smem:[#allocation21_spill]] }
  0x8f   : > { %v566_v5 = vsub.s32 %v563_v4, %v565_v3  ;;  %vm7319_vm8 = vmpackc.low %vm704_vm2, %vm6972_vm7  ;;  %vm749_vm9 = vcmask 80896   ;;  %vm2130_vm10 = vcmask 859136   ;;  %vm2137_vm11 = vcmask 1044480   ;;  %s9508_s20 = sld [smem:[#allocation25_spill]] }
  0x90   : > { %s550_s19 = scalar_lea.vmem %s9424_s0, %s5869_s23  ;;  %vm2510_vm14 = vcmask 1040384   ;;  %vm2641_vm15 = vcmask 1042432   ;;  %s9507_s23 = sld [smem:[#allocation24_spill]] }
  0x91   : > { %v553_v6 = vld [vmem:[%s550_s19 + $0x8] sm:$0xf]  ;;  %v552_v7 = vld [vmem:[%s550_s19] sm:$0xff] }
  0x92   : > { %v600_v8 = vcombine.low %v553_v6, %v553_v6  ;;  %v560_v9 = vcombine.high %v552_v7, %v552_v7  ;;  %v7228_v10 = vrot.slane %v552_v7, %v566_v5  ;;  %v7230_v11 = vrot.slane %v553_v6, %v566_v5 }
  0x93   : > { %v591_v12 = vcombine.low %v552_v7, %v552_v7  ;;  %s544_s7 = sand.u32 1, %s9505_s14  }
  0x94   : > { %v607_v13 = vrot.slane %v600_v8, %v566_v5  ;;  %v7234_v14 = vcombine.high %v7228_v10, %v7228_v10  ;;  %v7236_v15 = vrot.slane %v560_v9, %v566_v5  ;;  %v633_v17 = vcombine.low %v7228_v10, %v7228_v10  ;;  %s5026_s26 = scalar_lea.sflag [#allocation4], %s544_s7  ;;  %p9510_p3 = scmp.ne.s32.totalorder %s9506_s27, 0 }
  0x95   : > { %v598_v16 = vrot.slane %v591_v12, %v566_v5  ;;  %v635_v18 = vcombine.low %v7230_v11, %v7230_v11  ;;  %v7276_v34 = vcombine.high %v7230_v11, %v7230_v11  ;;  %s9509_s17 = smov %s9508_s20 }
  0x96   : > { %617 = vrot.lane.b32.xlu1 %v607_v13, %s6966_s28  ;;  %v634_v19 = vcombine.low %v7236_v15, %v7236_v15  ;;  %v5972_v21 = vpack.i.bf16 %v7236_v15, %v633_v17  ;;  %v5997_v28 = vpack.i.bf16 %v7236_v15, %v7234_v14  ;;  %v661_v29 = vcombine.low %v607_v13, %v607_v13 }
  0x97   : > { %v5967_v20 = vpack.i.bf16 %v7234_v14, %v598_v16  ;;  %v660_v23 = vcombine.low %v598_v16, %v598_v16  ;;  %v5977_v24 = vpack.i.bf16 %v633_v17, %v598_v16  ;;  %v599_v25 = vcombine.high %v598_v16, %v598_v16 }
  0x98   : > { %v5987_v22 = vpack.i.bf16 %v634_v19, %v7228_v10  ;;  %v7261_v30 = vcombine.high %v7236_v15, %v7236_v15  ;;  %v608_v33 = vcombine.high %v607_v13, %v607_v13 }
  0x99   : > { %5968 = vrot.lane.b32.xlu0 %v5967_v20, %s6966_s28  ;;  %v5992_v26 = vpack.i.bf16 %v7228_v10, %v660_v23  ;;  %v5982_v27 = vpack.i.bf16 %v7228_v10, %v599_v25 }
  0x9a   : > { %644 = vrot.lane.b32.xlu1 %v635_v18, %s6967_s21  ;;  %v6002_v32 = vpack.i.bf16 %v7261_v30, %v7228_v10 }
  0x9d   : > { %5973 = vrot.lane.b32.xlu0 %v5972_v21, %s6967_s21 }
  0x9e   : > { %5988 = vrot.lane.b32.xlu1 %v5987_v22, %s6967_s21 }
  0xa1   : > { %5978 = vrot.lane.b32.xlu0 %v5977_v24, %s6968_s29 }
  0xa2   : > { %5993 = vrot.lane.b32.xlu1 %v5992_v26, %s6968_s29 }
  0xa5   : > { %5983 = vrot.lane.b32.xlu0 %v5982_v27, %s6966_s28 }
  0xa6   : > { %5998 = vrot.lane.b32.xlu1 %v5997_v28, %s6969_s25 }
  0xa9   : > { %670 = vrot.lane.b32.xlu0 %v661_v29, %s6968_s29 }
  0xaa   : > { %694 = vrot.lane.b32.xlu1 %v7230_v11, %s6969_s25 }
  0xad   : > { %6003 = vrot.lane.b32.xlu0 %v6002_v32, %s6969_s25 }
  0xae   : > { %646 = vrot.lane.b32.xlu1 %v7230_v11, %s6967_s21 }
  0xb1   : > { %619 = vrot.lane.b32.xlu0 %v608_v33, %s6966_s28 }
  0xb2   : > { %696 = vrot.lane.b32.xlu1 %v7276_v34, %s6969_s25 }
  0xb5   : > { %672 = vrot.lane.b32.xlu0 %v607_v13, %s6968_s29 }
  0xb6   : > { %736 = vperm.xlu1 %6008, %v726_v36  }
  0xb9   : > { %731 = vperm.xlu0 %6007, %v725_v35  }
  0xba   : > { %741 = vperm.xlu1 %6008, %v727_v39  }
  0xbd   : > { %746 = vperm.xlu0 %6007, %v728_v38  }
 0x108   : > { %v7296_v40 = vpop.permute.xlu1 %617 }
 0x10b   : > { %v5969_v41 = vpop.permute.xlu0 %5968 }
 0x10c   : > { %v7298_v42 = vpop.permute.xlu1 %644  ;;  %v5971_v45 = vunpack.i.h.bf16 %v5969_v41  ;;  %v5970_v49 = vunpack.i.l.bf16 %v5969_v41 }
 0x10e   : > { %v625_v48 = vsel %vm621_vm0, %v5971_v45, %v7296_v40 }
 0x10f   : > { %v5974_v43 = vpop.permute.xlu0 %5973  ;;  %v708_v22 = vsel %vm704_vm2, %v7261_v30, %v625_v48 }
 0x110   : > { %v5989_v44 = vpop.permute.xlu1 %5988  ;;  %v5976_v58 = vunpack.i.h.bf16 %v5974_v43  ;;  %v5975_v59 = vunpack.i.l.bf16 %v5974_v43 }
 0x111   : > { %v5991_v50 = vunpack.i.h.bf16 %v5989_v44  ;;  %v5990_v51 = vunpack.i.l.bf16 %v5989_v44 }
 0x113   : > { %v5979_v46 = vpop.permute.xlu0 %5978  ;;  %v650_v1 = vsel %vm648_vm1, %v5990_v51, %v5991_v50  ;;  %v649_v16 = vsel %vm648_vm1, %v5975_v59, %v5990_v51  ;;  %v651_v18 = vsel %vm648_vm1, %v5991_v50, %v5976_v58  ;;  %v6492_v59 = vld [vmem:[%s9427_s3] ss:$12 sps:$4 sm:$0xff]  }
 0x114   : > { %v5994_v47 = vpop.permute.xlu1 %5993  ;;  %v5981_v53 = vunpack.i.h.bf16 %v5979_v46  ;;  %v5980_v54 = vunpack.i.l.bf16 %v5979_v46 }
 0x115   : > { %v5996_v2 = vunpack.i.h.bf16 %v5994_v47  ;;  %v5995_v7 = vunpack.i.l.bf16 %v5994_v47 }
 0x116   : > { %v676_v9 = vsel %vm674_vm4, %v5980_v54, %v5981_v53 }
 0x117   : > { %v5984_v52 = vpop.permute.xlu0 %5983  ;;  %v675_v27 = vsel %vm674_vm4, %v5995_v7, %v5980_v54  ;;  %v677_v33 = vsel %vm674_vm4, %v5981_v53, %v5996_v2  ;;  %v6501_v7 = vld [vmem:[%s9427_s3 + $0x48] ss:$12 sps:$4 sm:$0xff]  }
 0x118   : > { %v5986_v55 = vunpack.i.h.bf16 %v5984_v52  ;;  %v5985_v56 = vunpack.i.l.bf16 %v5984_v52  ;;  %v5999_v57 = vpop.permute.xlu1 %5998 }
 0x119   : > { %v6001_v60 = vunpack.i.h.bf16 %v5999_v57  ;;  %v6000_v61 = vunpack.i.l.bf16 %v5999_v57  ;;  %v556_v57 = vld [vmem:[%s9425_s1 + $0x10] sm:$0xff] }
 0x11a   : > { %v624_v62 = vsel %vm621_vm0, %v5986_v55, %v5971_v45  ;;  %v622_v63 = vsel %vm621_vm0, %v5970_v49, %v5985_v56  ;;  %v623_v0 = vsel %vm621_vm0, %v5985_v56, %v5986_v55  ;;  %v554_v49 = vld [vmem:[%s9425_s1] sm:$0xff] }
 0x11b   : > { %v671_v3 = vpop.permute.xlu0 %670  ;;  %v700_v4 = vsel %vm698_vm5, %v6000_v61, %v6001_v60  ;;  %v706_v5 = vsel %vm704_vm2, %v7234_v14, %v623_v0  ;;  %v705_v6 = vsel %vm704_vm2, %v7228_v10, %v622_v63  ;;  %v707_v13 = vsel %vm704_vm2, %v7236_v15, %v624_v62  ;;  %v6495_v62 = vld [vmem:[%s9427_s3 + $0x18] ss:$12 sps:$4 sm:$0xff]   ;;  %v6500_v63 = vld [vmem:[%s9427_s3 + $0x34] ss:$12 sps:$4 sm:$0xff]  }
 0x11c   : > { %v695_v8 = vpop.permute.xlu1 %694  ;;  %v713_v12 = vsel %vm711_vm3, %v706_v5, %v650_v1  ;;  %v652_v10 = vsel %vm648_vm1, %v5976_v58, %v7298_v42  ;;  %v678_v19 = vsel %vm674_vm4, %v5996_v2, %v671_v3  ;;  %v712_v15 = vsel %vm711_vm3, %v705_v6, %v649_v16  ;;  %v557_v58 = vld [vmem:[%s9425_s1 + $0x18] sm:$0x1]  ;;  %v6519_v0 = vld [vmem:[%s9427_s3 + $0xc8] ss:$12 sps:$4 sm:$0xff]   ;;  %v6498_v2 = vld [vmem:[%s9427_s3 + $0x30] ss:$12 sps:$4 sm:$0xff]  }
 0x11d   : > { %v720_v17 = vsel %vm9455_vm6, %v713_v12, %v676_v9  ;;  %v714_v23 = vsel %vm711_vm3, %v707_v13, %v651_v18  ;;  %v715_v28 = vsel %vm711_vm3, %v708_v22, %v652_v10  ;;  %v719_v29 = vsel %vm9455_vm6, %v712_v15, %v675_v27  ;;  %v6520_v1 = vld [vmem:[%s9427_s3 + $0x8] ss:$12 sps:$4 sm:$0xff]   ;;  %v6525_v5 = vld [vmem:[%s9427_s3 + $0x20] ss:$12 sps:$4 sm:$0xff]   ;;  %v6529_v6 = vld [vmem:[%s9427_s3 + $0xf8] ss:$12 sps:$4 sm:$0xff]  }
 0x11e   : > { %v5645_v20 = vpack.c.bf16 %v700_v4, %v720_v17  ;;  %v722_v32 = vsel %vm9455_vm6, %v715_v28, %v678_v19  ;;  %v721_v38 = vsel %vm9455_vm6, %v714_v23, %v677_v33  ;;  %v6503_v4 = vld [vmem:[%s9427_s3 + $0x4c] ss:$12 sps:$4 sm:$0xff]   ;;  %v6534_v12 = vld [vmem:[%s9427_s3 + $0x110] ss:$12 sps:$4 sm:$0xff]   ;;  %v6539_v10 = vld [vmem:[%s9427_s3 + $0x128] ss:$12 sps:$4 sm:$0xff]  }
 0x11f   : > { %v6004_v21 = vpop.permute.xlu0 %6003  ;;  %v6530_v9 = vld [vmem:[%s9427_s3 + $0x38] ss:$12 sps:$4 sm:$0xff]   ;;  %v6504_v13 = vld [vmem:[%s9427_s3 + $0x60] ss:$12 sps:$4 sm:$0xff]   ;;  %v6509_v16 = vld [vmem:[%s9427_s3 + $0x7c] ss:$12 sps:$4 sm:$0xff]  }
 0x120   : > { %v6006_v24 = vunpack.i.h.bf16 %v6004_v21  ;;  %v6005_v25 = vunpack.i.l.bf16 %v6004_v21  ;;  %5647 = vmatprep.subr.msk.bf16.mxu0 %vm7319_vm8, %v5645_v20  ;;  %v647_v26 = vpop.permute.xlu1 %646  ;;  %v6535_v17 = vld [vmem:[%s9427_s3 + $0x50] ss:$12 sps:$4 sm:$0xff]   ;;  %v6507_v18 = vld [vmem:[%s9427_s3 + $0x78] ss:$12 sps:$4 sm:$0xff]   ;;  %v6512_v19 = vld [vmem:[%s9427_s3 + $0x94] ss:$12 sps:$4 sm:$0xff]  }
 0x121   : > { %v6540_v20 = vld [vmem:[%s9427_s3 + $0x68] ss:$12 sps:$4 sm:$0xff]   ;;  %v6544_v15 = vld [vmem:[%s9427_s3 + $0x140] ss:$12 sps:$4 sm:$0xff]   ;;  %v6510_v21 = vld [vmem:[%s9427_s3 + $0x90] ss:$12 sps:$4 sm:$0xff]  }
 0x122   : > { %v699_v30 = vsel %vm698_vm5, %v6005_v25, %v6000_v61  ;;  %v702_v35 = vsel %vm698_vm5, %v6006_v24, %v695_v8  ;;  %v701_v36 = vsel %vm698_vm5, %v6001_v60, %v6006_v24  ;;  %v6494_v60 = vld [vmem:[%s9427_s3 + $0x4] ss:$12 sps:$4 sm:$0xff]   ;;  %v6497_v61 = vld [vmem:[%s9427_s3 + $0x1c] ss:$12 sps:$4 sm:$0xff]   ;;  %v6515_v22 = vld [vmem:[%s9427_s3 + $0xac] ss:$12 sps:$4 sm:$0xff]  }
 0x123   : > { %v620_v39 = vpop.permute.xlu0 %619  ;;  %v5648_v41 = vpack.c.bf16 %v699_v30, %v719_v29  ;;  %v5651_v43 = vpack.c.bf16 %v702_v35, %v722_v32  ;;  %v5654_v44 = vpack.c.bf16 %v701_v36, %v721_v38  ;;  %v6513_v23 = vld [vmem:[%s9427_s3 + $0xa8] ss:$12 sps:$4 sm:$0xff]   ;;  %v6518_v24 = vld [vmem:[%s9427_s3 + $0xc4] ss:$12 sps:$4 sm:$0xff]   ;;  %v6516_v25 = vld [vmem:[%s9427_s3 + $0xc0] ss:$12 sps:$4 sm:$0xff]  }
 0x124   : > { %v626_v45 = vsel %vm621_vm0, %v7296_v40, %v620_v39  ;;  %v710_v46 = vsel %vm704_vm2, %v7276_v34, %v620_v39  ;;  %v697_v40 = vpop.permute.xlu1 %696  ;;  %v6521_v27 = vld [vmem:[%s9427_s3 + $0xd8] ss:$12 sps:$4 sm:$0xff]   ;;  %v6528_v28 = vld [vmem:[%s9427_s3 + $0xf4] ss:$12 sps:$4 sm:$0xff]   ;;  %v6526_v29 = vld [vmem:[%s9427_s3 + $0xf0] ss:$12 sps:$4 sm:$0xff]  }
 0x125   : > { %v709_v47 = vsel %vm704_vm2, %v7230_v11, %v626_v45  ;;  %5650 = vmatpush1.bf16.msk.msra.mxu0 %vm7319_vm8, %v5648_v41  ;;  %5653 = vmatprep.subr.msk.bf16.mxu1 %vm7319_vm8, %v5651_v43  ;;  %v717_v48 = vsel %vm711_vm3, %v710_v46, %v647_v26  ;;  %v653_v11 = vsel %vm648_vm1, %v7298_v42, %v647_v26  ;;  %v555_v42 = vld [vmem:[%s9425_s1 + $0x8] sm:$0xff]  ;;  %v6538_v30 = vld [vmem:[%s9427_s3 + $0x124] ss:$12 sps:$4 sm:$0xff]   ;;  %v6548_v43 = vld [vmem:[%s9427_s3 + $0x154] ss:$12 sps:$4 sm:$0xff]  }
 0x126   : > { %5656 = vmatpush1.bf16.msk.msra.mxu1 %vm7319_vm8, %v5654_v44  ;;  %v716_v50 = vsel %vm711_vm3, %v709_v47, %v653_v11  ;;  %v703_v53 = vsel %vm698_vm5, %v695_v8, %v697_v40  ;;  %v6506_v8 = vld [vmem:[%s9427_s3 + $0x64] ss:$12 sps:$4 sm:$0xff]   ;;  %v6523_v26 = vld [vmem:[%s9427_s3 + $0xdc] ss:$12 sps:$4 sm:$0xff]   ;;  %v6533_v32 = vld [vmem:[%s9427_s3 + $0x10c] ss:$12 sps:$4 sm:$0xff]  }
 0x127   : > { %v673_v34 = vpop.permute.xlu0 %672  ;;  %2149 = vmatprep.subr.bf16.mxu1 %v6494_v60  ;;  %v6531_v33 = vld [vmem:[%s9427_s3 + $0x108] ss:$12 sps:$4 sm:$0xff]   ;;  %v6536_v35 = vld [vmem:[%s9427_s3 + $0x120] ss:$12 sps:$4 sm:$0xff]   ;;  %v6541_v38 = vld [vmem:[%s9427_s3 + $0x138] ss:$12 sps:$4 sm:$0xff]  }
 0x128   : > { %v679_v51 = vsel %vm674_vm4, %v671_v3, %v673_v34  ;;  %v724_v52 = vsel %vm9455_vm6, %v717_v48, %v673_v34  ;;  %5149 = vmatmul.mubr.msk.f32.vlgmr.msra.gmra.mrb[0].mxu0 %vm749_vm9, %v554_v49  ;;  %v6524_v3 = vld [vmem:[%s9427_s3 + $0xe0] ss:$12 sps:$4 sm:$0xff]   ;;  %v6543_v36 = vld [vmem:[%s9427_s3 + $0x13c] ss:$12 sps:$4 sm:$0xff]   ;;  %v6549_v44 = vld [vmem:[%s9427_s3 + $0x158] ss:$12 sps:$4 sm:$0xff]  }
 0x129   : > { %v723_v54 = vsel %vm9455_vm6, %v716_v50, %v679_v51  ;;  %v5657_v55 = vpack.c.bf16 %v697_v40, %v724_v52  ;;  %5155 = vmatmul.mubr.msk.f32.vlgmr.msra.gmra.mrb[0].mxu1 %vm749_vm9, %v554_v49  ;;  %844 = vmatprep.mubr.f32.mxu0 %v6970_v31  ;;  %v6545_v39 = vld [vmem:[%s9427_s3 + $0x80] ss:$12 sps:$4 sm:$0xff]   ;;  %v6546_v41 = vld [vmem:[%s9427_s3 + $0x150] ss:$12 sps:$4 sm:$0xff]   ;;  %v6550_v45 = vld [vmem:[%s9427_s3 + $0x98] ss:$12 sps:$4 sm:$0xff]  }
 0x12a   : > { %v5660_v56 = vpack.c.bf16 %v703_v53, %v723_v54  ;;  %933 = vmatprep.mubr.f32.mxu1 %v6970_v31  ;;  %2150 = vmatpush1.bf16.msra.mxu1 %v6492_v59  ;;  %v6553_v46 = vld [vmem:[%s9427_s3 + $0x16c] ss:$12 sps:$4 sm:$0xff]   ;;  %v6554_v47 = vld [vmem:[%s9427_s3 + $0x170] ss:$12 sps:$4 sm:$0xff]   ;;  %v6551_v40 = vld [vmem:[%s9427_s3 + $0x168] ss:$12 sps:$4 sm:$0xff]  }
 0x12b   : > { %5659 = vmatprep.subr.msk.bf16.mxu0 %vm7319_vm8, %v5657_v55  ;;  %2151 = vmatprep.subr.bf16.mxu1 %v6497_v61  ;;  %v6555_v11 = vld [vmem:[%s9427_s3 + $0xb0] ss:$12 sps:$4 sm:$0xff]   ;;  %v4430_v14 = vld [vmem:[#allocation8 + $0x40] sm:$0xff] }
 0x12c   : > { %5150 = vmatmul.mubr.msk.f32.gmra.mrb[2].mxu0 %vm749_vm9, %v555_v42  ;;  %v6558_v55 = vld [vmem:[%s9427_s3 + $0x184] ss:$12 sps:$4 sm:$0xff]  }
 0x12d   : > { %5662 = vmatpush1.bf16.msk.msra.mxu0 %vm7319_vm8, %v5660_v56  ;;  %5156 = vmatmul.mubr.msk.f32.gmra.mrb[2].mxu1 %vm749_vm9, %v555_v42 }
 0x12e   : > { %850 = vmatprep.mubr.f32.mxu0 %v6970_v31  ;;  %939 = vmatprep.mubr.f32.mxu1 %v6970_v31 }
 0x12f   : > { %2152 = vmatpush1.bf16.msra.mxu1 %v6495_v62  ;;  %5430 = vmatprep.subr.bf16.mxu0 %v6519_v0 }
 0x130   : > { %5151 = vmatmul.mubr.msk.f32.gmra.mrb[4].mxu0 %vm749_vm9, %v556_v57  ;;  %2153 = vmatprep.subr.bf16.mxu1 %v6500_v63 }
 0x131   : > { %5157 = vmatmul.mubr.msk.f32.gmra.mrb[4].mxu1 %vm749_vm9, %v556_v57  ;;  %856 = vmatprep.mubr.f32.mxu0 %v6970_v31 }
 0x132   : > { %945 = vmatprep.mubr.f32.mxu1 %v6970_v31 }
 0x133   : > { %2154 = vmatpush1.bf16.msra.mxu1 %v6498_v2 }
 0x134   : > { %5152 = vmatmul.mubr.msk.f32.gmra.mrb[6].mxu0 %vm749_vm9, %v557_v58  ;;  %2155 = vmatprep.subr.bf16.mxu1 %v6503_v4 }
 0x135   : > { %5158 = vmatmul.mubr.msk.f32.gmra.mrb[6].mxu1 %vm749_vm9, %v557_v58  ;;  %1016 = vmatprep.mubr.f32.mxu0 %v6970_v31  ;;  %v737_v51 = vpop.permute.xlu1 %736 }
 0x137   : > { %2156 = vmatpush1.bf16.msra.mxu1 %v6501_v7 }
 0x138   : > { %5161 = vmatmul.mubr.msk.f32.vlgmr.msra.gmra.mrb[8].mxu0 %vm749_vm9, %v554_v49  ;;  %2157 = vmatprep.subr.bf16.mxu1 %v6506_v8  ;;  %v7538_v48 = vpop.permute.xlu0 %731 }
 0x139   : > { %1022 = vmatprep.mubr.f32.mxu0 %v6970_v31  ;;  %5431 = vmatpush3.bf16.msra.mxu0 %v6520_v1  ;;  %v742_v2 = vpop.permute.xlu1 %741 }
 0x13a   : > { %5432 = vmatprep.subr.bf16.mxu0 %v6524_v3 }
 0x13b   : > { %2158 = vmatpush1.bf16.msra.mxu1 %v6504_v13 }
 0x13c   : > { %5162 = vmatmul.mubr.msk.f32.gmra.mrb[10].mxu0 %vm749_vm9, %v555_v42  ;;  %2159 = vmatprep.subr.bf16.mxu1 %v6509_v16  ;;  %v6559_v42 = vld [vmem:[%s9427_s3 + $0x248] ss:$12 sps:$4 sm:$0xff]  }
 0x13d   : > { %1028 = vmatprep.mubr.f32.mxu0 %v6970_v31  ;;  %5433 = vmatpush3.bf16.msra.mxu0 %v6525_v5 }
 0x13e   : > { %5434 = vmatprep.subr.bf16.mxu0 %v6529_v6 }
 0x13f   : > { %2160 = vmatpush1.bf16.msra.mxu1 %v6507_v18 }
 0x140   : > { %5163 = vmatmul.mubr.msk.f32.gmra.mrb[12].mxu0 %vm749_vm9, %v556_v57  ;;  %2161 = vmatprep.subr.bf16.mxu1 %v6512_v19 }
 0x141   : > { %1034 = vmatprep.mubr.f32.mxu0 %v6970_v31  ;;  %5435 = vmatpush3.bf16.msra.mxu0 %v6530_v9 }
 0x142   : > { %5436 = vmatprep.subr.bf16.mxu0 %v6534_v12  ;;  %v747_v12 = vpop.permute.xlu0 %746 }
 0x143   : > { %2162 = vmatpush1.bf16.msra.mxu1 %v6510_v21 }
 0x144   : > { %5164 = vmatmul.mubr.msk.f32.gmra.mrb[14].mxu0 %vm749_vm9, %v557_v58  ;;  %2163 = vmatprep.subr.bf16.mxu1 %v6515_v22 }
 0x145   : > { %5437 = vmatpush3.bf16.msra.mxu0 %v6535_v17 }
 0x146   : > { %5438 = vmatprep.subr.bf16.mxu0 %v6539_v10 }
 0x147   : > { %2164 = vmatpush1.bf16.msra.mxu1 %v6513_v23 }
 0x148   : > { %2165 = vmatprep.subr.bf16.mxu1 %v6518_v24 }
 0x149   : > { %5439 = vmatpush3.bf16.msra.mxu0 %v6540_v20 }
 0x14a   : > { %5440 = vmatprep.subr.bf16.mxu0 %v6544_v15 }
 0x14b   : > { %2166 = vmatpush1.bf16.msra.mxu1 %v6516_v25 }
 0x14c   : > { %2167 = vmatprep.subr.bf16.mxu1 %v6523_v26 }
 0x14d   : > { %5441 = vmatpush3.bf16.msra.mxu0 %v6545_v39 }
 0x14e   : > { %5442 = vmatprep.subr.bf16.mxu0 %v6549_v44 }
 0x14f   : > { %2168 = vmatpush1.bf16.msra.mxu1 %v6521_v27 }
 0x150   : > { %2169 = vmatprep.subr.bf16.mxu1 %v6528_v28 }
 0x151   : > { %5443 = vmatpush3.bf16.msra.mxu0 %v6550_v45 }
 0x152   : > { %5444 = vmatprep.subr.bf16.mxu0 %v6554_v47 }
 0x153   : > { %2170 = vmatpush1.bf16.msra.mxu1 %v6526_v29 }
 0x154   : > { %2171 = vmatprep.subr.bf16.mxu1 %v6533_v32 }
 0x155   : > { %5445 = vmatpush3.bf16.msra.mxu0 %v6555_v11 }
 0x156   : > { %5458 = vmatprep.subr.bf16.mxu0 %v6559_v42 }
 0x157   : > { %2172 = vmatpush1.bf16.msra.mxu1 %v6531_v33 }
 0x158   : > { %2173 = vmatprep.subr.bf16.mxu1 %v6538_v30 }
 0x15b   : > { %2174 = vmatpush1.bf16.msra.mxu1 %v6536_v35 }
 0x15c   : > { %2175 = vmatprep.subr.bf16.mxu1 %v6543_v36 }
 0x15f   : > { %2176 = vmatpush1.bf16.msra.mxu1 %v6541_v38 }
 0x160   : > { %2177 = vmatprep.subr.bf16.mxu1 %v6548_v43 }
 0x163   : > { %2178 = vmatpush1.bf16.msra.mxu1 %v6546_v41 }
 0x164   : > { %2179 = vmatprep.subr.bf16.mxu1 %v6553_v46 }
 0x167   : > { %2180 = vmatpush1.bf16.msra.mxu1 %v6551_v40 }
 0x168   : > { %2202 = vmatprep.subr.bf16.mxu1 %v6558_v55 }
 0x1fb   : > { %v840_v49 = vpop.f32.mrb[0].mxu0 }
 0x1fc   : > { %v842_v34 = vpop.f32.mrb[1].mxu0  ;;  %v929_v50 = vpop.f32.mrb[0].mxu1  ;;  %v7561_v58 = vadd.f32 %v840_v49, %v7538_v48 }
 0x1fd   : > { %v7547_v52 = vadd.f32 %v842_v34, %v7538_v48  ;;  %v7550_v53 = vadd.f32 %v929_v50, %v7538_v48  ;;  %v931_v54 = vpop.f32.mrb[1].mxu1 }
 0x1fe   : > { %v7596_v25 = vadd.f32 %v931_v54, %v7538_v48 }
 0x1ff   : > { %v6009_v56 = vpack.i.bf16 %v7550_v53, %v7547_v52  ;;  %v846_v57 = vpop.f32.mrb[2].mxu0 }
 0x200   : > { %v7563_v59 = vadd.f32 %v846_v57, %v737_v51  ;;  %v848_v60 = vpop.f32.mrb[3].mxu0  ;;  %v935_v61 = vpop.f32.mrb[2].mxu1 }
 0x201   : > { %v7565_v62 = vadd.f32 %v848_v60, %v737_v51  ;;  %v7567_v63 = vadd.f32 %v935_v61, %v737_v51  ;;  %v937_v0 = vpop.f32.mrb[3].mxu1  ;;  %6010 = vrot.lane.b32.xlu1 %v6009_v56, %s6966_s28 }
 0x202   : > { %v6019_v1 = vpack.i.bf16 %v7563_v59, %v7561_v58  ;;  %v7605_v32 = vadd.f32 %v937_v0, %v737_v51 }
 0x203   : > { %v6014_v3 = vpack.i.bf16 %v7567_v63, %v7565_v62  ;;  %v852_v4 = vpop.f32.mrb[4].mxu0 }
 0x204   : > { %v854_v5 = vpop.f32.mrb[5].mxu0  ;;  %v941_v6 = vpop.f32.mrb[4].mxu1  ;;  %v7582_v17 = vadd.f32 %v852_v4, %v742_v2 }
 0x205   : > { %v7574_v7 = vadd.f32 %v854_v5, %v742_v2  ;;  %v7576_v8 = vadd.f32 %v941_v6, %v742_v2  ;;  %v943_v9 = vpop.f32.mrb[5].mxu1  ;;  %6015 = vrot.lane.b32.xlu0 %v6014_v3, %s6966_s28  ;;  %6020 = vrot.lane.b32.xlu1 %v6019_v1, %s6966_s28 }
 0x206   : > { %v7612_v38 = vadd.f32 %v943_v9, %v742_v2 }
 0x207   : > { %v6024_v13 = vpack.i.bf16 %v7576_v8, %v7574_v7  ;;  %v858_v16 = vpop.f32.mrb[6].mxu0 }
 0x208   : > { %v7584_v10 = vadd.f32 %v858_v16, %v747_v12  ;;  %v860_v18 = vpop.f32.mrb[7].mxu0  ;;  %v947_v19 = vpop.f32.mrb[6].mxu1 }
 0x209   : > { %v7586_v20 = vadd.f32 %v860_v18, %v747_v12  ;;  %v7588_v15 = vadd.f32 %v947_v19, %v747_v12  ;;  %v949_v21 = vpop.f32.mrb[7].mxu1  ;;  %6025 = vrot.lane.b32.xlu0 %v6024_v13, %s6966_s28 }
 0x20a   : > { %v6034_v22 = vpack.i.bf16 %v7584_v10, %v7582_v17  ;;  %v7621_v46 = vadd.f32 %v949_v21, %v747_v12 }
 0x20b   : > { %v6029_v23 = vpack.i.bf16 %v7588_v15, %v7586_v20  ;;  %v1018_v24 = vpop.f32.mrb[8].mxu0 }
 0x20c   : > { %v7599_v26 = vadd.f32 %v1018_v24, %v7538_v48  ;;  %v1020_v27 = vpop.f32.mrb[9].mxu0 }
 0x20d   : > { %6035 = vrot.lane.b32.xlu0 %v6034_v22, %s6966_s28  ;;  %6030 = vrot.lane.b32.xlu1 %v6029_v23, %s6966_s28  ;;  %v7624_v47 = vadd.f32 %v1020_v27, %v7538_v48  ;;  %v6556_v22 = vld [vmem:[%s9427_s3 + $0x180] ss:$12 sps:$4 sm:$0xff]  }
 0x20e   : > { %v6039_v28 = vpack.i.bf16 %v7599_v26, %v7596_v25 }
 0x20f   : > { %v1024_v29 = vpop.f32.mrb[10].mxu0 }
 0x210   : > { %v7607_v33 = vadd.f32 %v1024_v29, %v737_v51  ;;  %v1026_v30 = vpop.f32.mrb[11].mxu0 }
 0x211   : > { %6040 = vrot.lane.b32.xlu1 %v6039_v28, %s6966_s28  ;;  %v7617_v43 = vadd.f32 %v1026_v30, %v737_v51 }
 0x212   : > { %v6044_v35 = vpack.i.bf16 %v7607_v33, %v7605_v32 }
 0x213   : > { %v1030_v36 = vpop.f32.mrb[12].mxu0  ;;  %v6059_v11 = vpack.i.bf16 %v7617_v43, %v7624_v47 }
 0x214   : > { %v7614_v39 = vadd.f32 %v1030_v36, %v742_v2  ;;  %v1032_v41 = vpop.f32.mrb[13].mxu0  ;;  %6045 = vrot.lane.b32.xlu0 %v6044_v35, %s6966_s28  ;;  %v6561_v36 = vld [vmem:[%s9427_s3 + $0x198] ss:$12 sps:$4 sm:$0xff]  }
 0x215   : > { %v7635_v51 = vadd.f32 %v1032_v41, %v742_v2  ;;  %v6565_v41 = vld [vmem:[%s9427_s3 + $0x1a0] ss:$12 sps:$4 sm:$0xff]  }
 0x216   : > { %v6049_v44 = vpack.i.bf16 %v7614_v39, %v7612_v38 }
 0x217   : > { %v1036_v45 = vpop.f32.mrb[14].mxu0 }
 0x218   : > { %v7626_v49 = vadd.f32 %v1036_v45, %v747_v12  ;;  %v1038_v40 = vpop.f32.mrb[15].mxu0  ;;  %6050 = vrot.lane.b32.xlu1 %v6049_v44, %s6966_s28  ;;  %v6568_v45 = vld [vmem:[%s9427_s3 + $0x1b4] ss:$12 sps:$4 sm:$0xff]  }
 0x219   : > { %v7633_v50 = vadd.f32 %v1038_v40, %v747_v12  ;;  %v6569_v40 = vld [vmem:[%s9427_s3 + $0x278] ss:$12 sps:$4 sm:$0xff]  }
 0x21a   : > { %v6054_v34 = vpack.i.bf16 %v7626_v49, %v7621_v46 }
 0x21b   : > { %v6064_v48 = vpack.i.bf16 %v7633_v50, %v7635_v51 }
 0x21c   : > { %6055 = vrot.lane.b32.xlu0 %v6054_v34, %s6966_s28  ;;  %6060 = vrot.lane.b32.xlu1 %v6059_v11, %s6966_s28 }
 0x220   : > { %6065 = vrot.lane.b32.xlu0 %v6064_v48, %s6966_s28 }
 0x273   : > { %v7642_v54 = vpop.permute.xlu1 %6010 }
 0x274   : > { %v6013_v55 = vunpack.i.h.bf16 %v7642_v54  ;;  %v6012_v42 = vunpack.i.l.bf16 %v7642_v54 }
 0x276   : > { %v1114_v60 = vsel %vm621_vm0, %v6012_v42, %v6013_v55 }
 0x277   : > { %v7646_v56 = vpop.permute.xlu0 %6015  ;;  %v6021_v57 = vpop.permute.xlu1 %6020  ;;  %v1158_v13 = vmax.f32 %v7547_v52, %v1114_v60  ;;  %v6563_v52 = vld [vmem:[%s9427_s3 + $0x19c] ss:$12 sps:$4 sm:$0xff]  }
 0x278   : > { %v6018_v61 = vunpack.i.h.bf16 %v7646_v56  ;;  %v6017_v0 = vunpack.i.l.bf16 %v7646_v56  ;;  %v6023_v1 = vunpack.i.h.bf16 %v6021_v57  ;;  %v6022_v2 = vunpack.i.l.bf16 %v6021_v57  ;;  %v6595_v56 = vld [vmem:[%s9427_s3 + $0x230] ss:$12 sps:$4 sm:$0xff]  }
 0x27a   : > { %v1118_v3 = vsel %vm621_vm0, %v6023_v1, %v6017_v0  ;;  %v1113_v4 = vsel %vm621_vm0, %v6022_v2, %v6012_v42  ;;  %v1119_v5 = vsel %vm621_vm0, %v6017_v0, %v6018_v61 }
 0x27b   : > { %v1163_v6 = vmax.f32 %v7563_v59, %v1118_v3  ;;  %v1157_v9 = vmax.f32 %v7561_v58, %v1113_v4  ;;  %v7660_v12 = vpop.permute.xlu0 %6025  ;;  %v1164_v16 = vmax.f32 %v7565_v62, %v1119_v5  ;;  %v6560_v58 = vld [vmem:[%s9427_s3 + $0x188] ss:$12 sps:$4 sm:$0xff]   ;;  %v6564_v59 = vld [vmem:[%s9427_s3 + $0x260] ss:$12 sps:$4 sm:$0xff]   ;;  %v6566_v4 = vld [vmem:[%s9427_s3 + $0x1b0] ss:$12 sps:$4 sm:$0xff]  }
 0x27c   : > { %v6028_v18 = vunpack.i.h.bf16 %v7660_v12  ;;  %v6027_v19 = vunpack.i.l.bf16 %v7660_v12  ;;  %v6604_v12 = vld [vmem:[%s9427_s3 + $0x270] ss:$12 sps:$4 sm:$0xff]  }
 0x27d   : > { %v1181_v21 = vpack.c.bf16 %v1163_v6, %v1157_v9  ;;  %v1182_v23 = vpack.c.bf16 %v1164_v16, %v1158_v13  ;;  %v6571_v16 = vld [vmem:[%s9427_s3 + $0x1c8] ss:$12 sps:$4 sm:$0xff]  }
 0x27e   : > { %v1124_v27 = vsel %vm621_vm0, %v6027_v19, %v6028_v18 }
 0x27f   : > { %v6036_v62 = vpop.permute.xlu0 %6035  ;;  %v7678_v24 = vpop.permute.xlu1 %6030  ;;  %2181 = vmatprep.mubr.bf16.mxu1 %v1182_v23  ;;  %2340 = vmatprep.mubr.bf16.mxu0 %v1182_v23  ;;  %v1170_v42 = vmax.f32 %v7574_v7, %v1124_v27  ;;  %v6570_v7 = vld [vmem:[%s9427_s3 + $0x1b8] ss:$12 sps:$4 sm:$0xff]   ;;  %v6576_v27 = vld [vmem:[%s9427_s3 + $0x1e0] ss:$12 sps:$4 sm:$0xff]  }
 0x280   : > { %v6038_v28 = vunpack.i.h.bf16 %v6036_v62  ;;  %v6037_v29 = vunpack.i.l.bf16 %v6036_v62  ;;  %v6033_v30 = vunpack.i.h.bf16 %v7678_v24  ;;  %v6032_v35 = vunpack.i.l.bf16 %v7678_v24  ;;  %2182 = vmatmul.mubr.bf16.vlgmr.msra.gmra.mrb[8].mxu1 %v1181_v21  ;;  %2341 = vmatmul.mubr.bf16.vlgmr.msra.gmra.mrb[16].mxu0 %v1181_v21  ;;  %v6606_v24 = vld [vmem:[%s9427_s3 + $0x274] ss:$12 sps:$4 sm:$0xff]  }
 0x281   : > { %2203 = vmatpush1.bf16.msra.mxu1 %v6556_v22  ;;  %5459 = vmatpush3.bf16.msra.mxu0 %v6560_v58 }
 0x282   : > { %2204 = vmatprep.subr.bf16.mxu1 %v6563_v52  ;;  %5460 = vmatprep.subr.bf16.mxu0 %v6564_v59  ;;  %v1129_v44 = vsel %vm621_vm0, %v6032_v35, %v6033_v30  ;;  %v1123_v11 = vsel %vm621_vm0, %v6037_v29, %v6027_v19  ;;  %v1128_v34 = vsel %vm621_vm0, %v6038_v28, %v6032_v35  ;;  %v6575_v19 = vld [vmem:[%s9427_s3 + $0x1d0] ss:$12 sps:$4 sm:$0xff]   ;;  %v6579_v59 = vld [vmem:[%s9427_s3 + $0x2a8] ss:$12 sps:$4 sm:$0xff]  }
 0x283   : > { %v7702_v48 = vpop.permute.xlu1 %6040  ;;  %v1176_v57 = vmax.f32 %v7586_v20, %v1129_v44  ;;  %v1169_v60 = vmax.f32 %v7582_v17, %v1123_v11  ;;  %v1175_v0 = vmax.f32 %v7584_v10, %v1128_v34  ;;  %v6573_v17 = vld [vmem:[%s9427_s3 + $0x1cc] ss:$12 sps:$4 sm:$0xff]   ;;  %v6574_v10 = vld [vmem:[%s9427_s3 + $0x290] ss:$12 sps:$4 sm:$0xff]  }
 0x284   : > { %v6043_v1 = vunpack.i.h.bf16 %v7702_v48  ;;  %v6042_v2 = vunpack.i.l.bf16 %v7702_v48  ;;  %v6578_v52 = vld [vmem:[%s9427_s3 + $0x1e4] ss:$12 sps:$4 sm:$0xff]   ;;  %v6583_v29 = vld [vmem:[%s9427_s3 + $0x1fc] ss:$12 sps:$4 sm:$0xff]  }
 0x285   : > { %2205 = vmatpush1.bf16.msra.mxu1 %v6561_v36  ;;  %5461 = vmatpush3.bf16.msra.mxu0 %v6565_v41  ;;  %v1188_v3 = vpack.c.bf16 %v1176_v57, %v1170_v42  ;;  %v1187_v5 = vpack.c.bf16 %v1175_v0, %v1169_v60  ;;  %v6584_v41 = vld [vmem:[%s9427_s3 + $0x2c0] ss:$12 sps:$4 sm:$0xff]  }
 0x286   : > { %v7716_v20 = vpop.permute.xlu0 %6045  ;;  %2206 = vmatprep.subr.bf16.mxu1 %v6568_v45  ;;  %5462 = vmatprep.subr.bf16.mxu0 %v6569_v40  ;;  %v1116_v13 = vsel %vm621_vm0, %v6042_v2, %v6043_v1  ;;  %v6581_v40 = vld [vmem:[%s9427_s3 + $0x1f8] ss:$12 sps:$4 sm:$0xff]   ;;  %v6585_v57 = vld [vmem:[%s9427_s3 + $0x200] ss:$12 sps:$4 sm:$0xff]  }
 0x287   : > { %v6048_v6 = vunpack.i.h.bf16 %v7716_v20  ;;  %v6047_v9 = vunpack.i.l.bf16 %v7716_v20  ;;  %2191 = vmatprep.mubr.bf16.mxu1 %v1188_v3  ;;  %2348 = vmatprep.mubr.bf16.mxu0 %v1188_v3  ;;  %v1160_v23 = vmax.f32 %v7596_v25, %v1116_v13  ;;  %v6588_v60 = vld [vmem:[%s9427_s3 + $0x214] ss:$12 sps:$4 sm:$0xff]  }
 0x288   : > { %2192 = vmatmul.mubr.bf16.gmra.mrb[12].mxu1 %v1187_v5  ;;  %2349 = vmatmul.mubr.bf16.gmra.mrb[20].mxu0 %v1187_v5 }
 0x289   : > { %2207 = vmatpush1.bf16.msra.mxu1 %v6566_v4  ;;  %5463 = vmatpush3.bf16.msra.mxu0 %v6570_v7  ;;  %v1121_v21 = vsel %vm621_vm0, %v6047_v9, %v6048_v6  ;;  %v6586_v7 = vld [vmem:[%s9427_s3 + $0x210] ss:$12 sps:$4 sm:$0xff]  }
 0x28a   : > { %v7738_v22 = vpop.permute.xlu1 %6050  ;;  %2208 = vmatprep.subr.bf16.mxu1 %v6573_v17  ;;  %5464 = vmatprep.subr.bf16.mxu0 %v6574_v10  ;;  %v1166_v58 = vmax.f32 %v7605_v32, %v1121_v21  ;;  %v6580_v32 = vld [vmem:[%s9427_s3 + $0x1e8] ss:$12 sps:$4 sm:$0xff]   ;;  %v6590_v10 = vld [vmem:[%s9427_s3 + $0x218] ss:$12 sps:$4 sm:$0xff]   ;;  %v6594_v21 = vld [vmem:[%s9427_s3 + $0x2f0] ss:$12 sps:$4 sm:$0xff]  }
 0x28b   : > { %v6053_v0 = vunpack.i.h.bf16 %v7738_v22 }
 0x28c   : > { %v1184_v62 = vpack.c.bf16 %v1166_v58, %v1160_v23  ;;  %v1120_v58 = vsel %vm621_vm0, %v6018_v61, %v6047_v9  ;;  %v6598_v61 = vld [vmem:[%s9427_s3 + $0x244] ss:$12 sps:$4 sm:$0xff]  }
 0x28d   : > { %2209 = vmatpush1.bf16.msra.mxu1 %v6571_v16  ;;  %5465 = vmatpush3.bf16.msra.mxu0 %v6575_v19  ;;  %v6052_v19 = vunpack.i.l.bf16 %v7738_v22  ;;  %v1165_v20 = vmax.f32 %v7567_v63, %v1120_v58  ;;  %v6599_v63 = vld [vmem:[%s9427_s3 + $0x308] ss:$12 sps:$4 sm:$0xff]  }
 0x28e   : > { %v7751_v28 = vpop.permute.xlu0 %6055  ;;  %v7753_v25 = vpop.permute.xlu1 %6060  ;;  %2234 = vmatprep.mubr.bf16.mxu1 %v1184_v62  ;;  %2389 = vmatprep.mubr.bf16.mxu0 %v1184_v62  ;;  %v6640_v58 = vld [vmem:[%s9427_s3 + $0x348] ss:$12 sps:$4 sm:$0xff]  }
 0x28f   : > { %v6063_v35 = vunpack.i.h.bf16 %v7753_v25  ;;  %v6062_v36 = vunpack.i.l.bf16 %v7753_v25  ;;  %2210 = vmatprep.subr.bf16.mxu1 %v6578_v52  ;;  %5466 = vmatprep.subr.bf16.mxu0 %v6579_v59  ;;  %v6058_v3 = vunpack.i.h.bf16 %v7751_v28  ;;  %v6057_v5 = vunpack.i.l.bf16 %v7751_v28  ;;  %v6611_v25 = vld [vmem:[%s9427_s3 + $0x350] ss:$12 sps:$4 sm:$0xff]  }
 0x290   : > { %v1126_v9 = vsel %vm621_vm0, %v6052_v19, %v6053_v0 }
 0x291   : > { %v1122_v44 = vsel %vm621_vm0, %v6048_v6, %v6063_v35  ;;  %v1117_v45 = vsel %vm621_vm0, %v6043_v1, %v6062_v36  ;;  %2211 = vmatpush1.bf16.msra.mxu1 %v6576_v27  ;;  %5467 = vmatpush3.bf16.msra.mxu0 %v6580_v32  ;;  %v6593_v6 = vld [vmem:[%s9427_s3 + $0x22c] ss:$12 sps:$4 sm:$0xff]   ;;  %v1131_v22 = vsel %vm621_vm0, %v6057_v5, %v6058_v3 }
 0x292   : > { %v1167_v11 = vmax.f32 %v7607_v33, %v1122_v44  ;;  %v1161_v34 = vmax.f32 %v7599_v26, %v1117_v45  ;;  %v7777_v42 = vpop.permute.xlu0 %6065  ;;  %2212 = vmatprep.subr.bf16.mxu1 %v6583_v29  ;;  %5468 = vmatprep.subr.bf16.mxu0 %v6584_v41  ;;  %v6589_v26 = vld [vmem:[%s9427_s3 + $0x2d8] ss:$12 sps:$4 sm:$0xff]   ;;  %v1178_v48 = vmax.f32 %v7621_v46, %v1131_v22  ;;  %v6603_v27 = vld [vmem:[%s9427_s3 + $0x320] ss:$12 sps:$4 sm:$0xff]   ;;  %v6615_v44 = vld [vmem:[%s9427_s3 + $0x368] ss:$12 sps:$4 sm:$0xff]  }
 0x293   : > { %v6068_v1 = vunpack.i.h.bf16 %v7777_v42  ;;  %v6067_v33 = vunpack.i.l.bf16 %v7777_v42  ;;  %v1130_v62 = vsel %vm621_vm0, %v6033_v30, %v6057_v5  ;;  %v1125_v30 = vsel %vm621_vm0, %v6028_v18, %v6052_v19  ;;  %v6618_v45 = vld [vmem:[%s9427_s3 + $0x2bc] ss:$12 sps:$4 sm:$0xff]   ;;  %v6630_v5 = vld [vmem:[%s9427_s3 + $0x304] ss:$12 sps:$4 sm:$0xff]  }
 0x294   : > { %v7792_v4 = vpack.c.bf16 %v1167_v11, %v1161_v34  ;;  %v1177_v28 = vmax.f32 %v7588_v15, %v1130_v62  ;;  %v1168_v32 = vmax.f32 %v7617_v43, %v6063_v35  ;;  %v1162_v29 = vmax.f32 %v7624_v47, %v6062_v36  ;;  %v6607_v15 = vld [vmem:[%s9427_s3 + $0x338] ss:$12 sps:$4 sm:$0xff]   ;;  %v6612_v36 = vld [vmem:[%s9427_s3 + $0x2a0] ss:$12 sps:$4 sm:$0xff]   ;;  %v6636_v19 = vld [vmem:[%s9427_s3 + $0x330] ss:$12 sps:$4 sm:$0xff]  }
 0x295   : > { %2213 = vmatpush1.bf16.msra.mxu1 %v6581_v40  ;;  %v1127_v17 = vsel %vm621_vm0, %v6053_v0, %v6067_v33  ;;  %5469 = vmatpush3.bf16.msra.mxu0 %v6585_v57  ;;  %v1132_v13 = vsel %vm621_vm0, %v6058_v3, %v6068_v1  ;;  %v1171_v18 = vmax.f32 %v7576_v8, %v1125_v30  ;;  %v6610_v43 = vld [vmem:[%s9427_s3 + $0x28c] ss:$12 sps:$4 sm:$0xff]   ;;  %v6608_v8 = vld [vmem:[%s9427_s3 + $0x288] ss:$12 sps:$4 sm:$0xff]   ;;  %v6614_v35 = vld [vmem:[%s9427_s3 + $0x2a4] ss:$12 sps:$4 sm:$0xff]  }
 0x296   : > { %2214 = vmatprep.subr.bf16.mxu1 %v6588_v60  ;;  %v1173_v16 = vmax.f32 %v7614_v39, %v1127_v17  ;;  %5470 = vmatprep.subr.bf16.mxu0 %v6589_v26  ;;  %v1179_v23 = vmax.f32 %v7626_v49, %v1132_v13  ;;  %v6591_v39 = vld [vmem:[%s9427_s3 + $0x228] ss:$12 sps:$4 sm:$0xff]   ;;  %v1115_v49 = vsel %vm621_vm0, %v6013_v55, %v6042_v2  ;;  %v6596_v55 = vld [vmem:[%s9427_s3 + $0x240] ss:$12 sps:$4 sm:$0xff]   ;;  %v6616_v40 = vld [vmem:[%s9427_s3 + $0x2b8] ss:$12 sps:$4 sm:$0xff]  }
 0x297   : > { %v1159_v54 = vmax.f32 %v7550_v53, %v1115_v49  ;;  %v1172_v2 = vmax.f32 %v7612_v38, %v1126_v9  ;;  %v6602_v53 = vld [vmem:[%s9427_s3 + $0x25c] ss:$12 sps:$4 sm:$0xff]   ;;  %v6600_v38 = vld [vmem:[%s9427_s3 + $0x258] ss:$12 sps:$4 sm:$0xff]   ;;  %v7889_v41 = vpack.c.bf16 %v1177_v28, %v1171_v18  ;;  %v7895_v47 = vpack.c.bf16 %v1168_v32, %v1162_v29  ;;  %v6619_v11 = vld [vmem:[%s9427_s3 + $0x380] ss:$12 sps:$4 sm:$0xff]  }
 0x298   : > { %v7825_v52 = vpack.c.bf16 %v1179_v23, %v1173_v16  ;;  %v6622_v34 = vld [vmem:[%s9427_s3 + $0x2d4] ss:$12 sps:$4 sm:$0xff]   ;;  %v6620_v57 = vld [vmem:[%s9427_s3 + $0x2d0] ss:$12 sps:$4 sm:$0xff]   ;;  %v6623_v60 = vld [vmem:[%s9427_s3 + $0x398] ss:$12 sps:$4 sm:$0xff]   ;;  %v1180_v62 = vmax.f32 %v7633_v50, %v6068_v1 }
 0x299   : > { %2215 = vmatpush1.bf16.msra.mxu1 %v6586_v7  ;;  %5471 = vmatpush3.bf16.msra.mxu0 %v6590_v10  ;;  %v7849_v59 = vpack.c.bf16 %v1165_v20, %v1159_v54  ;;  %v7855_v46 = vpack.c.bf16 %v1178_v48, %v1172_v2  ;;  %v6626_v0 = vld [vmem:[%s9427_s3 + $0x2ec] ss:$12 sps:$4 sm:$0xff]   ;;  %v6624_v26 = vld [vmem:[%s9427_s3 + $0x2e8] ss:$12 sps:$4 sm:$0xff]   ;;  %v6627_v3 = vld [vmem:[%s9427_s3 + $0x3b0] ss:$12 sps:$4 sm:$0xff]  }
 0x29a   : > { %2216 = vmatprep.subr.bf16.mxu1 %v6593_v6  ;;  %5472 = vmatprep.subr.bf16.mxu0 %v6594_v21  ;;  %v6628_v7 = vld [vmem:[%s9427_s3 + $0x300] ss:$12 sps:$4 sm:$0xff]   ;;  %v6631_v17 = vld [vmem:[%s9427_s3 + $0x3c8] ss:$12 sps:$4 sm:$0xff]   ;;  %v6632_v6 = vld [vmem:[%s9427_s3 + $0x318] ss:$12 sps:$4 sm:$0xff]  }
 0x29b   : > { %v6634_v10 = vld [vmem:[%s9427_s3 + $0x31c] ss:$12 sps:$4 sm:$0xff]   ;;  %v6635_v13 = vld [vmem:[%s9427_s3 + $0x3e0] ss:$12 sps:$4 sm:$0xff]   ;;  %v6639_v21 = vld [vmem:[%s9427_s3 + $0x3f8] ss:$12 sps:$4 sm:$0xff]  }
 0x29c   : > { %v6638_v16 = vld [vmem:[%s9427_s3 + $0x334] ss:$12 sps:$4 sm:$0xff]   ;;  %v6642_v23 = vld [vmem:[%s9427_s3 + $0x34c] ss:$12 sps:$4 sm:$0xff]   ;;  %v6646_v22 = vld [vmem:[%s9427_s3 + $0x364] ss:$12 sps:$4 sm:$0xff]  }
 0x29d   : > { %2217 = vmatpush1.bf16.msra.mxu1 %v6591_v39  ;;  %5473 = vmatpush3.bf16.msra.mxu0 %v6595_v56  ;;  %v6643_v39 = vld [vmem:[%s9427_s3 + $0x410] ss:$12 sps:$4 sm:$0xff]   ;;  %v6644_v49 = vld [vmem:[%s9427_s3 + $0x360] ss:$12 sps:$4 sm:$0xff]   ;;  %v6647_v56 = vld [vmem:[%s9427_s3 + $0x428] ss:$12 sps:$4 sm:$0xff]  }
 0x29e   : > { %2218 = vmatprep.subr.bf16.mxu1 %v6598_v61  ;;  %2406 = vmatprep.subr.bf16.mxu0 %v6971_v37  ;;  %v6650_v61 = vld [vmem:[%s9427_s3 + $0x37c] ss:$12 sps:$4 sm:$0xff]   ;;  %v6973_v20 = vmov 65535   ;;  %v6648_v48 = vld [vmem:[%s9427_s3 + $0x378] ss:$12 sps:$4 sm:$0xff]  }
 0x29f   : > { %v2138_v9 = vsel %vm711_vm3, 4294967295, %v6973_v20  ;;  %v6651_v54 = vld [vmem:[%s9427_s3 + $0x440] ss:$12 sps:$4 sm:$0xff]   ;;  %v6655_v2 = vld [vmem:[%s9427_s3 + $0x458] ss:$12 sps:$4 sm:$0x1f]  }
 0x2a0   : > { %2390 = vmatmul.mubr.bf16.vlgmr.msra.gmra.mrb[24].mxu0 %v7849_v59  ;;  %v6659_v50 = vld [vmem:[%s9427_s3 + $0x3c0] ss:$12 sps:$4 sm:$0xff]   ;;  %v6662_v42 = vld [vmem:[%s9427_s3 + $0x3d8] ss:$12 sps:$4 sm:$0xff]   ;;  %v6668_v32 = vld [vmem:[%s9427_s3 + $0x408] ss:$12 sps:$4 sm:$0xff]  }
 0x2a1   : > { %2219 = vmatpush1.bf16.msra.mxu1 %v6596_v55  ;;  %2397 = vmatprep.mubr.bf16.mxu0 %v7855_v46  ;;  %v6654_v55 = vld [vmem:[%s9427_s3 + $0x394] ss:$12 sps:$4 sm:$0xff]   ;;  %v6670_v28 = vld [vmem:[%s9427_s3 + $0x40c] ss:$12 sps:$4 sm:$0xff]   ;;  %v6673_v29 = vld [vmem:[%s9427_s3 + $0x424] ss:$12 sps:$4 sm:$0xff]  }
 0x2a2   : > { %2407 = vmatpush1.bf16.msra.mxu0 %v6599_v63  ;;  %2220 = vmatprep.subr.bf16.mxu1 %v6602_v53  ;;  %v2139_v63 = vsel %vm2137_vm11, %v2138_v9, 0  ;;  %v6667_v1 = vld [vmem:[%s9427_s3 + $0x3f4] ss:$12 sps:$4 sm:$0xff]   ;;  %v6676_v18 = vld [vmem:[%s9427_s3 + $0x43c] ss:$12 sps:$4 sm:$0xff]  }
 0x2a3   : > { %2408 = vmatprep.subr.bf16.mxu0 %v6971_v37  ;;  %v2147_v53 = vand.u32 %v6655_v2, %v2139_v63 }
 0x2a5   : > { %2221 = vmatpush1.bf16.msra.mxu1 %v6600_v38  ;;  %v1174_v38 = vmax.f32 %v7635_v51, %v6067_v33  ;;  %v6664_v51 = vld [vmem:[%s9427_s3 + $0x3dc] ss:$12 sps:$4 sm:$0xff]  }
 0x2a6   : > { %2409 = vmatpush1.bf16.msra.mxu0 %v6603_v27  ;;  %2222 = vmatprep.subr.bf16.mxu1 %v6606_v24  ;;  %v6656_v27 = vld [vmem:[%s9427_s3 + $0x3a8] ss:$12 sps:$4 sm:$0xff]   ;;  %v6661_v24 = vld [vmem:[%s9427_s3 + $0x3c4] ss:$12 sps:$4 sm:$0xff]  }
 0x2a7   : > { %2410 = vmatprep.subr.bf16.mxu0 %v6971_v37  ;;  %v1192_v30 = vpack.c.bf16 %v1180_v62, %v1174_v38  ;;  %v6665_v33 = vld [vmem:[%s9427_s3 + $0x3f0] ss:$12 sps:$4 sm:$0xff]  }
 0x2a8   : > { %2398 = vmatmul.mubr.bf16.gmra.mrb[28].mxu0 %v7889_v41 }
 0x2a9   : > { %2223 = vmatpush1.bf16.msra.mxu1 %v6604_v12  ;;  %5308 = vmatprep.mubr.msk.bf16.mxu0 %vm2130_vm10, %v7895_v47  ;;  %v6671_v12 = vld [vmem:[%s9427_s3 + $0x420] ss:$12 sps:$4 sm:$0xff]  }
 0x2aa   : > { %2411 = vmatpush1.bf16.msra.mxu0 %v6607_v15  ;;  %2224 = vmatprep.subr.bf16.mxu1 %v6610_v43  ;;  %v6679_v15 = vld [vmem:[%s9427_s3 + $0x454] ss:$12 sps:$4 sm:$0x1f]   ;;  %v6677_v43 = vld [vmem:[%s9427_s3 + $0x450] ss:$12 sps:$4 sm:$0x1f]  }
 0x2ab   : > { %2412 = vmatprep.subr.bf16.mxu0 %v6971_v37 }
 0x2ad   : > { %2225 = vmatpush1.bf16.msra.mxu1 %v6608_v8  ;;  %v2141_v8 = vand.u32 %v6677_v43, %v2139_v63 }
 0x2ae   : > { %2413 = vmatpush1.bf16.msra.mxu0 %v6611_v25  ;;  %2226 = vmatprep.subr.bf16.mxu1 %v6614_v35 }
 0x2af   : > { %2414 = vmatprep.subr.bf16.mxu0 %v6971_v37 }
 0x2b1   : > { %2227 = vmatpush1.bf16.msra.mxu1 %v6612_v36 }
 0x2b2   : > { %2415 = vmatpush1.bf16.msra.mxu0 %v6615_v44  ;;  %2228 = vmatprep.subr.bf16.mxu1 %v6618_v45 }
 0x2b3   : > { %2416 = vmatprep.subr.bf16.mxu0 %v6971_v37 }
 0x2b5   : > { %2229 = vmatpush1.bf16.msra.mxu1 %v6616_v40 }
 0x2b6   : > { %2417 = vmatpush1.bf16.msra.mxu0 %v6619_v11  ;;  %2230 = vmatprep.subr.bf16.mxu1 %v6622_v34 }
 0x2b7   : > { %2418 = vmatprep.subr.bf16.mxu0 %v6971_v37 }
 0x2b9   : > { %2231 = vmatpush1.bf16.msra.mxu1 %v6620_v57 }
 0x2ba   : > { %2419 = vmatpush1.bf16.msra.mxu0 %v6623_v60  ;;  %2232 = vmatprep.subr.bf16.mxu1 %v6626_v0 }
 0x2bb   : > { %2420 = vmatprep.subr.bf16.mxu0 %v6971_v37 }
 0x2bd   : > { %2233 = vmatpush1.bf16.msra.mxu1 %v6624_v26 }
 0x2be   : > { %2421 = vmatpush1.bf16.msra.mxu0 %v6627_v3  ;;  %2255 = vmatprep.subr.bf16.mxu1 %v6630_v5 }
 0x2bf   : > { %2422 = vmatprep.subr.bf16.mxu0 %v6971_v37 }
 0x2c0   : > { %2235 = vmatmul.mubr.bf16.vlgmr.msra.gmra.mrb[8].mxu1 %v7849_v59  ;;  %v6652_v59 = vld [vmem:[%s9427_s3 + $0x390] ss:$12 sps:$4 sm:$0xff]  }
 0x2c1   : > { %2244 = vmatprep.mubr.bf16.mxu1 %v7855_v46  ;;  %2256 = vmatpush1.bf16.msra.mxu1 %v6628_v7  ;;  %v6658_v46 = vld [vmem:[%s9427_s3 + $0x3ac] ss:$12 sps:$4 sm:$0xff]  }
 0x2c2   : > { %2423 = vmatpush1.bf16.msra.mxu0 %v6631_v17  ;;  %2257 = vmatprep.subr.bf16.mxu1 %v6634_v10 }
 0x2c3   : > { %2424 = vmatprep.subr.bf16.mxu0 %v6971_v37 }
 0x2c5   : > { %2258 = vmatpush1.bf16.msra.mxu1 %v6632_v6 }
 0x2c6   : > { %2425 = vmatpush1.bf16.msra.mxu0 %v6635_v13  ;;  %2259 = vmatprep.subr.bf16.mxu1 %v6638_v16 }
 0x2c7   : > { %2426 = vmatprep.subr.bf16.mxu0 %v6971_v37 }
 0x2c8   : > { %2245 = vmatmul.mubr.bf16.gmra.mrb[12].mxu1 %v7889_v41  ;;  %v6674_v41 = vld [vmem:[%s9427_s3 + $0x438] ss:$12 sps:$4 sm:$0xff]  }
 0x2c9   : > { %2260 = vmatpush1.bf16.msra.mxu1 %v6636_v19  ;;  %5306 = vmatprep.mubr.msk.bf16.mxu1 %vm2130_vm10, %v7895_v47  ;;  %v2144_v47 = vand.u32 %v6679_v15, %v2139_v63 }
 0x2ca   : > { %2427 = vmatpush1.bf16.msra.mxu0 %v6639_v21  ;;  %2261 = vmatprep.subr.bf16.mxu1 %v6642_v23 }
 0x2cb   : > { %2428 = vmatprep.subr.bf16.mxu0 %v6971_v37 }
 0x2cd   : > { %2262 = vmatpush1.bf16.msra.mxu1 %v6640_v58 }
 0x2ce   : > { %2429 = vmatpush1.bf16.msra.mxu0 %v6643_v39  ;;  %2263 = vmatprep.subr.bf16.mxu1 %v6646_v22 }
 0x2cf   : > { %2430 = vmatprep.subr.bf16.mxu0 %v6971_v37 }
 0x2d1   : > { %2264 = vmatpush1.bf16.msra.mxu1 %v6644_v49 }
 0x2d2   : > { %2431 = vmatpush1.bf16.msra.mxu0 %v6647_v56  ;;  %2265 = vmatprep.subr.bf16.mxu1 %v6650_v61 }
 0x2d3   : > { %2432 = vmatprep.subr.bf16.mxu0 %v6971_v37 }
 0x2d5   : > { %2266 = vmatpush1.bf16.msra.mxu1 %v6648_v48 }
 0x2d6   : > { %2433 = vmatpush1.bf16.msra.mxu0 %v6651_v54  ;;  %2267 = vmatprep.subr.bf16.mxu1 %v6654_v55 }
 0x2d7   : > { %2434 = vmatprep.subr.bf16.mxu0 %v6971_v37 }
 0x2d9   : > { %2268 = vmatpush1.bf16.msra.mxu1 %v6652_v59 }
 0x2da   : > { %2435 = vmatpush1.bf16.msra.mxu0 %v2147_v53  ;;  %2269 = vmatprep.subr.bf16.mxu1 %v6658_v46 }
 0x2dd   : > { %2439 = vmatmul.mubr.bf16.vlgmr.msra.gmra.mrb[32].mxu0 %v7792_v4  ;;  %2270 = vmatpush1.bf16.msra.mxu1 %v6656_v27 }
 0x2de   : > { %5309 = vmatprep.mubr.msk.bf16.mxu0 %vm2130_vm10, %v1192_v30  ;;  %2271 = vmatprep.subr.bf16.mxu1 %v6661_v24 }
 0x2e1   : > { %2272 = vmatpush1.bf16.msra.mxu1 %v6659_v50 }
 0x2e2   : > { %2273 = vmatprep.subr.bf16.mxu1 %v6664_v51 }
 0x2e5   : > { %2447 = vmatmul.mubr.bf16.gmra.mrb[36].mxu0 %v7825_v52  ;;  %2274 = vmatpush1.bf16.msra.mxu1 %v6662_v42 }
 0x2e6   : > { %2275 = vmatprep.subr.bf16.mxu1 %v6667_v1  ;;  %2914 = vmatprep.mubr.f32.mxu0 %v6970_v31 }
 0x2e9   : > { %2276 = vmatpush1.bf16.msra.mxu1 %v6665_v33 }
 0x2ea   : > { %2277 = vmatprep.subr.bf16.mxu1 %v6670_v28 }
 0x2ed   : > { %2278 = vmatpush1.bf16.msra.mxu1 %v6668_v32 }
 0x2ee   : > { %2279 = vmatprep.subr.bf16.mxu1 %v6673_v29 }
 0x2f1   : > { %2280 = vmatpush1.bf16.msra.mxu1 %v6671_v12 }
 0x2f2   : > { %2281 = vmatprep.subr.bf16.mxu1 %v6676_v18 }
 0x2f5   : > { %2282 = vmatpush1.bf16.msra.mxu1 %v6674_v41 }
 0x2f6   : > { %2283 = vmatprep.subr.bf16.mxu1 %v2144_v47 }
 0x2f9   : > { %2284 = vmatpush1.bf16.msra.mxu1 %v2141_v8 }
 0x2fc   : > { %2288 = vmatmul.mubr.bf16.vlgmr.msra.gmra.mrb[8].mxu1 %v7792_v4 }
 0x2fd   : > { %5307 = vmatprep.mubr.msk.bf16.mxu1 %vm2130_vm10, %v1192_v30 }
 0x304   : > { %2298 = vmatmul.mubr.bf16.gmra.mrb[12].mxu1 %v7825_v52 }
 0x353   : > { %v5446_v25 = vpop.f32.mrb[16].mxu0 }
 0x354   : > { %v5447_v35 = vpop.f32.mrb[17].mxu0 }
 0x355   : > { %v5448_v36 = vadd.f32 %v5447_v35, %v5446_v25  ;;  %v5449_v44 = vpop.f32.mrb[18].mxu0 }
 0x356   : > { %v5450_v45 = vpop.f32.mrb[19].mxu0 }
 0x357   : > { %v5451_v40 = vadd.f32 %v5450_v45, %v5449_v44 }
 0x35b   : > { %v5452_v11 = vpop.f32.mrb[20].mxu0 }
 0x35c   : > { %v5453_v34 = vpop.f32.mrb[21].mxu0 }
 0x35d   : > { %v5454_v57 = vadd.f32 %v5453_v34, %v5452_v11  ;;  %v5455_v60 = vpop.f32.mrb[22].mxu0 }
 0x35e   : > { %v5456_v0 = vpop.f32.mrb[23].mxu0 }
 0x35f   : > { %v5457_v26 = vadd.f32 %v5456_v0, %v5455_v60 }
 0x373   : > { %v5474_v3 = vpop.f32.mrb[24].mxu0 }
 0x374   : > { %v5475_v5 = vpop.f32.mrb[25].mxu0 }
 0x375   : > { %v5476_v7 = vadd.f32 %v5475_v5, %v5474_v3  ;;  %v5477_v4 = vpop.f32.mrb[26].mxu0 }
 0x376   : > { %v5478_v17 = vpop.f32.mrb[27].mxu0 }
 0x377   : > { %v5479_v10 = vadd.f32 %v5478_v17, %v5477_v4  ;;  %v2392_v6 = vadd.f32 %v5476_v7, %v5448_v36 }
 0x379   : > { %v2395_v52 = vadd.f32 %v5479_v10, %v5451_v40 }
 0x37b   : > { %v5480_v13 = vpop.f32.mrb[28].mxu0 }
 0x37c   : > { %v5481_v16 = vpop.f32.mrb[29].mxu0 }
 0x37d   : > { %v5482_v19 = vadd.f32 %v5481_v16, %v5480_v13  ;;  %v5483_v21 = vpop.f32.mrb[30].mxu0 }
 0x37e   : > { %v5484_v23 = vpop.f32.mrb[31].mxu0 }
 0x37f   : > { %v5485_v58 = vadd.f32 %v5484_v23, %v5483_v21  ;;  %v2400_v39 = vadd.f32 %v5482_v19, %v5454_v57 }
 0x381   : > { %v2403_v22 = vadd.f32 %v5485_v58, %v5457_v26 }
 0x3b0   : > { %v2440_v49 = vpop.f32.mrb[32].mxu0 }
 0x3b1   : > { %v2441_v56 = vadd.f32 %v2440_v49, %v2392_v6  ;;  %v2442_v61 = vpop.f32.mrb[33].mxu0 }
 0x3b2   : > { %v2443_v9 = vpop.f32.mrb[34].mxu0 }
 0x3b3   : > { %vm2457_vm12 = vcmp.ge.f32.partialorder %v2441_v56, 0.0  ;;  %v2469_v48 = vmul.f32 0.01, %v2441_v56  ;;  %v2444_v54 = vadd.f32 %v2443_v9, %v2395_v52  ;;  %v2445_v55 = vpop.f32.mrb[35].mxu0 }
 0x3b5   : > { %v8086_v2 = vsel %vm2457_vm12, %v2441_v56, %v2469_v48  ;;  %vm2460_vm13 = vcmp.ge.f32.partialorder %v2444_v54, 0.0  ;;  %v2472_v63 = vmul.f32 0.01, %v2444_v54 }
 0x3b6   : > { %v2513_v59 = vrot.slane %v8086_v2, 7  ;;  %v2578_v46 = vrot.slane %v8086_v2, 6  ;;  %v2644_v62 = vrot.slane %v8086_v2, 5  ;;  %v2709_v38 = vrot.slane %v8086_v2, 4 }
 0x3b7   : > { %v8089_v53 = vsel %vm2460_vm13, %v2444_v54, %v2472_v63 }
 0x3b8   : > { %v2448_v27 = vpop.f32.mrb[36].mxu0  ;;  %v2518_v24 = vrot.slane %v8089_v53, 7  ;;  %v2583_v30 = vrot.slane %v8089_v53, 6  ;;  %v2649_v50 = vrot.slane %v8089_v53, 5  ;;  %v2714_v51 = vrot.slane %v8089_v53, 4 }
 0x3b9   : > { %v2449_v42 = vadd.f32 %v2448_v27, %v2400_v39  ;;  %v2450_v1 = vpop.f32.mrb[37].mxu0  ;;  %v5698_v33 = vpack.c.bf16 %v8089_v53, %v8086_v2  ;;  %v2494_v53 = vld [vmem:[#allocation2 + $0x18] sm:$0xff] }
 0x3ba   : > { %v2451_v28 = vpop.f32.mrb[38].mxu0  ;;  %v8103_v32 = vsel %vm704_vm2, %v2578_v46, %v2583_v30  ;;  %v8106_v29 = vsel %vm2510_vm14, %v2513_v59, %v2518_v24  ;;  %v8111_v12 = vsel %vm2641_vm15, %v2644_v62, %v2649_v50  ;;  %v8118_v18 = vsel %vm711_vm3, %v2709_v38, %v2714_v51 }
 0x3bb   : > { %v8120_v15 = vadd.f32 %v2451_v28, %v2403_v22  ;;  %v2453_v41 = vpop.f32.mrb[39].mxu0  ;;  %v2475_v43 = vmul.f32 0.01, %v2449_v42  ;;  %vm2463_vm9 = vcmp.ge.f32.partialorder %v2449_v42, 0.0 }
 0x3bd   : > { %v8122_v47 = vsel %vm2463_vm9, %v2449_v42, %v2475_v43  ;;  %v2478_v1 = vmul.f32 0.01, %v8120_v15 }
 0x3be   : > { %v2524_v25 = vrot.slane %v8122_v47, 7 }
 0x3c0   : > { %v2525_v0 = vsel %vm2510_vm14, %v2518_v24, %v2524_v25 }
 0x3cf   : > { %v2289_v8 = vpop.f32.mrb[8].mxu1 }
 0x3d0   : > { %vm2455_vm10 = vcmp.ge.f32.partialorder %v2289_v8, 0.0  ;;  %v2467_v35 = vmul.f32 0.01, %v2289_v8  ;;  %v2291_v36 = vpop.f32.mrb[9].mxu1 }
 0x3d1   : > { %vm2456_vm12 = vcmp.ge.f32.partialorder %v2291_v36, 0.0  ;;  %v2468_v44 = vmul.f32 0.01, %v2291_v36  ;;  %v2293_v45 = vpop.f32.mrb[10].mxu1 }
 0x3d2   : > { %v8125_v40 = vsel %vm2455_vm10, %v2289_v8, %v2467_v35  ;;  %vm2458_vm13 = vcmp.ge.f32.partialorder %v2293_v45, 0.0  ;;  %v2470_v11 = vmul.f32 0.01, %v2293_v45  ;;  %v2295_v34 = vpop.f32.mrb[11].mxu1 }
 0x3d3   : > { %v8127_v57 = vsel %vm2456_vm12, %v2291_v36, %v2468_v44  ;;  %vm2459_vm6 = vcmp.ge.f32.partialorder %v2295_v34, 0.0  ;;  %v2471_v60 = vmul.f32 0.01, %v2295_v34  ;;  %v2511_v10 = vrot.slane %v8125_v40, 7 }
 0x3d4   : > { %v8132_v26 = vsel %vm2458_vm13, %v2293_v45, %v2470_v11  ;;  %v2512_v3 = vrot.slane %v8127_v57, 7  ;;  %v2577_v5 = vrot.slane %v8127_v57, 6  ;;  %v2643_v7 = vrot.slane %v8127_v57, 5 }
 0x3d5   : > { %v8137_v4 = vsel %vm2459_vm6, %v2295_v34, %v2471_v60  ;;  %v5665_v17 = vpack.c.bf16 %v8132_v26, %v8125_v40  ;;  %v2514_v6 = vrot.slane %v8132_v26, 7  ;;  %v2579_v22 = vrot.slane %v8132_v26, 6 }
 0x3d6   : > { %v6069_v52 = vpack.i.bf16 %v2513_v59, %v2512_v3  ;;  %v5663_v13 = vpack.c.bf16 %v8137_v4, %v8127_v57  ;;  %v6074_v16 = vpack.i.bf16 %v2578_v46, %v2577_v5  ;;  %v2516_v19 = vrot.slane %v8137_v4, 7 }
 0x3d7   : > { %v2299_v21 = vpop.f32.mrb[12].mxu1  ;;  %v2515_v23 = vsel %vm2510_vm14, %v2511_v10, %v2514_v6  ;;  %v6079_v58 = vpack.i.bf16 %v2644_v62, %v2643_v7  ;;  %v2581_v39 = vrot.slane %v8137_v4, 6  ;;  %v2576_v9 = vrot.slane %v8125_v40, 6 }
 0x3d8   : > { %6070 = vrot.lane.b32.xlu1 %v6069_v52, %s6966_s28  ;;  %v2301_v49 = vpop.f32.mrb[13].mxu1  ;;  %5664 = vmatprep.subr.bf16.mxu0 %v5663_v13  ;;  %v6084_v56 = vpack.i.bf16 %v2515_v23, %v2525_v0  ;;  %v2517_v61 = vsel %vm2510_vm14, %v2512_v3, %v2516_v19  ;;  %v2589_v62 = vrot.slane %v8122_v47, 6  ;;  %v2647_v41 = vrot.slane %v8137_v4, 5 }
 0x3d9   : > { %vm2462_vm6 = vcmp.ge.f32.partialorder %v2301_v49, 0.0  ;;  %v2474_v48 = vmul.f32 0.01, %v2301_v49  ;;  %v2303_v54 = vpop.f32.mrb[14].mxu1  ;;  %5666 = vmatpush1.bf16.msra.mxu0 %v5665_v17  ;;  %v6094_v55 = vpack.i.bf16 %v2517_v61, %v2511_v10  ;;  %v2582_v63 = vsel %vm704_vm2, %v2577_v5, %v2581_v39 }
 0x3da   : > { %6085 = vrot.lane.b32.xlu0 %v6084_v56, %s6966_s28  ;;  %v2305_v59 = vpop.f32.mrb[15].mxu1  ;;  %v6099_v46 = vpack.i.bf16 %v2582_v63, %v2576_v9  ;;  %v2476_v24 = vmul.f32 0.01, %v2303_v54  ;;  %v2580_v42 = vsel %vm704_vm2, %v2576_v9, %v2579_v22  ;;  %vm2464_vm9 = vcmp.ge.f32.partialorder %v2303_v54, 0.0 }
 0x3db   : > { %v8157_v27 = vsel %vm2462_vm6, %v2301_v49, %v2474_v48  ;;  %v6089_v28 = vpack.i.bf16 %v2580_v42, %v8103_v32  ;;  %v2473_v43 = vmul.f32 0.01, %v2299_v21  ;;  %v2642_v8 = vrot.slane %v8125_v40, 5  ;;  %vm8450_vm6 = vmpackc.low %vm2137_vm11, %vm6972_vm7 }
 0x3dc   : > { %6075 = vrot.lane.b32.xlu1 %v6074_v16, %s6967_s21  ;;  %v2522_v35 = vrot.slane %v8157_v27, 7  ;;  %v2587_v36 = vrot.slane %v8157_v27, 6  ;;  %vm2461_vm10 = vcmp.ge.f32.partialorder %v2299_v21, 0.0  ;;  %v2648_v44 = vsel %vm2641_vm15, %v2643_v7, %v2647_v41 }
 0x3dd   : > { %v2590_v32 = vsel %vm704_vm2, %v2583_v30, %v2589_v62  ;;  %v2655_v45 = vrot.slane %v8122_v47, 5  ;;  %v8177_v11 = vsel %vm2464_vm9, %v2303_v54, %v2476_v24  ;;  %v6104_v34 = vpack.i.bf16 %v2648_v44, %v2642_v8 }
 0x3de   : > { %6095 = vrot.lane.b32.xlu0 %v6094_v55, %s6966_s28  ;;  %v2523_v60 = vsel %vm2510_vm14, %v2516_v19, %v2522_v35  ;;  %v2588_v0 = vsel %vm704_vm2, %v2581_v39, %v2587_v36  ;;  %vm2466_vm12 = vcmp.ge.f32.partialorder %v8120_v15, 0.0  ;;  %v2477_v3 = vmul.f32 0.01, %v2305_v59 }
 0x3df   : > { %v6109_v5 = vpack.i.bf16 %v2523_v60, %v8106_v29  ;;  %v6114_v7 = vpack.i.bf16 %v2590_v32, %v2588_v0  ;;  %v8186_v30 = vsel %vm2461_vm10, %v2299_v21, %v2473_v43  ;;  %vm2465_vm13 = vcmp.ge.f32.partialorder %v2305_v59, 0.0 }
 0x3e0   : > { %6080 = vrot.lane.b32.xlu1 %v6079_v58, %s6968_s29  ;;  %v2591_v17 = vrot.slane %v8177_v11, 6  ;;  %v2645_v10 = vrot.slane %v8132_v26, 5  ;;  %v2653_v52 = vrot.slane %v8157_v27, 5  ;;  %v2708_v13 = vrot.slane %v8127_v57, 4 }
 0x3e1   : > { %v8194_v16 = vsel %vm2466_vm12, %v8120_v15, %v2478_v1  ;;  %v2656_v29 = vsel %vm2641_vm15, %v2649_v50, %v2655_v45  ;;  %v2720_v19 = vrot.slane %v8122_v47, 4  ;;  %v8202_v21 = vsel %vm2465_vm13, %v2305_v59, %v2477_v3 }
 0x3e2   : > { %6100 = vrot.lane.b32.xlu0 %v6099_v46, %s6967_s21  ;;  %v2585_v23 = vrot.slane %v8186_v30, 6  ;;  %v2646_v58 = vsel %vm2641_vm15, %v2642_v8, %v2645_v10  ;;  %v2654_v57 = vsel %vm2641_vm15, %v2647_v41, %v2653_v52  ;;  %v2526_v15 = vrot.slane %v8177_v11, 7 }
 0x3e3   : > { %v6139_v39 = vpack.i.bf16 %v2646_v58, %v2656_v29  ;;  %v6134_v49 = vpack.i.bf16 %v2654_v57, %v8111_v12  ;;  %v6154_v50 = vpack.i.bf16 %v2709_v38, %v2708_v13  ;;  %v2520_v61 = vrot.slane %v8186_v30, 7 }
 0x3e4   : > { %6090 = vrot.lane.b32.xlu1 %v6089_v28, %s6967_s21  ;;  %v2592_v56 = vsel %vm704_vm2, %v2585_v23, %v2591_v17  ;;  %v2530_v9 = vrot.slane %v8194_v16, 7  ;;  %v2528_v48 = vrot.slane %v8202_v21, 7  ;;  %v2707_v54 = vrot.slane %v8125_v40, 4 }
 0x3e5   : > { %v2712_v55 = vrot.slane %v8137_v4, 4  ;;  %v2710_v63 = vrot.slane %v8132_v26, 4  ;;  %v2718_v38 = vrot.slane %v8157_v27, 4  ;;  %v2721_v12 = vsel %vm711_vm3, %v2714_v51, %v2720_v19 }
 0x3e6   : > { %6105 = vrot.lane.b32.xlu0 %v6104_v34, %s6968_s29  ;;  %v2586_v59 = vsel %vm704_vm2, %v2579_v22, %v2585_v23  ;;  %v2527_v40 = vsel %vm2510_vm14, %v2520_v61, %v2526_v15  ;;  %v2531_v51 = vsel %vm2510_vm14, %v2524_v25, %v2530_v9  ;;  %v2529_v22 = vsel %vm2510_vm14, %v2522_v35, %v2528_v48  ;;  %v2786_v9 = vld [vmem:[%s9429_s5 + $0x28] sm:$0xff]  ;;  %v2787_v48 = vld [vmem:[%s9429_s5 + $0x30] sm:$0x3] }
 0x3e7   : > { %v2713_v4 = vsel %vm711_vm3, %v2708_v13, %v2712_v55  ;;  %v2711_v46 = vsel %vm711_vm3, %v2707_v54, %v2710_v63  ;;  %v6124_v24 = vpack.i.bf16 %v2586_v59, %v2592_v56  ;;  %v2719_v28 = vsel %vm711_vm3, %v2712_v55, %v2718_v38  ;;  %v2784_v56 = vld [vmem:[%s9429_s5 + $0x18] sm:$0xff] }
 0x3e8   : > { %6110 = vrot.lane.b32.xlu1 %v6109_v5, %s6966_s28  ;;  %v6159_v42 = vpack.i.bf16 %v2713_v4, %v2707_v54  ;;  %v6169_v1 = vpack.i.bf16 %v2711_v46, %v8118_v18  ;;  %v6174_v41 = vpack.i.bf16 %v2721_v12, %v2719_v28  ;;  %v6119_v43 = vpack.i.bf16 %v2527_v40, %v2531_v51 }
 0x3e9   : > { %v2521_v8 = vsel %vm2510_vm14, %v2514_v6, %v2520_v61  ;;  %v2593_v44 = vrot.slane %v8202_v21, 6  ;;  %v2595_v32 = vrot.slane %v8194_v16, 6  ;;  %v2657_v35 = vrot.slane %v8177_v11, 5  ;;  %v2785_v61 = vld [vmem:[%s9429_s5 + $0x20] sm:$0xff] }
 0x3ea   : > { %6115 = vrot.lane.b32.xlu0 %v6114_v7, %s6967_s21  ;;  %v6129_v18 = vpack.i.bf16 %v2529_v22, %v2521_v8  ;;  %v2651_v6 = vrot.slane %v8186_v30, 5  ;;  %v2661_v34 = vrot.slane %v8194_v16, 5  ;;  %v2659_v60 = vrot.slane %v8202_v21, 5 }
 0x3eb   : > { %v2594_v25 = vsel %vm704_vm2, %v2587_v36, %v2593_v44  ;;  %v2596_v26 = vsel %vm704_vm2, %v2589_v62, %v2595_v32  ;;  %v2724_v13 = vrot.slane %v8202_v21, 4  ;;  %v2726_v29 = vrot.slane %v8194_v16, 4 }
 0x3ec   : > { %6125 = vrot.lane.b32.xlu1 %v6124_v24, %s6967_s21  ;;  %v6144_v0 = vpack.i.bf16 %v2596_v26, %v2594_v25  ;;  %v2658_v3 = vsel %vm2641_vm15, %v2651_v6, %v2657_v35  ;;  %v2662_v36 = vsel %vm2641_vm15, %v2655_v45, %v2661_v34  ;;  %v2660_v5 = vsel %vm2641_vm15, %v2653_v52, %v2659_v60 }
 0x3ed   : > { %v6149_v62 = vpack.i.bf16 %v2658_v3, %v2662_v36  ;;  %v2652_v7 = vsel %vm2641_vm15, %v2645_v10, %v2651_v6  ;;  %v2722_v23 = vrot.slane %v8177_v11, 4  ;;  %v2725_v45 = vsel %vm711_vm3, %v2718_v38, %v2724_v13 }
 0x3ee   : > { %6120 = vrot.lane.b32.xlu0 %v6119_v43, %s6966_s28  ;;  %v6164_v17 = vpack.i.bf16 %v2660_v5, %v2652_v7  ;;  %v2716_v52 = vrot.slane %v8186_v30, 4  ;;  %v2727_v10 = vsel %vm711_vm3, %v2720_v19, %v2726_v29  ;;  %v2782_v19 = vld [vmem:[%s9429_s5 + $0x8] sm:$0xff]  ;;  %vm6975_vm7 = vmmov 0  }
 0x3ef   : > { %v6179_v57 = vpack.i.bf16 %v2727_v10, %v2725_v45  ;;  %vm3464_vm11 = vcmask 916480  }
 0x3f0   : > { %6130 = vrot.lane.b32.xlu1 %v6129_v18, %s6966_s28  ;;  %v2723_v58 = vsel %vm711_vm3, %v2716_v52, %v2722_v23  ;;  %v2717_v15 = vsel %vm711_vm3, %v2710_v63, %v2716_v52 }
 0x3f2   : > { %6140 = vrot.lane.b32.xlu0 %v6139_v39, %s6968_s29  ;;  %v6184_v39 = vpack.i.bf16 %v2723_v58, %v2717_v15 }
 0x3f4   : > { %6135 = vrot.lane.b32.xlu1 %v6134_v49, %s6968_s29  ;;  %v2781_v49 = vld [vmem:[%s9429_s5] sm:$0xff] }
 0x3f6   : > { %6145 = vrot.lane.b32.xlu0 %v6144_v0, %s6967_s21 }
 0x3f8   : > { %6155 = vrot.lane.b32.xlu1 %v6154_v50, %s6969_s25  ;;  %v2783_v50 = vld [vmem:[%s9429_s5 + $0x10] sm:$0xff] }
 0x3fa   : > { %6150 = vrot.lane.b32.xlu0 %v6149_v62, %s6968_s29 }
 0x3fc   : > { %6165 = vrot.lane.b32.xlu1 %v6164_v17, %s6968_s29 }
 0x3fe   : > { %6160 = vrot.lane.b32.xlu0 %v6159_v42, %s6969_s25 }
 0x400   : > { %6170 = vrot.lane.b32.xlu1 %v6169_v1, %s6969_s25 }
 0x402   : > { %6175 = vrot.lane.b32.xlu0 %v6174_v41, %s6969_s25 }
 0x404   : > { %6180 = vrot.lane.b32.xlu1 %v6179_v57, %s6969_s25 }
 0x406   : > { %6185 = vrot.lane.b32.xlu0 %v6184_v39, %s6969_s25 }
 0x408   : > { %2790 = vperm.xlu1 %6008, %v2781_v49  }
 0x40a   : > { %2795 = vperm.xlu0 %6007, %v2782_v19  }
 0x40c   : > { %2800 = vperm.xlu1 %6008, %v2783_v50  }
 0x40e   : > { %2805 = vperm.xlu0 %6007, %v2784_v56  }
 0x410   : > { %2810 = vperm.xlu1 %6008, %v2785_v61  }
 0x412   : > { %2815 = vperm.xlu0 %6007, %v2786_v9  }
 0x414   : > { %2820 = vperm.xlu1 %6008, %v2787_v48  }
 0x44a   : > { %v8306_v54 = vpop.permute.xlu1 %6070 }
 0x44b   : > { %v6073_v55 = vunpack.i.h.bf16 %v8306_v54  ;;  %v6072_v63 = vunpack.i.l.bf16 %v8306_v54  ;;  %v2493_v54 = vld [vmem:[#allocation2 + $0x10] sm:$0xff] }
 0x44c   : > { %v8310_v38 = vpop.permute.xlu0 %6085 }
 0x44d   : > { %v2557_v12 = vsel %vm621_vm0, %v6072_v63, %v6073_v55  ;;  %v6087_v18 = vunpack.i.l.bf16 %v8310_v38  ;;  %v6088_v60 = vunpack.i.h.bf16 %v8310_v38 }
 0x44e   : > { %v8315_v59 = vpop.permute.xlu1 %6075  ;;  %v2770_v40 = vsel %vm2510_vm14, %v8202_v21, %v2557_v12 }
 0x44f   : > { %v5667_v4 = vpack.c.bf16 %v2770_v40, %v8157_v27  ;;  %v6077_v25 = vunpack.i.l.bf16 %v8315_v59 }
 0x450   : > { %v6096_v46 = vpop.permute.xlu0 %6095 }
 0x451   : > { %v6097_v24 = vunpack.i.l.bf16 %v6096_v46  ;;  %5668 = vmatprep.subr.bf16.mxu0 %v5667_v4  ;;  %v6098_v27 = vunpack.i.h.bf16 %v6096_v46 }
 0x452   : > { %v8320_v42 = vpop.permute.xlu1 %6080 }
 0x453   : > { %v2556_v1 = vsel %vm621_vm0, %v6097_v24, %v6072_v63  ;;  %v2558_v62 = vsel %vm621_vm0, %v6088_v60, %v6098_v27  ;;  %v6083_v29 = vunpack.i.h.bf16 %v8320_v42  ;;  %v6082_v58 = vunpack.i.l.bf16 %v8320_v42 }
 0x454   : > { %v6101_v28 = vpop.permute.xlu0 %6100  ;;  %v2769_v51 = vsel %vm2510_vm14, %v8177_v11, %v2556_v1 }
 0x455   : > { %v5669_v22 = vpack.c.bf16 %v2769_v51, %v8186_v30  ;;  %v6078_v30 = vunpack.i.h.bf16 %v8315_v59  ;;  %v6102_v0 = vunpack.i.l.bf16 %v6101_v28  ;;  %v6103_v23 = vunpack.i.h.bf16 %v6101_v28  ;;  %v2496_v59 = vld [vmem:[#allocation2 + $0x28] sm:$0xff] }
 0x456   : > { %v8326_v41 = vpop.permute.xlu1 %6090 }
 0x457   : > { %5670 = vmatpush1.bf16.msra.mxu0 %v5669_v22  ;;  %v6092_v3 = vunpack.i.l.bf16 %v8326_v41  ;;  %v2622_v5 = vsel %vm648_vm1, %v6077_v25, %v6078_v30  ;;  %v6093_v45 = vunpack.i.h.bf16 %v8326_v41  ;;  %v2621_v57 = vsel %vm648_vm1, %v6102_v0, %v6077_v25  ;;  %v2497_v41 = vld [vmem:[#allocation2 + $0x30] sm:$0x3] }
 0x458   : > { %v8328_v43 = vpop.permute.xlu0 %6105 }
 0x459   : > { %v6107_v49 = vunpack.i.l.bf16 %v8328_v43  ;;  %v2624_v61 = vsel %vm648_vm1, %v6103_v23, %v6092_v3  ;;  %v2623_v40 = vsel %vm648_vm1, %v6093_v45, %v6103_v23 }
 0x45a   : > { %v8330_v21 = vpop.permute.xlu1 %6110 }
 0x45b   : > { %v6113_v8 = vunpack.i.h.bf16 %v8330_v21  ;;  %v6112_v44 = vunpack.i.l.bf16 %v8330_v21 }
 0x45c   : > { %v8335_v32 = vpop.permute.xlu0 %6115 }
 0x45d   : > { %v2559_v11 = vsel %vm621_vm0, %v6098_v27, %v6112_v44  ;;  %v2561_v26 = vsel %vm621_vm0, %v6113_v8, %v6087_v18  ;;  %v6118_v9 = vunpack.i.h.bf16 %v8335_v32  ;;  %v6117_v48 = vunpack.i.l.bf16 %v8335_v32  ;;  %v6680_v32 = vld [vmem:[%s9430_s6] ss:$8 sps:$4 sm:$0xff]  }
 0x45e   : > { %v6126_v35 = vpop.permute.xlu1 %6125  ;;  %v5671_v6 = vpack.c.bf16 %v2561_v26, %v2559_v11  ;;  %v2687_v26 = vsel %vm674_vm4, %v6107_v49, %v6082_v58 }
 0x45f   : > { %v6128_v4 = vunpack.i.h.bf16 %v6126_v35  ;;  %v6127_v46 = vunpack.i.l.bf16 %v6126_v35  ;;  %v2688_v35 = vsel %vm674_vm4, %v6082_v58, %v6083_v29  ;;  %v2626_v0 = vsel %vm648_vm1, %v6117_v48, %v6118_v9 }
 0x460   : > { %v8345_v34 = vpop.permute.xlu0 %6120  ;;  %5672 = vmatprep.subr.bf16.mxu0 %v5671_v6 }
 0x461   : > { %v6123_v7 = vunpack.i.h.bf16 %v8345_v34  ;;  %v6122_v52 = vunpack.i.l.bf16 %v8345_v34  ;;  %v6685_v34 = vld [vmem:[%s9430_s6 + $0x14] ss:$8 sps:$4 sm:$0xff]  }
 0x462   : > { %v6131_v36 = vpop.permute.xlu1 %6130 }
 0x463   : > { %v6133_v17 = vunpack.i.h.bf16 %v6131_v36  ;;  %v6132_v13 = vunpack.i.l.bf16 %v6131_v36  ;;  %v2774_v2 = vsel %vm704_vm2, %v6122_v52, %v6078_v30  ;;  %v6682_v30 = vld [vmem:[%s9430_s6 + $0x4] ss:$8 sps:$4 sm:$0xff]  }
 0x464   : > { %v8357_v10 = vpop.permute.xlu0 %6140  ;;  %3477 = vmatprep.subr.bf16.mxu1 %v6682_v30 }
 0x465   : > { %v2562_v15 = vsel %vm621_vm0, %v6123_v7, %v6133_v17  ;;  %v2560_v39 = vsel %vm621_vm0, %v6132_v13, %v6113_v8  ;;  %v2563_v56 = vsel %vm621_vm0, %v6133_v17, %v6122_v52  ;;  %v6108_v8 = vunpack.i.h.bf16 %v8328_v43  ;;  %3478 = vmatpush1.bf16.msra.mxu1 %v6680_v32  ;;  %v6691_v52 = vld [vmem:[%s9430_s6 + $0x34] ss:$8 sps:$4 sm:$0xff]  }
 0x466   : > { %v8364_v19 = vpop.permute.xlu1 %6135  ;;  %v5673_v50 = vpack.c.bf16 %v2560_v39, %v2558_v62  ;;  %v2773_v63 = vsel %vm704_vm2, %v2563_v56, %v2622_v5  ;;  %v2772_v12 = vsel %vm704_vm2, %v2562_v15, %v2621_v57  ;;  %v6142_v6 = vunpack.i.l.bf16 %v8357_v10  ;;  %3479 = vmatprep.subr.bf16.mxu1 %v6685_v34  ;;  %v6730_v34 = vld [vmem:[%s9430_s6 + $0x104] ss:$8 sps:$4 sm:$0xff]  }
 0x467   : > { %v5675_v1 = vpack.c.bf16 %v2624_v61, %v2773_v63  ;;  %v6138_v28 = vunpack.i.h.bf16 %v8364_v19  ;;  %v6137_v51 = vunpack.i.l.bf16 %v8364_v19  ;;  %v5677_v25 = vpack.c.bf16 %v2623_v40, %v2772_v12  ;;  %v6694_v19 = vld [vmem:[%s9430_s6 + $0x44] ss:$8 sps:$4 sm:$0xff]  }
 0x468   : > { %v8377_v24 = vpop.permute.xlu0 %6145  ;;  %5674 = vmatpush1.bf16.msra.mxu0 %v5673_v50  ;;  %v2625_v43 = vsel %vm648_vm1, %v6128_v4, %v6117_v48  ;;  %v6143_v36 = vunpack.i.h.bf16 %v8357_v10  ;;  %v6689_v10 = vld [vmem:[%s9430_s6 + $0x30] ss:$8 sps:$4 sm:$0xff]  }
 0x469   : > { %v6148_v22 = vunpack.i.h.bf16 %v8377_v24  ;;  %v6147_v27 = vunpack.i.l.bf16 %v8377_v24  ;;  %5676 = vmatprep.subr.bf16.mxu0 %v5675_v1  ;;  %v2690_v23 = vsel %vm674_vm4, %v6108_v8, %v6137_v51  ;;  %v2692_v45 = vsel %vm674_vm4, %v6138_v28, %v6142_v6  ;;  %v6697_v24 = vld [vmem:[%s9430_s6 + $0x54] ss:$8 sps:$4 sm:$0xff]  }
 0x46a   : > { %v8384_v11 = vpop.permute.xlu1 %6155  ;;  %v2689_v49 = vsel %vm674_vm4, %v6143_v36, %v6108_v8  ;;  %v5683_v48 = vpack.c.bf16 %v2692_v45, %v2690_v23  ;;  %v5713_v42 = vpack.c.bf16 %v6142_v6, %v6137_v51  ;;  %v6695_v51 = vld [vmem:[%s9430_s6 + $0x50] ss:$8 sps:$4 sm:$0xff]   ;;  %v6703_v6 = vld [vmem:[%s9430_s6 + $0x74] ss:$8 sps:$4 sm:$0xff]  }
 0x46b   : > { %v2627_v60 = vsel %vm648_vm1, %v6127_v46, %v6147_v27  ;;  %v2628_v62 = vsel %vm648_vm1, %v6147_v27, %v6148_v22  ;;  %v6158_v50 = vunpack.i.h.bf16 %v8384_v11  ;;  %v6157_v63 = vunpack.i.l.bf16 %v8384_v11  ;;  %v6698_v11 = vld [vmem:[%s9430_s6 + $0x60] ss:$8 sps:$4 sm:$0xff]  }
 0x46c   : > { %v8397_v5 = vpop.permute.xlu0 %6150  ;;  %5678 = vmatpush1.bf16.msra.mxu0 %v5677_v25  ;;  %v2775_v7 = vsel %vm2641_vm15, %v2627_v60, %v2687_v26  ;;  %v2776_v17 = vsel %vm2641_vm15, %v2628_v62, %v2688_v35 }
 0x46d   : > { %v5681_v13 = vpack.c.bf16 %v2775_v7, %v2625_v43  ;;  %v5679_v57 = vpack.c.bf16 %v2776_v17, %v2626_v0  ;;  %v6153_v56 = vunpack.i.h.bf16 %v8397_v5  ;;  %v6152_v12 = vunpack.i.l.bf16 %v8397_v5  ;;  %v6701_v5 = vld [vmem:[%s9430_s6 + $0x70] ss:$8 sps:$4 sm:$0xff]  }
 0x46e   : > { %v6166_v58 = vpop.permute.xlu1 %6165  ;;  %v2753_v7 = vsel %vm698_vm5, %v6157_v63, %v6158_v50 }
 0x46f   : > { %v6168_v15 = vunpack.i.h.bf16 %v6166_v58  ;;  %v6167_v39 = vunpack.i.l.bf16 %v6166_v58  ;;  %5680 = vmatprep.subr.bf16.mxu0 %v5679_v57  ;;  %v2780_v21 = vsel %vm711_vm3, %v6152_v12, %v6158_v50  ;;  %v6706_v50 = vld [vmem:[%s9430_s6 + $0x84] ss:$8 sps:$4 sm:$0xff]  }
 0x470   : > { %v6161_v61 = vpop.permute.xlu0 %6160  ;;  %5682 = vmatpush1.bf16.msra.mxu0 %v5681_v13 }
 0x471   : > { %v2691_v40 = vsel %vm674_vm4, %v6167_v39, %v6138_v28  ;;  %v6162_v4 = vunpack.i.l.bf16 %v6161_v61  ;;  %v2693_v46 = vsel %vm674_vm4, %v6153_v56, %v6168_v15  ;;  %v6163_v1 = vunpack.i.h.bf16 %v6161_v61  ;;  %5684 = vmatprep.subr.bf16.mxu0 %v5683_v48 }
 0x472   : > { %v8417_v27 = vpop.permute.xlu1 %6170  ;;  %v5685_v8 = vpack.c.bf16 %v2691_v40, %v2689_v49  ;;  %v2694_v60 = vsel %vm674_vm4, %v6168_v15, %v6152_v12  ;;  %v6704_v12 = vld [vmem:[%s9430_s6 + $0x80] ss:$8 sps:$4 sm:$0xff]  }
 0x473   : > { %v2752_v25 = vsel %vm698_vm5, %v6162_v4, %v6157_v63  ;;  %v6173_v35 = vunpack.i.h.bf16 %v8417_v27  ;;  %v6172_v26 = vunpack.i.l.bf16 %v8417_v27  ;;  %v2779_v23 = vsel %vm711_vm3, %v2694_v60, %v2753_v7  ;;  %v2492_v60 = vld [vmem:[#allocation2 + $0x8] sm:$0xff]  ;;  %v6709_v27 = vld [vmem:[%s9430_s6 + $0x94] ss:$8 sps:$4 sm:$0xff]  }
 0x474   : > { %v8425_v28 = vpop.permute.xlu0 %6175  ;;  %v2778_v0 = vsel %vm711_vm3, %v2693_v46, %v2752_v25  ;;  %5686 = vmatpush1.bf16.msra.mxu0 %v5685_v8  ;;  %v2491_v8 = vld [vmem:[#allocation2] sm:$0xff]  ;;  %v6974_v25 = vmov 0.0|0.0  }
 0x475   : > { %v2754_v43 = vsel %vm698_vm5, %v6173_v35, %v6163_v1  ;;  %v6178_v36 = vunpack.i.h.bf16 %v8425_v28  ;;  %v6177_v62 = vunpack.i.l.bf16 %v8425_v28  ;;  %v2755_v13 = vsel %vm698_vm5, %v6163_v1, %v6172_v26  ;;  %v6712_v28 = vld [vmem:[%s9430_s6 + $0xa4] ss:$8 sps:$4 sm:$0xff]  }
 0x476   : > { %v8434_v17 = vpop.permute.xlu1 %6180  ;;  %v5689_v45 = vpack.c.bf16 %v2754_v43, %v2778_v0  ;;  %v5687_v15 = vpack.c.bf16 %v2755_v13, %v2779_v23  ;;  %v2771_v35 = vsel %vm2510_vm14, %v8194_v16, %v6073_v55  ;;  %v5704_v16 = vpack.c.bf16 %v6087_v18, %v6112_v44  ;;  %v2495_v55 = vld [vmem:[#allocation2 + $0x20] sm:$0xff] }
 0x477   : > { %v6183_v58 = vunpack.i.h.bf16 %v8434_v17  ;;  %v6182_v57 = vunpack.i.l.bf16 %v8434_v17  ;;  %v2757_v49 = vsel %vm698_vm5, %v6177_v62, %v6178_v36  ;;  %v5701_v0 = vpack.c.bf16 %v2771_v35, %v8122_v47  ;;  %v6710_v43 = vld [vmem:[%s9430_s6 + $0xa0] ss:$8 sps:$4 sm:$0xff]   ;;  %v6718_v7 = vld [vmem:[%s9430_s6 + $0xc4] ss:$8 sps:$4 sm:$0xff]  }
 0x478   : > { %v6186_v39 = vpop.permute.xlu0 %6185  ;;  %5688 = vmatprep.subr.bf16.mxu0 %v5687_v15  ;;  %v2777_v47 = vsel %vm2641_vm15, %v6148_v22, %v6083_v29  ;;  %v5716_v44 = vpack.c.bf16 %v6172_v26, %v2780_v21  ;;  %v6686_v29 = vld [vmem:[%s9430_s6 + $0x20] ss:$8 sps:$4 sm:$0xff]   ;;  %v6700_v22 = vld [vmem:[%s9430_s6 + $0x64] ss:$8 sps:$4 sm:$0xff]   ;;  %v6707_v26 = vld [vmem:[%s9430_s6 + $0x90] ss:$8 sps:$4 sm:$0xff]  }
 0x479   : > { %v2759_v56 = vsel %vm698_vm5, %v6182_v57, %v6183_v58  ;;  %v6188_v61 = vunpack.i.h.bf16 %v6186_v39  ;;  %v6187_v48 = vunpack.i.l.bf16 %v6186_v39  ;;  %5690 = vmatpush1.bf16.msra.mxu0 %v5689_v45  ;;  %v5710_v38 = vpack.c.bf16 %v2777_v47, %v6118_v9  ;;  %v6692_v9 = vld [vmem:[%s9430_s6 + $0x40] ss:$8 sps:$4 sm:$0xff]  }
 0x47a   : > { %v5691_v40 = vpack.c.bf16 %v2759_v56, %v2757_v49  ;;  %v5719_v18 = vpack.c.bf16 %v6183_v58, %v6178_v36  ;;  %v6715_v36 = vld [vmem:[%s9430_s6 + $0xb4] ss:$8 sps:$4 sm:$0xff]   ;;  %v6716_v17 = vld [vmem:[%s9430_s6 + $0xc0] ss:$8 sps:$4 sm:$0xff]  }
 0x47b   : > { %v2756_v4 = vsel %vm698_vm5, %v6187_v48, %v6177_v62  ;;  %v2758_v46 = vsel %vm698_vm5, %v6188_v61, %v6182_v57  ;;  %v6713_v62 = vld [vmem:[%s9430_s6 + $0xb0] ss:$8 sps:$4 sm:$0xff]  }
 0x47c   : > { %v5694_v1 = vpack.c.bf16 %v2758_v46, %v2756_v4  ;;  %5693 = vmatprep.subr.msk.bf16.mxu0 %vm8450_vm6, %v5691_v40  ;;  %v6719_v46 = vld [vmem:[%s9430_s6 + $0xd0] ss:$8 sps:$4 sm:$0xff]  }
 0x47e   : > { %5696 = vmatpush1.bf16.msk.msra.mxu0 %vm8450_vm6, %v5694_v1  ;;  %v6721_v1 = vld [vmem:[%s9430_s6 + $0xd4] ss:$8 sps:$4 sm:$0xff]  }
 0x47f   : > { %5697 = vmatprep.subr.bf16.mxu0 %v6974_v25 }
 0x481   : > { %5312 = vmatmul.mubr.msk.f32.vlgmr.msra.gmra.mrb[40].mxu0 %vm674_vm4, %v2491_v8 }
 0x482   : > { %5699 = vmatpush3.bf16.msra.mxu0 %v5698_v33  ;;  %2920 = vmatprep.mubr.f32.mxu0 %v6970_v31  ;;  %v5707_v33 = vpack.c.bf16 %v6092_v3, %v2774_v2  ;;  %v6688_v3 = vld [vmem:[%s9430_s6 + $0x24] ss:$8 sps:$4 sm:$0xff]  }
 0x483   : > { %5700 = vmatprep.subr.bf16.mxu0 %v6974_v25 }
 0x485   : > { %5313 = vmatmul.mubr.msk.f32.gmra.mrb[42].mxu0 %vm674_vm4, %v2492_v60 }
 0x486   : > { %5702 = vmatpush3.bf16.msra.mxu0 %v5701_v0  ;;  %2926 = vmatprep.mubr.f32.mxu0 %v6970_v31 }
 0x487   : > { %5703 = vmatprep.subr.bf16.mxu0 %v6974_v25 }
 0x489   : > { %5314 = vmatmul.mubr.msk.f32.gmra.mrb[44].mxu0 %vm674_vm4, %v2493_v54  ;;  %v2796_v2 = vpop.permute.xlu0 %2795 }
 0x48a   : > { %5705 = vmatpush3.bf16.msra.mxu0 %v5704_v16  ;;  %2932 = vmatprep.mubr.f32.mxu0 %v6970_v31  ;;  %v6724_v16 = vld [vmem:[%s9430_s6 + $0xe4] ss:$8 sps:$4 sm:$0xff]  }
 0x48b   : > { %5706 = vmatprep.subr.bf16.mxu0 %v6974_v25 }
 0x48d   : > { %5315 = vmatmul.mubr.msk.f32.gmra.mrb[46].mxu0 %vm674_vm4, %v2494_v53 }
 0x48e   : > { %5708 = vmatpush3.bf16.msra.mxu0 %v5707_v33  ;;  %2938 = vmatprep.mubr.f32.mxu0 %v6970_v31 }
 0x48f   : > { %5709 = vmatprep.subr.bf16.mxu0 %v6974_v25 }
 0x491   : > { %5316 = vmatmul.mubr.msk.f32.gmra.mrb[48].mxu0 %vm674_vm4, %v2495_v55 }
 0x492   : > { %5711 = vmatpush3.bf16.msra.mxu0 %v5710_v38  ;;  %2944 = vmatprep.mubr.f32.mxu0 %v6970_v31  ;;  %v6725_v38 = vld [vmem:[%s9430_s6 + $0xf0] ss:$8 sps:$4 sm:$0xff]  }
 0x493   : > { %5712 = vmatprep.subr.bf16.mxu0 %v6974_v25 }
 0x495   : > { %5317 = vmatmul.mubr.msk.f32.gmra.mrb[50].mxu0 %vm674_vm4, %v2496_v59 }
 0x496   : > { %5714 = vmatpush3.bf16.msra.mxu0 %v5713_v42  ;;  %2950 = vmatprep.mubr.f32.mxu0 %v6970_v31 }
 0x497   : > { %5715 = vmatprep.subr.bf16.mxu0 %v6974_v25 }
 0x499   : > { %5318 = vmatmul.mubr.msk.f32.gmra.mrb[52].mxu0 %vm674_vm4, %v2497_v41 }
 0x49a   : > { %5717 = vmatpush3.bf16.msra.mxu0 %v5716_v44  ;;  %5604 = vmatprep.mubr.msk.f32.mxu0 %vm6975_vm7, %v6970_v31 }
 0x49b   : > { %5718 = vmatprep.subr.bf16.mxu0 %v6974_v25 }
 0x49e   : > { %5721 = vmatpush3.bf16.msk.msra.mxu0 %vm8450_vm6, %v5719_v18 }
 0x4a1   : > { %5605 = vmatmul.mubr.msk.f32.vlgmr.msra.gmra.mrb[54].mxu0 %vm674_vm4, %v2491_v8  ;;  %v2791_v8 = vpop.permute.xlu1 %2790 }
 0x4a2   : > { %5607 = vmatprep.mubr.msk.f32.mxu0 %vm6975_vm7, %v6970_v31 }
 0x4a5   : > { %5608 = vmatmul.mubr.msk.f32.gmra.mrb[56].mxu0 %vm674_vm4, %v2492_v60  ;;  %v2801_v32 = vpop.permute.xlu1 %2800 }
 0x4a6   : > { %5610 = vmatprep.mubr.msk.f32.mxu0 %vm6975_vm7, %v6970_v31 }
 0x4a9   : > { %5611 = vmatmul.mubr.msk.f32.gmra.mrb[58].mxu0 %vm674_vm4, %v2493_v54  ;;  %v6722_v54 = vld [vmem:[%s9430_s6 + $0xe0] ss:$8 sps:$4 sm:$0xff]  }
 0x4aa   : > { %5613 = vmatprep.mubr.msk.f32.mxu0 %vm6975_vm7, %v6970_v31 }
 0x4ad   : > { %5614 = vmatmul.mubr.msk.f32.gmra.mrb[60].mxu0 %vm674_vm4, %v2494_v53  ;;  %v6727_v53 = vld [vmem:[%s9430_s6 + $0xf4] ss:$8 sps:$4 sm:$0xff]  }
 0x4ae   : > { %5616 = vmatprep.mubr.msk.f32.mxu0 %vm6975_vm7, %v6970_v31 }
 0x4b1   : > { %5617 = vmatmul.mubr.msk.f32.gmra.mrb[62].mxu0 %vm674_vm4, %v2495_v55 }
 0x4b2   : > { %5619 = vmatprep.mubr.msk.f32.mxu0 %vm6975_vm7, %v6970_v31 }
 0x4b5   : > { %5620 = vmatmul.mubr.msk.f32.gmra.mrb[64].mxu0 %vm674_vm4, %v2496_v59 }
 0x4b6   : > { %5622 = vmatprep.mubr.msk.f32.mxu0 %vm6975_vm7, %v6970_v31  ;;  %v6683_v31 = vld [vmem:[%s9430_s6 + $0x10] ss:$8 sps:$4 sm:$0xff]  }
 0x4b7   : > { %3480 = vmatpush1.bf16.msra.mxu1 %v6683_v31 }
 0x4b8   : > { %3481 = vmatprep.subr.bf16.mxu1 %v6688_v3 }
 0x4b9   : > { %5623 = vmatmul.mubr.msk.f32.gmra.mrb[66].mxu0 %vm674_vm4, %v2497_v41 }
 0x4bb   : > { %3482 = vmatpush1.bf16.msra.mxu1 %v6686_v29 }
 0x4bc   : > { %3483 = vmatprep.subr.bf16.mxu1 %v6691_v52  ;;  %v2806_v52 = vpop.permute.xlu0 %2805 }
 0x4bf   : > { %3484 = vmatpush1.bf16.msra.mxu1 %v6689_v10 }
 0x4c0   : > { %3485 = vmatprep.subr.bf16.mxu1 %v6694_v19 }
 0x4c3   : > { %3486 = vmatpush1.bf16.msra.mxu1 %v6692_v9 }
 0x4c4   : > { %3487 = vmatprep.subr.bf16.mxu1 %v6697_v24 }
 0x4c7   : > { %3488 = vmatpush1.bf16.msra.mxu1 %v6695_v51 }
 0x4c8   : > { %3489 = vmatprep.subr.bf16.mxu1 %v6700_v22 }
 0x4cb   : > { %3490 = vmatpush1.bf16.msra.mxu1 %v6698_v11 }
 0x4cc   : > { %3491 = vmatprep.subr.bf16.mxu1 %v6703_v6 }
 0x4cf   : > { %3492 = vmatpush1.bf16.msra.mxu1 %v6701_v5 }
 0x4d0   : > { %3493 = vmatprep.subr.bf16.mxu1 %v6706_v50  ;;  %v2811_v50 = vpop.permute.xlu1 %2810 }
 0x4d3   : > { %3494 = vmatpush1.bf16.msra.mxu1 %v6704_v12 }
 0x4d4   : > { %3495 = vmatprep.subr.bf16.mxu1 %v6709_v27 }
 0x4d7   : > { %3496 = vmatpush1.bf16.msra.mxu1 %v6707_v26 }
 0x4d8   : > { %3497 = vmatprep.subr.bf16.mxu1 %v6712_v28 }
 0x4db   : > { %3498 = vmatpush1.bf16.msra.mxu1 %v6710_v43  ;;  %v2816_v43 = vpop.permute.xlu0 %2815 }
 0x4dc   : > { %3499 = vmatprep.subr.bf16.mxu1 %v6715_v36 }
 0x4df   : > { %3500 = vmatpush1.bf16.msra.mxu1 %v6713_v62 }
 0x4e0   : > { %3501 = vmatprep.subr.bf16.mxu1 %v6718_v7 }
 0x4e3   : > { %3502 = vmatpush1.bf16.msra.mxu1 %v6716_v17 }
 0x4e4   : > { %3503 = vmatprep.subr.bf16.mxu1 %v6721_v1 }
 0x4e7   : > { %3504 = vmatpush1.bf16.msra.mxu1 %v6719_v46 }
 0x4e8   : > { %3505 = vmatprep.subr.bf16.mxu1 %v6724_v16 }
 0x4eb   : > { %3506 = vmatpush1.bf16.msra.mxu1 %v6722_v54 }
 0x4ec   : > { %3507 = vmatprep.subr.bf16.mxu1 %v6727_v53 }
 0x4ef   : > { %3508 = vmatpush1.bf16.msra.mxu1 %v6725_v38 }
 0x4f0   : > { %3548 = vmatprep.subr.bf16.mxu1 %v6730_v34 }
 0x554   : > { %v2916_v13 = vpop.f32.mrb[40].mxu0 }
 0x555   : > { %v2918_v23 = vpop.f32.mrb[41].mxu0  ;;  %v8649_v59 = vadd.f32 %v2916_v13, %v2791_v8 }
 0x556   : > { %v8629_v35 = vadd.f32 %v2918_v23, %v2791_v8 }
 0x558   : > { %v2922_v45 = vpop.f32.mrb[42].mxu0 }
 0x559   : > { %v2924_v58 = vpop.f32.mrb[43].mxu0  ;;  %v8642_v33 = vadd.f32 %v2922_v45, %v2796_v2 }
 0x55a   : > { %v8651_v42 = vadd.f32 %v2924_v58, %v2796_v2 }
 0x55b   : > { %v6199_v44 = vpack.i.bf16 %v8642_v33, %v8649_v59 }
 0x55c   : > { %v2928_v57 = vpop.f32.mrb[44].mxu0 }
 0x55d   : > { %v2930_v15 = vpop.f32.mrb[45].mxu0  ;;  %v8673_v24 = vadd.f32 %v2928_v57, %v2801_v32 }
 0x55e   : > { %v8663_v31 = vadd.f32 %v2930_v15, %v2801_v32  ;;  %v2821_v15 = vpop.permute.xlu1 %2820 }
 0x560   : > { %v2934_v39 = vpop.f32.mrb[46].mxu0 }
 0x561   : > { %v2936_v49 = vpop.f32.mrb[47].mxu0  ;;  %v8669_v10 = vadd.f32 %v2934_v39, %v2806_v52 }
 0x562   : > { %v8675_v51 = vadd.f32 %v2936_v49, %v2806_v52 }
 0x563   : > { %v6214_v6 = vpack.i.bf16 %v8669_v10, %v8673_v24 }
 0x564   : > { %v8615_v56 = vpop.f32.mrb[48].mxu0 }
 0x565   : > { %v2942_v61 = vpop.f32.mrb[49].mxu0  ;;  %v8695_v17 = vadd.f32 %v8615_v56, %v2811_v50 }
 0x566   : > { %v8684_v27 = vadd.f32 %v2942_v61, %v2811_v50 }
 0x568   : > { %v2946_v48 = vpop.f32.mrb[50].mxu0 }
 0x569   : > { %v8617_v63 = vpop.f32.mrb[51].mxu0  ;;  %v8690_v36 = vadd.f32 %v2946_v48, %v2816_v43 }
 0x56a   : > { %v8698_v13 = vadd.f32 %v8617_v63, %v2816_v43 }
 0x56b   : > { %v6229_v58 = vpack.i.bf16 %v8690_v36, %v8695_v17 }
 0x56c   : > { %v8619_v40 = vpop.f32.mrb[52].mxu0 }
 0x56d   : > { %v8621_v4 = vpop.f32.mrb[53].mxu0  ;;  %v8715_v48 = vadd.f32 %v8619_v40, %v2821_v15 }
 0x56e   : > { %v8708_v49 = vadd.f32 %v8621_v4, %v2821_v15 }
 0x574   : > { %v3023_v25 = vpop.f32.mrb[54].mxu0 }
 0x575   : > { %v8631_v60 = vadd.f32 %v3023_v25, %v2791_v8  ;;  %v5606_v0 = vpop.f32.mrb[55].mxu0 }
 0x577   : > { %v6189_v47 = vpack.i.bf16 %v8631_v60, %v8629_v35 }
 0x578   : > { %v3028_v55 = vpop.f32.mrb[56].mxu0 }
 0x579   : > { %v8653_v41 = vadd.f32 %v3028_v55, %v2796_v2  ;;  %v5609_v21 = vpop.f32.mrb[57].mxu0  ;;  %6190 = vrot.lane.b32.xlu0 %v6189_v47, %s6966_s28 }
 0x57b   : > { %v6194_v18 = vpack.i.bf16 %v8653_v41, %v8651_v42 }
 0x57c   : > { %v3033_v30 = vpop.f32.mrb[58].mxu0 }
 0x57d   : > { %v8665_v3 = vadd.f32 %v3033_v30, %v2801_v32  ;;  %v5612_v29 = vpop.f32.mrb[59].mxu0  ;;  %6195 = vrot.lane.b32.xlu1 %v6194_v18, %s6966_s28  ;;  %6200 = vrot.lane.b32.xlu0 %v6199_v44, %s6966_s28 }
 0x57f   : > { %v6204_v19 = vpack.i.bf16 %v8665_v3, %v8663_v31 }
 0x580   : > { %v3038_v9 = vpop.f32.mrb[60].mxu0 }
 0x581   : > { %v8677_v22 = vadd.f32 %v3038_v9, %v2806_v52  ;;  %v5615_v11 = vpop.f32.mrb[61].mxu0  ;;  %6205 = vrot.lane.b32.xlu1 %v6204_v19, %s6966_s28  ;;  %v6728_v19 = vld [vmem:[%s9430_s6 + $0x100] ss:$8 sps:$4 sm:$0xff]  }
 0x583   : > { %v6209_v5 = vpack.i.bf16 %v8677_v22, %v8675_v51 }
 0x584   : > { %v3043_v12 = vpop.f32.mrb[62].mxu0 }
 0x585   : > { %v8686_v26 = vadd.f32 %v3043_v12, %v2811_v50  ;;  %v5618_v28 = vpop.f32.mrb[63].mxu0  ;;  %6215 = vrot.lane.b32.xlu1 %v6214_v6, %s6966_s28  ;;  %6210 = vrot.lane.b32.xlu0 %v6209_v5, %s6966_s28  ;;  %v6731_v50 = vld [vmem:[%s9430_s6 + $0x110] ss:$8 sps:$4 sm:$0xff]  }
 0x587   : > { %v6219_v62 = vpack.i.bf16 %v8686_v26, %v8684_v27 }
 0x588   : > { %v3048_v7 = vpop.f32.mrb[64].mxu0 }
 0x589   : > { %v8700_v23 = vadd.f32 %v3048_v7, %v2816_v43  ;;  %v5621_v45 = vpop.f32.mrb[65].mxu0  ;;  %6220 = vrot.lane.b32.xlu0 %v6219_v62, %s6966_s28  ;;  %v6736_v62 = vld [vmem:[%s9430_s6 + $0x124] ss:$8 sps:$4 sm:$0xff]  }
 0x58b   : > { %v6224_v57 = vpack.i.bf16 %v8700_v23, %v8698_v13 }
 0x58c   : > { %v3053_v39 = vpop.f32.mrb[66].mxu0 }
 0x58d   : > { %v8710_v56 = vadd.f32 %v3053_v39, %v2821_v15  ;;  %6225 = vrot.lane.b32.xlu1 %v6224_v57, %s6966_s28  ;;  %6230 = vrot.lane.b32.xlu0 %v6229_v58, %s6966_s28  ;;  %v5624_v61 = vpop.f32.mrb[67].mxu0 }
 0x58f   : > { %v6234_v63 = vpack.i.bf16 %v8710_v56, %v8708_v49 }
 0x591   : > { %6235 = vrot.lane.b32.xlu1 %v6234_v63, %s6966_s28  ;;  %3114 = vrot.lane.b32.xlu0 %v8715_v48, %s6966_s28 }
 0x5eb   : > { %v8722_v4 = vpop.permute.xlu0 %6190 }
 0x5ec   : > { %v6193_v46 = vunpack.i.h.bf16 %v8722_v4  ;;  %v6192_v1 = vunpack.i.l.bf16 %v8722_v4 }
 0x5ee   : > { %v3121_v8 = vsel %vm621_vm0, %v6192_v1, %v6193_v46 }
 0x5ef   : > { %v8729_v40 = vpop.permute.xlu1 %6195  ;;  %v6201_v25 = vpop.permute.xlu0 %6200  ;;  %v3156_v18 = vmax.f32 %v8629_v35, %v3121_v8  ;;  %v6734_v8 = vld [vmem:[%s9430_s6 + $0x120] ss:$8 sps:$4 sm:$0xff]  }
 0x5f0   : > { %v6198_v0 = vunpack.i.h.bf16 %v8729_v40  ;;  %v6197_v54 = vunpack.i.l.bf16 %v8729_v40  ;;  %v6203_v16 = vunpack.i.h.bf16 %v6201_v25  ;;  %v6202_v2 = vunpack.i.l.bf16 %v6201_v25 }
 0x5f2   : > { %v3123_v53 = vsel %vm621_vm0, %v6197_v54, %v6198_v0  ;;  %v3122_v47 = vsel %vm621_vm0, %v6203_v16, %v6197_v54  ;;  %v3120_v55 = vsel %vm621_vm0, %v6202_v2, %v6192_v1 }
 0x5f3   : > { %v3158_v38 = vmax.f32 %v8642_v33, %v3122_v47  ;;  %v3155_v21 = vmax.f32 %v8649_v59, %v3120_v55  ;;  %v8740_v44 = vpop.permute.xlu1 %6205  ;;  %v3159_v32 = vmax.f32 %v8651_v42, %v3123_v53  ;;  %v6733_v33 = vld [vmem:[%s9430_s6 + $0x114] ss:$8 sps:$4 sm:$0xff]   ;;  %v6737_v53 = vld [vmem:[%s9430_s6 + $0x130] ss:$8 sps:$4 sm:$0xff]  }
 0x5f4   : > { %v6208_v30 = vunpack.i.h.bf16 %v8740_v44  ;;  %v6207_v34 = vunpack.i.l.bf16 %v8740_v44 }
 0x5f5   : > { %v3176_v29 = vpack.c.bf16 %v3158_v38, %v3155_v21  ;;  %v3177_v52 = vpack.c.bf16 %v3159_v32, %v3156_v18  ;;  %v6742_v21 = vld [vmem:[%s9430_s6 + $0x144] ss:$8 sps:$4 sm:$0xff]  }
 0x5f6   : > { %v3125_v35 = vsel %vm621_vm0, %v6207_v34, %v6208_v30  ;;  %v3163_v40 = vmax.f32 %v8665_v3, %v6208_v30 }
 0x5f7   : > { %v6216_v59 = vpop.permute.xlu1 %6215  ;;  %3509 = vmatprep.mubr.bf16.mxu1 %v3177_v52  ;;  %v8755_v42 = vpop.permute.xlu0 %6210  ;;  %v3162_v45 = vmax.f32 %v8663_v31, %v3125_v35  ;;  %v6739_v31 = vld [vmem:[%s9430_s6 + $0x134] ss:$8 sps:$4 sm:$0xff]  }
 0x5f8   : > { %v6218_v9 = vunpack.i.h.bf16 %v6216_v59  ;;  %v6217_v11 = vunpack.i.l.bf16 %v6216_v59  ;;  %v6213_v6 = vunpack.i.h.bf16 %v8755_v42  ;;  %v6212_v5 = vunpack.i.l.bf16 %v8755_v42  ;;  %3510 = vmatmul.mubr.bf16.vlgmr.msra.gmra.mrb[16].mxu1 %v3176_v29 }
 0x5f9   : > { %3549 = vmatpush1.bf16.msra.mxu1 %v6728_v19 }
 0x5fa   : > { %v3124_v12 = vsel %vm621_vm0, %v6217_v11, %v6207_v34  ;;  %v3126_v28 = vsel %vm621_vm0, %v6218_v9, %v6212_v5  ;;  %v3127_v43 = vsel %vm621_vm0, %v6212_v5, %v6213_v6  ;;  %3550 = vmatprep.subr.bf16.mxu1 %v6733_v33  ;;  %v6740_v9 = vld [vmem:[%s9430_s6 + $0x140] ss:$8 sps:$4 sm:$0xff]  }
 0x5fb   : > { %v8770_v7 = vpop.permute.xlu0 %6220  ;;  %v3165_v58 = vmax.f32 %v8675_v51, %v3127_v43  ;;  %v3161_v57 = vmax.f32 %v8673_v24, %v3124_v12  ;;  %v3164_v15 = vmax.f32 %v8669_v10, %v3126_v28  ;;  %v6748_v28 = vld [vmem:[%s9430_s6 + $0x164] ss:$8 sps:$4 sm:$0xff]  }
 0x5fc   : > { %v6223_v39 = vunpack.i.h.bf16 %v8770_v7  ;;  %v6222_v61 = vunpack.i.l.bf16 %v8770_v7 }
 0x5fd   : > { %3551 = vmatpush1.bf16.msra.mxu1 %v6731_v50  ;;  %v3180_v63 = vpack.c.bf16 %v3165_v58, %v3162_v45  ;;  %v3179_v1 = vpack.c.bf16 %v3164_v15, %v3161_v57  ;;  %v6743_v50 = vld [vmem:[%s9430_s6 + $0x150] ss:$8 sps:$4 sm:$0xff]   ;;  %v3166_v58 = vmax.f32 %v8677_v22, %v6213_v6 }
 0x5fe   : > { %3552 = vmatprep.subr.bf16.mxu1 %v6736_v62  ;;  %v3129_v10 = vsel %vm621_vm0, %v6222_v61, %v6223_v39  ;;  %v3157_v62 = vmax.f32 %v8631_v60, %v6193_v46 }
 0x5ff   : > { %v6226_v24 = vpop.permute.xlu1 %6225  ;;  %v6231_v51 = vpop.permute.xlu0 %6230  ;;  %3519 = vmatprep.mubr.bf16.mxu1 %v3180_v63  ;;  %v3168_v32 = vmax.f32 %v8684_v27, %v3129_v10  ;;  %v6745_v27 = vld [vmem:[%s9430_s6 + $0x154] ss:$8 sps:$4 sm:$0xff]   ;;  %v3181_v57 = vpack.c.bf16 %v3166_v58, %v3163_v40 }
 0x600   : > { %v6228_v25 = vunpack.i.h.bf16 %v6226_v24  ;;  %v6227_v54 = vunpack.i.l.bf16 %v6226_v24  ;;  %v6233_v16 = vunpack.i.h.bf16 %v6231_v51  ;;  %v6232_v2 = vunpack.i.l.bf16 %v6231_v51  ;;  %3520 = vmatmul.mubr.bf16.gmra.mrb[20].mxu1 %v3179_v1 }
 0x601   : > { %3553 = vmatpush1.bf16.msra.mxu1 %v6734_v8 }
 0x602   : > { %v3131_v47 = vsel %vm621_vm0, %v6227_v54, %v6228_v25  ;;  %v3130_v55 = vsel %vm621_vm0, %v6233_v16, %v6227_v54  ;;  %v3128_v38 = vsel %vm621_vm0, %v6232_v2, %v6222_v61  ;;  %3554 = vmatprep.subr.bf16.mxu1 %v6739_v31  ;;  %v3172_v60 = vmax.f32 %v8700_v23, %v6228_v25 }
 0x603   : > { %v6236_v18 = vpop.permute.xlu1 %6235  ;;  %v3171_v34 = vmax.f32 %v8698_v13, %v3131_v47  ;;  %v3167_v29 = vmax.f32 %v8695_v17, %v3128_v38  ;;  %v3170_v52 = vmax.f32 %v8690_v36, %v3130_v55  ;;  %v3115_v11 = vpop.permute.xlu0 %3114 }
 0x604   : > { %v6238_v19 = vunpack.i.h.bf16 %v6236_v18  ;;  %v6237_v33 = vunpack.i.l.bf16 %v6236_v18 }
 0x605   : > { %v3183_v35 = vpack.c.bf16 %v3171_v34, %v3168_v32  ;;  %3555 = vmatpush1.bf16.msra.mxu1 %v6737_v53  ;;  %v3182_v59 = vpack.c.bf16 %v3170_v52, %v3167_v29 }
 0x606   : > { %v3133_v5 = vsel %vm621_vm0, %v6237_v33, %v6238_v19  ;;  %3556 = vmatprep.subr.bf16.mxu1 %v6742_v21  ;;  %v3132_v17 = vsel %vm621_vm0, %v3115_v11, %v6237_v33  ;;  %v3175_v22 = vmax.f32 %v8710_v56, %v6238_v19 }
 0x607   : > { %3529 = vmatprep.mubr.bf16.mxu1 %v3183_v35  ;;  %v3174_v36 = vmax.f32 %v8708_v49, %v3133_v5  ;;  %v3173_v12 = vmax.f32 %v8715_v48, %v3132_v17  ;;  %v6746_v49 = vld [vmem:[%s9430_s6 + $0x160] ss:$8 sps:$4 sm:$0xff]   ;;  %v3160_v48 = vmax.f32 %v8653_v41, %v6198_v0  ;;  %v3169_v41 = vmax.f32 %v8686_v26, %v6223_v39 }
 0x608   : > { %3530 = vmatmul.mubr.bf16.gmra.mrb[24].mxu1 %v3182_v59  ;;  %v3187_v46 = vpack.c.bf16 %v3175_v22, %v3175_v22 }
 0x609   : > { %v3186_v13 = vpack.c.bf16 %v3174_v36, %v3174_v36  ;;  %3557 = vmatpush1.bf16.msra.mxu1 %v6740_v9  ;;  %v3185_v43 = vpack.c.bf16 %v3173_v12, %v3173_v12  ;;  %v3178_v45 = vpack.c.bf16 %v3160_v48, %v3157_v62  ;;  %v3184_v4 = vpack.c.bf16 %v3172_v60, %v3169_v41 }
 0x60a   : > { %3558 = vmatprep.subr.bf16.mxu1 %v6745_v27 }
 0x60b   : > { %3539 = vmatprep.mubr.bf16.mxu1 %v3186_v13 }
 0x60d   : > { %3559 = vmatpush1.bf16.msra.mxu1 %v6743_v50 }
 0x60e   : > { %3560 = vmatprep.subr.bf16.mxu1 %v6748_v28 }
 0x610   : > { %3540 = vmatmul.mubr.bf16.gmra.mrb[28].mxu1 %v3185_v43 }
 0x611   : > { %3561 = vmatpush1.bf16.msra.mxu1 %v6746_v49  ;;  %3580 = vmatprep.mubr.bf16.mxu1 %v6971_v37 }
 0x618   : > { %5373 = vmatmul.mubr.msk.bf16.vlgmr.msra.gmra.mrb[16].mxu1 %vm3464_vm11, %v3178_v45 }
 0x619   : > { %3590 = vmatprep.mubr.bf16.mxu1 %v6971_v37 }
 0x620   : > { %5374 = vmatmul.mubr.msk.bf16.gmra.mrb[20].mxu1 %vm3464_vm11, %v3181_v57 }
 0x621   : > { %3600 = vmatprep.mubr.bf16.mxu1 %v6971_v37 }
 0x628   : > { %5375 = vmatmul.mubr.msk.bf16.gmra.mrb[24].mxu1 %vm3464_vm11, %v3184_v4 }
 0x629   : > { %3610 = vmatprep.mubr.bf16.mxu1 %v6971_v37 }
 0x630   : > { %5376 = vmatmul.mubr.msk.bf16.gmra.mrb[28].mxu1 %vm3464_vm11, %v3187_v46 }
 0x6eb   : > { %v3582_v3 = vpop.f32.mrb[16].mxu1 }
 0x6ec   : > { %vm3619_vm9 = vcmp.ge.f32.partialorder %v3582_v3, 0.0  ;;  %v3633_v0 = vmul.f32 0.01, %v3582_v3  ;;  %v3584_v44 = vpop.f32.mrb[17].mxu1 }
 0x6ed   : > { %vm3620_vm10 = vcmp.ge.f32.partialorder %v3584_v44, 0.0  ;;  %v3634_v23 = vmul.f32 0.01, %v3584_v44  ;;  %v3586_v30 = vpop.f32.mrb[18].mxu1 }
 0x6ee   : > { %v8844_v42 = vsel %vm3619_vm9, %v3582_v3, %v3633_v0  ;;  %vm3621_vm12 = vcmp.ge.f32.partialorder %v3586_v30, 0.0  ;;  %v3635_v26 = vmul.f32 0.01, %v3586_v30  ;;  %v3588_v6 = vpop.f32.mrb[19].mxu1 }
 0x6ef   : > { %v8846_v7 = vsel %vm3620_vm10, %v3584_v44, %v3634_v23  ;;  %vm3622_vm13 = vcmp.ge.f32.partialorder %v3588_v6, 0.0  ;;  %v3636_v15 = vmul.f32 0.01, %v3588_v6  ;;  %v3764_v56 = vrot.slane %v8844_v42, 4 }
 0x6f0   : > { %v8849_v39 = vsel %vm3621_vm12, %v3586_v30, %v3635_v26  ;;  %v3765_v61 = vrot.slane %v8846_v7, 4  ;;  %v3689_v63 = vrot.slane %v8844_v42, 6  ;;  %v3690_v1 = vrot.slane %v8846_v7, 6 }
 0x6f1   : > { %v8854_v8 = vsel %vm3622_vm13, %v3588_v6, %v3636_v15  ;;  %v5724_v31 = vpack.c.bf16 %v8849_v39, %v8844_v42  ;;  %v3766_v10 = vrot.slane %v8849_v39, 4  ;;  %v3691_v24 = vrot.slane %v8849_v39, 6 }
 0x6f2   : > { %v6244_v51 = vpack.i.bf16 %v3765_v61, %v3764_v56  ;;  %v6239_v25 = vpack.i.bf16 %v3690_v1, %v3689_v63  ;;  %v5722_v54 = vpack.c.bf16 %v8854_v8, %v8846_v7  ;;  %v3768_v16 = vrot.slane %v8854_v8, 4 }
 0x6f3   : > { %v3592_v2 = vpop.f32.mrb[20].mxu1  ;;  %v3767_v53 = vsel %vm711_vm3, %v3764_v56, %v3766_v10  ;;  %v3692_v47 = vsel %vm704_vm2, %v3689_v63, %v3691_v24  ;;  %v3693_v55 = vrot.slane %v8854_v8, 6  ;;  %v3839_v38 = vrot.slane %v8844_v42, 2 }
 0x6f4   : > { %vm3623_vm6 = vcmp.ge.f32.partialorder %v3592_v2, 0.0  ;;  %v3637_v21 = vmul.f32 0.01, %v3592_v2  ;;  %6245 = vrot.lane.b32.xlu0 %v6244_v51, %s6967_s21  ;;  %6240 = vrot.lane.b32.xlu1 %v6239_v25, %s6966_s28  ;;  %v3594_v18 = vpop.f32.mrb[21].mxu1  ;;  %v3769_v32 = vsel %vm711_vm3, %v3765_v61, %v3768_v16  ;;  %v3840_v34 = vrot.slane %v8846_v7, 2 }
 0x6f5   : > { %vm3624_vm7 = vcmp.ge.f32.partialorder %v3594_v18, 0.0  ;;  %v3638_v29 = vmul.f32 0.01, %v3594_v18  ;;  %5723 = vmatprep.subr.bf16.mxu0 %v5722_v54  ;;  %v3596_v52 = vpop.f32.mrb[22].mxu1  ;;  %v6254_v19 = vpack.i.bf16 %v3769_v32, %v3767_v53  ;;  %v3694_v33 = vsel %vm704_vm2, %v3690_v1, %v3693_v55 }
 0x6f6   : > { %v8872_v35 = vsel %vm3623_vm6, %v3592_v2, %v3637_v21  ;;  %vm3625_vm11 = vcmp.ge.f32.partialorder %v3596_v52, 0.0  ;;  %v3639_v59 = vmul.f32 0.01, %v3596_v52  ;;  %5725 = vmatpush1.bf16.msra.mxu0 %v5724_v31  ;;  %v3598_v9 = vpop.f32.mrb[23].mxu1  ;;  %v6249_v11 = vpack.i.bf16 %v3694_v33, %v3692_v47 }
 0x6f7   : > { %v8874_v5 = vsel %vm3624_vm7, %v3594_v18, %v3638_v29  ;;  %vm3626_vm9 = vcmp.ge.f32.partialorder %v3598_v9, 0.0  ;;  %v3640_v27 = vmul.f32 0.01, %v3598_v9  ;;  %v3695_v17 = vrot.slane %v8872_v35, 6 }
 0x6f8   : > { %v8877_v36 = vsel %vm3625_vm11, %v3596_v52, %v3639_v59  ;;  %6255 = vrot.lane.b32.xlu1 %v6254_v19, %s6967_s21  ;;  %6250 = vrot.lane.b32.xlu0 %v6249_v11, %s6966_s28  ;;  %v3697_v13 = vrot.slane %v8874_v5, 6  ;;  %v3770_v50 = vrot.slane %v8872_v35, 4  ;;  %v3772_v12 = vrot.slane %v8874_v5, 4 }
 0x6f9   : > { %v8884_v28 = vsel %vm3626_vm9, %v3598_v9, %v3640_v27  ;;  %v3696_v49 = vsel %vm704_vm2, %v3691_v24, %v3695_v17  ;;  %v5728_v43 = vpack.c.bf16 %v8877_v36, %v8872_v35  ;;  %v3699_v48 = vrot.slane %v8877_v36, 6 }
 0x6fa   : > { %v5726_v62 = vpack.c.bf16 %v8884_v28, %v8874_v5  ;;  %v3698_v45 = vsel %vm704_vm2, %v3693_v55, %v3697_v13  ;;  %v3701_v58 = vrot.slane %v8884_v28, 6  ;;  %v8895_v40 = vsel %vm711_vm3, %v3766_v10, %v3770_v50 }
 0x6fb   : > { %v3602_v57 = vpop.f32.mrb[24].mxu1  ;;  %v6259_v60 = vpack.i.bf16 %v3698_v45, %v3696_v49  ;;  %v3700_v41 = vsel %vm704_vm2, %v3695_v17, %v3699_v48  ;;  %v8899_v4 = vsel %vm711_vm3, %v3768_v16, %v3772_v12  ;;  %v3774_v22 = vrot.slane %v8877_v36, 4 }
 0x6fc   : > { %vm3627_vm10 = vcmp.ge.f32.partialorder %v3602_v57, 0.0  ;;  %v3641_v46 = vmul.f32 0.01, %v3602_v57  ;;  %v3604_v3 = vpop.f32.mrb[25].mxu1  ;;  %5727 = vmatprep.subr.bf16.mxu0 %v5726_v62  ;;  %v3702_v0 = vsel %vm704_vm2, %v3697_v13, %v3701_v58  ;;  %v6279_v44 = vpack.i.bf16 %v8899_v4, %v8895_v40 }
 0x6fd   : > { %vm3628_vm12 = vcmp.ge.f32.partialorder %v3604_v3, 0.0  ;;  %v3642_v23 = vmul.f32 0.01, %v3604_v3  ;;  %6260 = vrot.lane.b32.xlu1 %v6259_v60, %s6966_s28  ;;  %v3606_v30 = vpop.f32.mrb[26].mxu1  ;;  %5729 = vmatpush1.bf16.msra.mxu0 %v5728_v43  ;;  %v6264_v26 = vpack.i.bf16 %v3702_v0, %v3700_v41  ;;  %v3776_v6 = vrot.slane %v8884_v28, 4 }
 0x6fe   : > { %v8907_v15 = vsel %vm3627_vm10, %v3602_v57, %v3641_v46  ;;  %vm3629_vm13 = vcmp.ge.f32.partialorder %v3606_v30, 0.0  ;;  %v3643_v56 = vmul.f32 0.01, %v3606_v30  ;;  %v3608_v61 = vpop.f32.mrb[27].mxu1  ;;  %v8910_v63 = vsel %vm711_vm3, %v3770_v50, %v3774_v22 }
 0x6ff   : > { %v8912_v1 = vsel %vm3628_vm12, %v3604_v3, %v3642_v23  ;;  %vm3630_vm6 = vcmp.ge.f32.partialorder %v3608_v61, 0.0  ;;  %v3644_v31 = vmul.f32 0.01, %v3608_v61  ;;  %6265 = vrot.lane.b32.xlu0 %v6264_v26, %s6966_s28  ;;  %v3703_v10 = vrot.slane %v8907_v15, 6 }
 0x700   : > { %v8916_v24 = vsel %vm3629_vm13, %v3606_v30, %v3643_v56  ;;  %v3705_v51 = vrot.slane %v8912_v1, 6  ;;  %v3778_v25 = vrot.slane %v8907_v15, 4  ;;  %v3780_v54 = vrot.slane %v8912_v1, 4 }
 0x701   : > { %v8921_v16 = vsel %vm3630_vm6, %v3608_v61, %v3644_v31  ;;  %v3704_v2 = vsel %vm704_vm2, %v3699_v48, %v3703_v10  ;;  %v5732_v53 = vpack.c.bf16 %v8916_v24, %v8907_v15  ;;  %v3707_v47 = vrot.slane %v8916_v24, 6 }
 0x702   : > { %v5730_v55 = vpack.c.bf16 %v8921_v16, %v8912_v1  ;;  %v3706_v21 = vsel %vm704_vm2, %v3701_v58, %v3705_v51  ;;  %v3709_v18 = vrot.slane %v8921_v16, 6  ;;  %v3779_v32 = vsel %vm711_vm3, %v3774_v22, %v3778_v25 }
 0x703   : > { %v3612_v29 = vpop.f32.mrb[28].mxu1  ;;  %v6269_v52 = vpack.i.bf16 %v3706_v21, %v3704_v2  ;;  %v3708_v19 = vsel %vm704_vm2, %v3703_v10, %v3707_v47  ;;  %v3781_v33 = vsel %vm711_vm3, %v3776_v6, %v3780_v54  ;;  %v8935_v59 = vsel %vm711_vm3, %v3772_v12, %v3776_v6 }
 0x704   : > { %vm3631_vm7 = vcmp.ge.f32.partialorder %v3612_v29, 0.0  ;;  %v3645_v9 = vmul.f32 0.01, %v3612_v29  ;;  %v3614_v11 = vpop.f32.mrb[29].mxu1  ;;  %5731 = vmatprep.subr.bf16.mxu0 %v5730_v55  ;;  %v3710_v27 = vsel %vm704_vm2, %v3705_v51, %v3709_v18  ;;  %v6294_v17 = vpack.i.bf16 %v3781_v33, %v3779_v32 }
 0x705   : > { %vm3632_vm11 = vcmp.ge.f32.partialorder %v3614_v11, 0.0  ;;  %v3646_v13 = vmul.f32 0.01, %v3614_v11  ;;  %6270 = vrot.lane.b32.xlu1 %v6269_v52, %s6966_s28  ;;  %v3616_v50 = vpop.f32.mrb[30].mxu1  ;;  %5733 = vmatpush1.bf16.msra.mxu0 %v5732_v53  ;;  %v6274_v49 = vpack.i.bf16 %v3710_v27, %v3708_v19  ;;  %v6289_v43 = vpack.i.bf16 %v8935_v59, %v8910_v63 }
 0x706   : > { %v8941_v48 = vsel %vm3631_vm7, %v3612_v29, %v3645_v9  ;;  %v3617_v12 = vpop.f32.mrb[31].mxu1  ;;  %v3782_v62 = vrot.slane %v8916_v24, 4  ;;  %v3784_v45 = vrot.slane %v8921_v16, 4  ;;  %v3841_v58 = vrot.slane %v8849_v39, 2 }
 0x707   : > { %v8946_v57 = vsel %vm3632_vm11, %v3614_v11, %v3646_v13  ;;  %6275 = vrot.lane.b32.xlu0 %v6274_v49, %s6966_s28  ;;  %v3711_v60 = vrot.slane %v8941_v48, 6  ;;  %v3786_v41 = vrot.slane %v8941_v48, 4  ;;  %v3843_v22 = vrot.slane %v8854_v8, 2 }
 0x708   : > { %v3713_v46 = vrot.slane %v8946_v57, 6  ;;  %v3788_v3 = vrot.slane %v8946_v57, 4  ;;  %v3783_v0 = vsel %vm711_vm3, %v3778_v25, %v3782_v62  ;;  %v3785_v23 = vsel %vm711_vm3, %v3780_v54, %v3784_v45 }
 0x709   : > { %v3712_v30 = vsel %vm704_vm2, %v3707_v47, %v3711_v60  ;;  %v3787_v26 = vsel %vm711_vm3, %v3782_v62, %v3786_v41  ;;  %v6299_v6 = vpack.i.bf16 %v3785_v23, %v3783_v0  ;;  %vm9486_vm9 = vcmask 1045504  }
 0x70a   : > { %v3842_v56 = vsel %vm9486_vm9, %v3839_v38, %v3841_v58  ;;  %v3714_v61 = vsel %vm704_vm2, %v3709_v18, %v3713_v46  ;;  %v3789_v63 = vsel %vm711_vm3, %v3784_v45, %v3788_v3  ;;  %vm9487_vm10 = vmmov %vm9486_vm9  ;;  %v6304_v10 = vpack.i.bf16 %v3840_v34, %v3839_v38 }
 0x70b   : > { %v3844_v31 = vsel %vm9487_vm10, %v3840_v34, %v3843_v22  ;;  %6280 = vrot.lane.b32.xlu0 %v6279_v44, %s6967_s21  ;;  %v6284_v51 = vpack.i.bf16 %v3714_v61, %v3712_v30  ;;  %v6309_v25 = vpack.i.bf16 %v3789_v63, %v3787_v26  ;;  %v3845_v2 = vrot.slane %v8872_v35, 2  ;;  %vm9488_vm12 = vmmov %vm9486_vm9 }
 0x70c   : > { %v6314_v54 = vpack.i.bf16 %v3844_v31, %v3842_v56  ;;  %v3847_v53 = vrot.slane %v8874_v5, 2  ;;  %v3849_v47 = vrot.slane %v8877_v36, 2  ;;  %v3851_v55 = vrot.slane %v8884_v28, 2  ;;  %vm9489_vm13 = vmmov %vm9486_vm9 }
 0x70d   : > { %v3853_v21 = vrot.slane %v8907_v15, 2  ;;  %6285 = vrot.lane.b32.xlu1 %v6284_v51, %s6966_s28  ;;  %v3846_v38 = vsel %vm9488_vm12, %v3841_v58, %v3845_v2  ;;  %v3855_v34 = vrot.slane %v8912_v1, 2  ;;  %v3857_v40 = vrot.slane %v8916_v24, 2  ;;  %vm9490_vm6 = vmmov %vm9486_vm9 }
 0x70e   : > { %v3859_v4 = vrot.slane %v8921_v16, 2  ;;  %v3850_v44 = vsel %vm9489_vm13, %v3845_v2, %v3849_v47  ;;  %v3852_v18 = vsel %vm9490_vm6, %v3847_v53, %v3851_v55  ;;  %vm9491_vm7 = vmmov %vm9490_vm6  ;;  %v6339_v27 = vpack.i.bf16 %v8846_v7, %v8844_v42 }
 0x70f   : > { %v3848_v32 = vsel %vm9491_vm7, %v3843_v22, %v3847_v53  ;;  %vm9492_vm11 = vmmov %vm9490_vm6  ;;  %6295 = vrot.lane.b32.xlu0 %v6294_v17, %s6967_s21  ;;  %v6324_v52 = vpack.i.bf16 %v3852_v18, %v3850_v44  ;;  %v3861_v13 = vrot.slane %v8941_v48, 2  ;;  %v3863_v49 = vrot.slane %v8946_v57, 2 }
 0x710   : > { %v3854_v29 = vsel %vm9492_vm11, %v3849_v47, %v3853_v21  ;;  %v6319_v19 = vpack.i.bf16 %v3848_v32, %v3846_v38  ;;  %vm9493_vm9 = vmmov %vm9490_vm6  ;;  %v6354_v17 = vpack.i.bf16 %v8874_v5, %v8872_v35  ;;  %v6349_v12 = vpack.i.bf16 %v8854_v8, %v8849_v39  ;;  %v3662_v39 = vld [vmem:[#allocation5 + $0x8] sm:$0xff]  ;;  %v3968_v35 = vld [vmem:[%s9432_s8 + $0x8] sm:$0xff] }
 0x711   : > { %v3858_v33 = vsel %vm9493_vm9, %v3853_v21, %v3857_v40  ;;  %vm9494_vm10 = vmmov %vm9490_vm6  ;;  %6290 = vrot.lane.b32.xlu1 %v6289_v43, %s6967_s21  ;;  %v6364_v45 = vpack.i.bf16 %v8912_v1, %v8907_v15  ;;  %v6359_v42 = vpack.i.bf16 %v8884_v28, %v8877_v36  ;;  %v3864_v7 = vsel %vm9490_vm6, %v3859_v4, %v3863_v49  ;;  %v3967_v5 = vld [vmem:[%s9432_s8] sm:$0xff]  ;;  %v3970_v36 = vld [vmem:[%s9432_s8 + $0x18] sm:$0xff] }
 0x712   : > { %v3860_v59 = vsel %vm9494_vm10, %v3855_v34, %v3859_v4  ;;  %vm9495_vm12 = vmmov %vm9490_vm6  ;;  %v6369_v43 = vpack.i.bf16 %v8921_v16, %v8916_v24  ;;  %vm4009_vm7 = vcmask 998400   ;;  %v6374_v8 = vpack.i.bf16 %v8946_v57, %v8941_v48  ;;  %v3969_v28 = vld [vmem:[%s9432_s8 + $0x10] sm:$0xff]  ;;  %v3972_v15 = vld [vmem:[%s9432_s8 + $0x28] sm:$0xff] }
 0x713   : > { %v6334_v9 = vpack.i.bf16 %v3860_v59, %v3858_v33  ;;  %v3856_v11 = vsel %vm9495_vm12, %v3851_v55, %v3855_v34  ;;  %vm9496_vm13 = vmmov %vm9490_vm6  ;;  %6310 = vrot.lane.b32.xlu0 %v6309_v25, %s6967_s21  ;;  %5379 = vmatprep.mubr.msk.f32.mxu0 %vm4009_vm7, %v3662_v39  ;;  %v3971_v1 = vld [vmem:[%s9432_s8 + $0x20] sm:$0xff]  ;;  %v3973_v24 = vld [vmem:[%s9432_s8 + $0x30] sm:$0x3] }
 0x714   : > { %v6329_v50 = vpack.i.bf16 %v3856_v11, %v3854_v29  ;;  %v3862_v62 = vsel %vm9496_vm13, %v3857_v40, %v3861_v13  ;;  %vm9497_vm11 = vmmov %vm9490_vm6 }
 0x715   : > { %v6344_v58 = vpack.i.bf16 %v3864_v7, %v3862_v62  ;;  %6300 = vrot.lane.b32.xlu1 %v6299_v6, %s6967_s21  ;;  %vm9498_vm9 = vmmov %vm9490_vm6 }
 0x717   : > { %6315 = vrot.lane.b32.xlu0 %v6314_v54, %s6968_s29 }
 0x719   : > { %6305 = vrot.lane.b32.xlu1 %v6304_v10, %s6968_s29 }
 0x71b   : > { %6325 = vrot.lane.b32.xlu0 %v6324_v52, %s6968_s29 }
 0x71d   : > { %6320 = vrot.lane.b32.xlu1 %v6319_v19, %s6968_s29 }
 0x71f   : > { %6335 = vrot.lane.b32.xlu0 %v6334_v9, %s6968_s29 }
 0x721   : > { %6330 = vrot.lane.b32.xlu1 %v6329_v50, %s6968_s29 }
 0x723   : > { %6340 = vrot.lane.b32.xlu0 %v6339_v27, %s6969_s25 }
 0x725   : > { %6345 = vrot.lane.b32.xlu1 %v6344_v58, %s6968_s29 }
 0x727   : > { %6355 = vrot.lane.b32.xlu0 %v6354_v17, %s6969_s25 }
 0x729   : > { %6350 = vrot.lane.b32.xlu1 %v6349_v12, %s6969_s25 }
 0x72b   : > { %6365 = vrot.lane.b32.xlu0 %v6364_v45, %s6969_s25 }
 0x72d   : > { %6360 = vrot.lane.b32.xlu1 %v6359_v42, %s6969_s25 }
 0x72f   : > { %6375 = vrot.lane.b32.xlu0 %v6374_v8, %s6969_s25 }
 0x731   : > { %6370 = vrot.lane.b32.xlu1 %v6369_v43, %s6969_s25 }
 0x733   : > { %3981 = vperm.xlu0 %6007, %v3968_v35  }
 0x735   : > { %3976 = vperm.xlu1 %6008, %v3967_v5  }
 0x737   : > { %3991 = vperm.xlu0 %6007, %v3970_v36  }
 0x739   : > { %3986 = vperm.xlu1 %6008, %v3969_v28  }
 0x73b   : > { %4001 = vperm.xlu0 %6007, %v3972_v15  }
 0x73d   : > { %3996 = vperm.xlu1 %6008, %v3971_v1  }
 0x741   : > { %4006 = vperm.xlu1 %6008, %v3973_v24  }
 0x766   : > { %v6246_v16 = vpop.permute.xlu0 %6245  ;;  %v6241_v60 = vpop.permute.xlu1 %6240 }
 0x767   : > { %v6243_v41 = vunpack.i.h.bf16 %v6241_v60  ;;  %v6242_v22 = vunpack.i.l.bf16 %v6241_v60  ;;  %v6248_v19 = vunpack.i.h.bf16 %v6246_v16  ;;  %v6247_v33 = vunpack.i.l.bf16 %v6246_v16 }
 0x769   : > { %v3743_v46 = vsel %vm621_vm0, %v6242_v22, %v6243_v41  ;;  %v3962_v26 = vsel %vm704_vm2, %v8946_v57, %v6243_v41  ;;  %v3818_v12 = vsel %vm648_vm1, %v6247_v33, %v6248_v19 }
 0x76a   : > { %v6256_v3 = vpop.permute.xlu1 %6255  ;;  %v6251_v0 = vpop.permute.xlu0 %6250  ;;  %v3961_v56 = vsel %vm704_vm2, %v8941_v48, %v3743_v46 }
 0x76b   : > { %v6253_v23 = vunpack.i.h.bf16 %v6251_v0  ;;  %v6252_v30 = vunpack.i.l.bf16 %v6251_v0  ;;  %v6258_v59 = vunpack.i.h.bf16 %v6256_v3  ;;  %v6257_v9 = vunpack.i.l.bf16 %v6256_v3 }
 0x76d   : > { %v3744_v6 = vsel %vm621_vm0, %v6252_v30, %v6253_v23  ;;  %v5734_v61 = vpack.c.bf16 %v6253_v23, %v3962_v26  ;;  %v3819_v42 = vsel %vm648_vm1, %v6257_v9, %v6258_v59 }
 0x76e   : > { %v5736_v63 = vpack.c.bf16 %v3744_v6, %v3961_v56 }
 0x76f   : > { %v6261_v31 = vpop.permute.xlu1 %6260  ;;  %5735 = vmatprep.subr.bf16.mxu0 %v5734_v61 }
 0x770   : > { %v6263_v10 = vunpack.i.h.bf16 %v6261_v31  ;;  %v6262_v51 = vunpack.i.l.bf16 %v6261_v31  ;;  %5737 = vmatpush1.bf16.msra.mxu0 %v5736_v63 }
 0x771   : > { %v6266_v25 = vpop.permute.xlu0 %6265 }
 0x772   : > { %v6268_v54 = vunpack.i.h.bf16 %v6266_v25  ;;  %v6267_v2 = vunpack.i.l.bf16 %v6266_v25  ;;  %v3745_v53 = vsel %vm621_vm0, %v6262_v51, %v6263_v10 }
 0x774   : > { %v5738_v47 = vpack.c.bf16 %v6268_v54, %v6263_v10  ;;  %v3746_v57 = vsel %vm621_vm0, %v6267_v2, %v6268_v54 }
 0x775   : > { %v5740_v55 = vpack.c.bf16 %v3746_v57, %v3745_v53 }
 0x776   : > { %5739 = vmatprep.subr.bf16.mxu0 %v5738_v47 }
 0x777   : > { %v6271_v21 = vpop.permute.xlu1 %6270  ;;  %5741 = vmatpush1.bf16.msra.mxu0 %v5740_v55 }
 0x778   : > { %v6273_v48 = vunpack.i.h.bf16 %v6271_v21  ;;  %v6272_v38 = vunpack.i.l.bf16 %v6271_v21 }
 0x779   : > { %v6276_v34 = vpop.permute.xlu0 %6275 }
 0x77a   : > { %v6278_v40 = vunpack.i.h.bf16 %v6276_v34  ;;  %v6277_v4 = vunpack.i.l.bf16 %v6276_v34  ;;  %v3747_v44 = vsel %vm621_vm0, %v6272_v38, %v6273_v48 }
 0x77c   : > { %v5742_v18 = vpack.c.bf16 %v6278_v40, %v6273_v48  ;;  %v3748_v32 = vsel %vm621_vm0, %v6277_v4, %v6278_v40 }
 0x77d   : > { %v5744_v29 = vpack.c.bf16 %v3748_v32, %v3747_v44  ;;  %v6281_v52 = vpop.permute.xlu0 %6280 }
 0x77e   : > { %5743 = vmatprep.subr.bf16.mxu0 %v5742_v18  ;;  %v6283_v50 = vunpack.i.h.bf16 %v6281_v52  ;;  %v6282_v49 = vunpack.i.l.bf16 %v6281_v52 }
 0x77f   : > { %5745 = vmatpush1.bf16.msra.mxu0 %v5744_v29  ;;  %v6286_v11 = vpop.permute.xlu1 %6285 }
 0x780   : > { %v6288_v27 = vunpack.i.h.bf16 %v6286_v11  ;;  %v6287_v13 = vunpack.i.l.bf16 %v6286_v11  ;;  %v3820_v5 = vsel %vm648_vm1, %v6282_v49, %v6283_v50 }
 0x781   : > { %v6296_v17 = vpop.permute.xlu0 %6295 }
 0x782   : > { %v3749_v62 = vsel %vm621_vm0, %v6287_v13, %v6288_v27  ;;  %v3964_v45 = vsel %vm711_vm3, %v6288_v27, %v6248_v19  ;;  %v6298_v28 = vunpack.i.h.bf16 %v6296_v17  ;;  %v6297_v15 = vunpack.i.l.bf16 %v6296_v17 }
 0x783   : > { %v6291_v7 = vpop.permute.xlu1 %6290  ;;  %v5746_v43 = vpack.c.bf16 %v6258_v59, %v3964_v45  ;;  %v3963_v58 = vsel %vm711_vm3, %v3749_v62, %v3818_v12 }
 0x784   : > { %v6293_v39 = vunpack.i.h.bf16 %v6291_v7  ;;  %v6292_v8 = vunpack.i.l.bf16 %v6291_v7  ;;  %v5748_v35 = vpack.c.bf16 %v3819_v42, %v3963_v58  ;;  %v3822_v23 = vsel %vm648_vm1, %v6297_v15, %v6298_v28 }
 0x785   : > { %v6311_v36 = vpop.permute.xlu0 %6310  ;;  %5747 = vmatprep.subr.bf16.mxu0 %v5746_v43 }
 0x786   : > { %v5750_v1 = vpack.c.bf16 %v6293_v39, %v6283_v50  ;;  %v3821_v24 = vsel %vm648_vm1, %v6292_v8, %v6293_v39  ;;  %5749 = vmatpush1.bf16.msra.mxu0 %v5748_v35  ;;  %v6313_v46 = vunpack.i.h.bf16 %v6311_v36  ;;  %v6312_v3 = vunpack.i.l.bf16 %v6311_v36 }
 0x787   : > { %v5752_v16 = vpack.c.bf16 %v3821_v24, %v3820_v5  ;;  %v6301_v60 = vpop.permute.xlu1 %6300 }
 0x788   : > { %v6303_v41 = vunpack.i.h.bf16 %v6301_v60  ;;  %v6302_v22 = vunpack.i.l.bf16 %v6301_v60  ;;  %5751 = vmatprep.subr.bf16.mxu0 %v5750_v1  ;;  %v3824_v51 = vsel %vm648_vm1, %v6312_v3, %v6313_v46 }
 0x789   : > { %v6316_v0 = vpop.permute.xlu0 %6315 }
 0x78a   : > { %v5754_v30 = vpack.c.bf16 %v6303_v41, %v6298_v28  ;;  %v3823_v26 = vsel %vm648_vm1, %v6302_v22, %v6303_v41  ;;  %5753 = vmatpush1.bf16.msra.mxu0 %v5752_v16  ;;  %v6318_v56 = vunpack.i.h.bf16 %v6316_v0  ;;  %v6317_v61 = vunpack.i.l.bf16 %v6316_v0 }
 0x78b   : > { %v5756_v6 = vpack.c.bf16 %v3823_v26, %v3822_v23  ;;  %v6306_v63 = vpop.permute.xlu1 %6305  ;;  %vm4319_vm1 = vcmask 416768  }
 0x78c   : > { %v6308_v31 = vunpack.i.h.bf16 %v6306_v63  ;;  %v6307_v10 = vunpack.i.l.bf16 %v6306_v63  ;;  %5755 = vmatprep.subr.bf16.mxu0 %v5754_v30  ;;  %v3894_v57 = vsel %vm674_vm4, %v6317_v61, %v6318_v56 }
 0x78d   : > { %v6326_v25 = vpop.permute.xlu0 %6325 }
 0x78e   : > { %v3893_v54 = vsel %vm674_vm4, %v6307_v10, %v6308_v31  ;;  %v6328_v2 = vunpack.i.h.bf16 %v6326_v25  ;;  %v6327_v53 = vunpack.i.l.bf16 %v6326_v25  ;;  %5757 = vmatpush1.bf16.msra.mxu0 %v5756_v6  ;;  %v3966_v47 = vsel %vm9497_vm11, %v6313_v46, %v6308_v31 }
 0x78f   : > { %v6321_v55 = vpop.permute.xlu1 %6320  ;;  %v5758_v21 = vpack.c.bf16 %v6318_v56, %v3966_v47  ;;  %v3965_v48 = vsel %vm9498_vm9, %v3824_v51, %v3893_v54 }
 0x790   : > { %v6323_v38 = vunpack.i.h.bf16 %v6321_v55  ;;  %v6322_v34 = vunpack.i.l.bf16 %v6321_v55  ;;  %v5760_v40 = vpack.c.bf16 %v3894_v57, %v3965_v48  ;;  %v3896_v4 = vsel %vm674_vm4, %v6327_v53, %v6328_v2  ;;  %v3661_v57 = vld [vmem:[#allocation5] sm:$0xff]  ;;  %v3664_v55 = vld [vmem:[#allocation5 + $0x18] sm:$0xff]  ;;  %v3666_v48 = vld [vmem:[#allocation5 + $0x28] sm:$0xff] }
 0x791   : > { %v6336_v44 = vpop.permute.xlu0 %6335  ;;  %5759 = vmatprep.subr.bf16.mxu0 %v5758_v21  ;;  %v3663_v21 = vld [vmem:[#allocation5 + $0x10] sm:$0xff] }
 0x792   : > { %v5762_v18 = vpack.c.bf16 %v6328_v2, %v6323_v38  ;;  %v3895_v32 = vsel %vm674_vm4, %v6322_v34, %v6323_v38  ;;  %v6338_v29 = vunpack.i.h.bf16 %v6336_v44  ;;  %v6337_v52 = vunpack.i.l.bf16 %v6336_v44  ;;  %5761 = vmatpush1.bf16.msra.mxu0 %v5760_v40  ;;  %v3665_v38 = vld [vmem:[#allocation5 + $0x20] sm:$0xff]  ;;  %v3668_v34 = vld [vmem:[#allocation5 + $0x38] sm:$0xff]  ;;  %v3667_v40 = vld [vmem:[#allocation5 + $0x30] sm:$0xff] }
 0x793   : > { %v5764_v19 = vpack.c.bf16 %v3896_v4, %v3895_v32  ;;  %v6331_v33 = vpop.permute.xlu1 %6330  ;;  %v3670_v4 = vld [vmem:[#allocation5 + $0x48] sm:$0xff]  ;;  %v3669_v44 = vld [vmem:[#allocation5 + $0x40] sm:$0xff]  ;;  %v3671_v32 = vld [vmem:[#allocation5 + $0x50] sm:$0xff] }
 0x794   : > { %v6333_v59 = vunpack.i.h.bf16 %v6331_v33  ;;  %v6332_v9 = vunpack.i.l.bf16 %v6331_v33  ;;  %5763 = vmatprep.subr.bf16.mxu0 %v5762_v18  ;;  %v3898_v11 = vsel %vm674_vm4, %v6337_v52, %v6338_v29  ;;  %v3672_v18 = vld [vmem:[#allocation5 + $0x58] sm:$0xff]  ;;  %v3673_v52 = vld [vmem:[#allocation5 + $0x60] sm:$0x3] }
 0x795   : > { %v6341_v27 = vpop.permute.xlu0 %6340  ;;  %v6750_v33 = vld [vmem:[#allocation7 + $0x8] sm:$0xff]  }
 0x796   : > { %v5766_v13 = vpack.c.bf16 %v6338_v29, %v6333_v59  ;;  %v3897_v50 = vsel %vm674_vm4, %v6332_v9, %v6333_v59  ;;  %v6343_v49 = vunpack.i.h.bf16 %v6341_v27  ;;  %v6342_v17 = vunpack.i.l.bf16 %v6341_v27  ;;  %5765 = vmatpush1.bf16.msra.mxu0 %v5764_v19  ;;  %v3674_v29 = vld [vmem:[#allocation5 + $0x68] sm:$0x3]  ;;  %v6749_v19 = vld [vmem:[#allocation7] sm:$0xff]   ;;  %v6751_v59 = vld [vmem:[#allocation7 + $0x10] sm:$0xff]  }
 0x797   : > { %v5768_v12 = vpack.c.bf16 %v3898_v11, %v3897_v50  ;;  %v6346_v62 = vpop.permute.xlu1 %6345  ;;  %v6752_v9 = vld [vmem:[#allocation7 + $0x18] sm:$0xff]   ;;  %v6753_v11 = vld [vmem:[#allocation7 + $0x20] sm:$0xff]   ;;  %v6754_v27 = vld [vmem:[#allocation7 + $0x28] sm:$0xff]  }
 0x798   : > { %v6348_v45 = vunpack.i.h.bf16 %v6346_v62  ;;  %v6347_v42 = vunpack.i.l.bf16 %v6346_v62  ;;  %5767 = vmatprep.subr.bf16.mxu0 %v5766_v13  ;;  %v3942_v7 = vsel %vm698_vm5, %v6342_v17, %v6343_v49  ;;  %v6755_v13 = vld [vmem:[#allocation7 + $0x30] sm:$0xff]   ;;  %v6756_v50 = vld [vmem:[#allocation7 + $0x38] sm:$0xff]   ;;  %v6758_v17 = vld [vmem:[#allocation7 + $0x48] sm:$0xff]  }
 0x799   : > { %v6356_v43 = vpop.permute.xlu0 %6355 }
 0x79a   : > { %v5770_v58 = vpack.c.bf16 %v6343_v49, %v6348_v45  ;;  %v3899_v39 = vsel %vm674_vm4, %v6347_v42, %v6348_v45  ;;  %v6358_v8 = vunpack.i.h.bf16 %v6356_v43  ;;  %v6357_v35 = vunpack.i.l.bf16 %v6356_v43  ;;  %5769 = vmatpush1.bf16.msra.mxu0 %v5768_v12  ;;  %v6757_v49 = vld [vmem:[#allocation7 + $0x40] sm:$0xff]   ;;  %v6759_v43 = vld [vmem:[#allocation7 + $0x50] sm:$0xff]  }
 0x79b   : > { %v5772_v5 = vpack.c.bf16 %v3942_v7, %v3899_v39  ;;  %v6351_v36 = vpop.permute.xlu1 %6350  ;;  %v4332_v39 = vsel %vm2510_vm14, 4294967295, %v6973_v20 }
 0x79c   : > { %v6353_v28 = vunpack.i.h.bf16 %v6351_v36  ;;  %v6352_v15 = vunpack.i.l.bf16 %v6351_v36  ;;  %5771 = vmatprep.subr.bf16.mxu0 %v5770_v58  ;;  %v3944_v1 = vsel %vm698_vm5, %v6357_v35, %v6358_v8  ;;  %v6760_v58 = vld [vmem:[#allocation7 + $0x58] ss:$0 sps:$4 sm:$0x33]   ;;  %v4333_v36 = vsel %vm704_vm2, %v4332_v39, 0 }
 0x79d   : > { %v6366_v24 = vpop.permute.xlu0 %6365 }
 0x79e   : > { %v5774_v16 = vpack.c.bf16 %v6358_v8, %v6353_v28  ;;  %v3943_v60 = vsel %vm698_vm5, %v6352_v15, %v6353_v28  ;;  %v6368_v41 = vunpack.i.h.bf16 %v6366_v24  ;;  %v6367_v22 = vunpack.i.l.bf16 %v6366_v24  ;;  %5773 = vmatpush1.bf16.msra.mxu0 %v5772_v5 }
 0x79f   : > { %v5776_v46 = vpack.c.bf16 %v3944_v1, %v3943_v60  ;;  %v6361_v3 = vpop.permute.xlu1 %6360  ;;  %v4335_v1 = vand.u32 %v6760_v58, %v4333_v36 }
 0x7a0   : > { %v6363_v0 = vunpack.i.h.bf16 %v6361_v3  ;;  %v6362_v23 = vunpack.i.l.bf16 %v6361_v3  ;;  %5775 = vmatprep.subr.bf16.mxu0 %v5774_v16  ;;  %v3946_v30 = vsel %vm698_vm5, %v6367_v22, %v6368_v41 }
 0x7a1   : > { %v6376_v26 = vpop.permute.xlu0 %6375 }
 0x7a2   : > { %v5778_v6 = vpack.c.bf16 %v6368_v41, %v6363_v0  ;;  %v3945_v56 = vsel %vm698_vm5, %v6362_v23, %v6363_v0  ;;  %v6378_v61 = vunpack.i.h.bf16 %v6376_v26  ;;  %v6377_v63 = vunpack.i.l.bf16 %v6376_v26  ;;  %5777 = vmatpush1.bf16.msra.mxu0 %v5776_v46 }
 0x7a3   : > { %v5780_v31 = vpack.c.bf16 %v3946_v30, %v3945_v56  ;;  %v6371_v10 = vpop.permute.xlu1 %6370 }
 0x7a4   : > { %v6373_v51 = vunpack.i.h.bf16 %v6371_v10  ;;  %v6372_v25 = vunpack.i.l.bf16 %v6371_v10  ;;  %5779 = vmatprep.subr.bf16.mxu0 %v5778_v6  ;;  %v3948_v54 = vsel %vm698_vm5, %v6377_v63, %v6378_v61 }
 0x7a6   : > { %v5782_v2 = vpack.c.bf16 %v6378_v61, %v6373_v51  ;;  %v3947_v53 = vsel %vm698_vm5, %v6372_v25, %v6373_v51  ;;  %5781 = vmatpush1.bf16.msra.mxu0 %v5780_v31 }
 0x7a7   : > { %v5785_v47 = vpack.c.bf16 %v3948_v54, %v3947_v53 }
 0x7a8   : > { %5784 = vmatprep.subr.msk.bf16.mxu0 %vm7319_vm8, %v5782_v2 }
 0x7aa   : > { %5787 = vmatpush1.bf16.msk.msra.mxu0 %vm7319_vm8, %v5785_v47 }
 0x7ab   : > { %4337 = vmatprep.subr.bf16.mxu0 %v6971_v37 }
 0x7ad   : > { %4100 = vmatmul.mubr.f32.vlgmr.msra.gmra.mrb[68].mxu0 %v3661_v57 }
 0x7ae   : > { %5380 = vmatprep.mubr.msk.f32.mxu0 %vm4009_vm7, %v3664_v55  ;;  %4338 = vmatpush1.bf16.msra.mxu0 %v6749_v19 }
 0x7af   : > { %4339 = vmatprep.subr.bf16.mxu0 %v6971_v37 }
 0x7b1   : > { %4106 = vmatmul.mubr.f32.gmra.mrb[70].mxu0 %v3663_v21 }
 0x7b2   : > { %5381 = vmatprep.mubr.msk.f32.mxu0 %vm4009_vm7, %v3666_v48  ;;  %4340 = vmatpush1.bf16.msra.mxu0 %v6750_v33  ;;  %v3982_v8 = vpop.permute.xlu0 %3981 }
 0x7b3   : > { %4341 = vmatprep.subr.bf16.mxu0 %v6971_v37 }
 0x7b4   : > { %v3977_v12 = vpop.permute.xlu1 %3976 }
 0x7b5   : > { %4112 = vmatmul.mubr.f32.gmra.mrb[72].mxu0 %v3665_v38 }
 0x7b6   : > { %5382 = vmatprep.mubr.msk.f32.mxu0 %vm4009_vm7, %v3668_v34  ;;  %4342 = vmatpush1.bf16.msra.mxu0 %v6751_v59  ;;  %v3992_v0 = vpop.permute.xlu0 %3991 }
 0x7b7   : > { %4343 = vmatprep.subr.bf16.mxu0 %v6971_v37 }
 0x7b8   : > { %v3987_v16 = vpop.permute.xlu1 %3986 }
 0x7b9   : > { %4118 = vmatmul.mubr.f32.gmra.mrb[74].mxu0 %v3667_v40 }
 0x7ba   : > { %5383 = vmatprep.mubr.msk.f32.mxu0 %vm4009_vm7, %v3670_v4  ;;  %4344 = vmatpush1.bf16.msra.mxu0 %v6752_v9  ;;  %v4002_v25 = vpop.permute.xlu0 %4001 }
 0x7bb   : > { %4345 = vmatprep.subr.bf16.mxu0 %v6971_v37 }
 0x7bc   : > { %v3997_v56 = vpop.permute.xlu1 %3996 }
 0x7bd   : > { %4124 = vmatmul.mubr.f32.gmra.mrb[76].mxu0 %v3669_v44 }
 0x7be   : > { %5384 = vmatprep.mubr.msk.f32.mxu0 %vm4009_vm7, %v3672_v18  ;;  %4346 = vmatpush1.bf16.msra.mxu0 %v6753_v11 }
 0x7bf   : > { %4347 = vmatprep.subr.bf16.mxu0 %v6971_v37 }
 0x7c0   : > { %v4007_v55 = vpop.permute.xlu1 %4006 }
 0x7c1   : > { %4130 = vmatmul.mubr.f32.gmra.mrb[78].mxu0 %v3671_v32 }
 0x7c2   : > { %5385 = vmatprep.mubr.msk.f32.mxu0 %vm4009_vm7, %v3674_v29  ;;  %4348 = vmatpush1.bf16.msra.mxu0 %v6754_v27 }
 0x7c3   : > { %4349 = vmatprep.subr.bf16.mxu0 %v6971_v37 }
 0x7c5   : > { %4136 = vmatmul.mubr.f32.gmra.mrb[80].mxu0 %v3673_v52 }
 0x7c6   : > { %4350 = vmatpush1.bf16.msra.mxu0 %v6755_v13 }
 0x7c7   : > { %4351 = vmatprep.subr.bf16.mxu0 %v6971_v37 }
 0x7ca   : > { %4352 = vmatpush1.bf16.msra.mxu0 %v6756_v50 }
 0x7cb   : > { %4353 = vmatprep.subr.bf16.mxu0 %v6971_v37 }
 0x7ce   : > { %4354 = vmatpush1.bf16.msra.mxu0 %v6757_v49 }
 0x7cf   : > { %4355 = vmatprep.subr.bf16.mxu0 %v6971_v37 }
 0x7d2   : > { %4356 = vmatpush1.bf16.msra.mxu0 %v6758_v17 }
 0x7d3   : > { %4357 = vmatprep.subr.bf16.mxu0 %v6971_v37 }
 0x7d6   : > { %4358 = vmatpush1.bf16.msra.mxu0 %v6759_v43 }
 0x7d7   : > { %4359 = vmatprep.subr.bf16.mxu0 %v6971_v37 }
 0x7da   : > { %4360 = vmatpush1.bf16.msra.mxu0 %v4335_v1 }
 0x880   : > { %v4101_v62 = vpop.f32.mrb[68].mxu0 }
 0x881   : > { %v9106_v45 = vadd.f32 %v4101_v62, %v3977_v12  ;;  %v4103_v42 = vpop.f32.mrb[69].mxu0 }
 0x882   : > { %v4104_v7 = vadd.f32 %v4103_v42, %v3977_v12 }
 0x884   : > { %v6379_v35 = vpack.i.bf16 %v4104_v7, %v9106_v45  ;;  %v4107_v5 = vpop.f32.mrb[70].mxu0 }
 0x885   : > { %v4108_v28 = vadd.f32 %v4107_v5, %v3982_v8  ;;  %v4109_v15 = vpop.f32.mrb[71].mxu0 }
 0x886   : > { %v4110_v24 = vadd.f32 %v4109_v15, %v3982_v8  ;;  %6380 = vrot.lane.b32.xlu0 %v6379_v35, %s6966_s28 }
 0x888   : > { %v6384_v60 = vpack.i.bf16 %v4110_v24, %v4108_v28  ;;  %v4113_v41 = vpop.f32.mrb[72].mxu0 }
 0x889   : > { %v9114_v22 = vadd.f32 %v4113_v41, %v3987_v16  ;;  %v4115_v46 = vpop.f32.mrb[73].mxu0 }
 0x88a   : > { %v4116_v3 = vadd.f32 %v4115_v46, %v3987_v16  ;;  %6385 = vrot.lane.b32.xlu1 %v6384_v60, %s6966_s28 }
 0x88c   : > { %v6389_v23 = vpack.i.bf16 %v4116_v3, %v9114_v22  ;;  %v4119_v30 = vpop.f32.mrb[74].mxu0 }
 0x88d   : > { %v4120_v26 = vadd.f32 %v4119_v30, %v3992_v0  ;;  %v4121_v37 = vpop.f32.mrb[75].mxu0 }
 0x88e   : > { %v4122_v6 = vadd.f32 %v4121_v37, %v3992_v0  ;;  %6390 = vrot.lane.b32.xlu0 %v6389_v23, %s6966_s28 }
 0x890   : > { %v6394_v61 = vpack.i.bf16 %v4122_v6, %v4120_v26  ;;  %v4125_v63 = vpop.f32.mrb[76].mxu0 }
 0x891   : > { %v9119_v31 = vadd.f32 %v4125_v63, %v3997_v56  ;;  %v4127_v10 = vpop.f32.mrb[77].mxu0 }
 0x892   : > { %v4128_v51 = vadd.f32 %v4127_v10, %v3997_v56  ;;  %6395 = vrot.lane.b32.xlu1 %v6394_v61, %s6966_s28 }
 0x894   : > { %v6399_v54 = vpack.i.bf16 %v4128_v51, %v9119_v31  ;;  %v4131_v2 = vpop.f32.mrb[78].mxu0 }
 0x895   : > { %v9123_v53 = vadd.f32 %v4131_v2, %v4002_v25  ;;  %v4133_v47 = vpop.f32.mrb[79].mxu0 }
 0x896   : > { %v4134_v57 = vadd.f32 %v4133_v47, %v4002_v25  ;;  %6400 = vrot.lane.b32.xlu0 %v6399_v54, %s6966_s28 }
 0x898   : > { %v6404_v21 = vpack.i.bf16 %v4134_v57, %v9123_v53  ;;  %v4137_v48 = vpop.f32.mrb[80].mxu0 }
 0x899   : > { %v4138_v38 = vadd.f32 %v4137_v48, %v4007_v55  ;;  %v4139_v34 = vpop.f32.mrb[81].mxu0 }
 0x89a   : > { %v4140_v40 = vadd.f32 %v4139_v34, %v4007_v55  ;;  %6405 = vrot.lane.b32.xlu1 %v6404_v21, %s6966_s28 }
 0x89c   : > { %v6409_v4 = vpack.i.bf16 %v4140_v40, %v4138_v38 }
 0x89e   : > { %6410 = vrot.lane.b32.xlu0 %v6409_v4, %s6966_s28 }
 0x8f8   : > { %v6381_v44 = vpop.permute.xlu0 %6380 }
 0x8f9   : > { %v6383_v18 = vunpack.i.h.bf16 %v6381_v44  ;;  %v6382_v32 = vunpack.i.l.bf16 %v6381_v44 }
 0x8fb   : > { %v4184_v52 = vsel %vm621_vm0, %v6382_v32, %v6383_v18  ;;  %v4206_v59 = vmax.f32 %v4104_v7, %v6383_v18 }
 0x8fc   : > { %v6386_v29 = vpop.permute.xlu1 %6385  ;;  %v4205_v27 = vmax.f32 %v9106_v45, %v4184_v52 }
 0x8fd   : > { %v6388_v19 = vunpack.i.h.bf16 %v6386_v29  ;;  %v6387_v33 = vunpack.i.l.bf16 %v6386_v29 }
 0x8ff   : > { %v4208_v9 = vmax.f32 %v4110_v24, %v6388_v19  ;;  %v4185_v11 = vsel %vm621_vm0, %v6387_v33, %v6388_v19 }
 0x900   : > { %v4207_v13 = vmax.f32 %v4108_v28, %v4185_v11  ;;  %v6391_v50 = vpop.permute.xlu0 %6390 }
 0x901   : > { %v4220_v49 = vpack.c.bf16 %v4208_v9, %v4206_v59  ;;  %v6393_v17 = vunpack.i.h.bf16 %v6391_v50  ;;  %v6392_v12 = vunpack.i.l.bf16 %v6391_v50 }
 0x902   : > { %v4219_v62 = vpack.c.bf16 %v4207_v13, %v4205_v27 }
 0x903   : > { %5398 = vmatprep.mubr.msk.bf16.mxu0 %vm4319_vm1, %v4220_v49  ;;  %v4186_v43 = vsel %vm621_vm0, %v6392_v12, %v6393_v17  ;;  %v4210_v39 = vmax.f32 %v4116_v3, %v6393_v17 }
 0x904   : > { %v6396_v42 = vpop.permute.xlu1 %6395  ;;  %4370 = vmatmul.mubr.bf16.vlgmr.msra.gmra.mrb[84].mxu0 %v4219_v62  ;;  %v4209_v5 = vmax.f32 %v9114_v22, %v4186_v43 }
 0x905   : > { %v6398_v58 = vunpack.i.h.bf16 %v6396_v42  ;;  %v6397_v7 = vunpack.i.l.bf16 %v6396_v42 }
 0x907   : > { %v4212_v8 = vmax.f32 %v4122_v6, %v6398_v58  ;;  %v4187_v35 = vsel %vm621_vm0, %v6397_v7, %v6398_v58 }
 0x908   : > { %v6401_v45 = vpop.permute.xlu0 %6400  ;;  %v4211_v36 = vmax.f32 %v4120_v26, %v4187_v35 }
 0x909   : > { %v4222_v28 = vpack.c.bf16 %v4212_v8, %v4210_v39  ;;  %v6403_v15 = vunpack.i.h.bf16 %v6401_v45  ;;  %v6402_v1 = vunpack.i.l.bf16 %v6401_v45 }
 0x90a   : > { %v4221_v24 = vpack.c.bf16 %v4211_v36, %v4209_v5 }
 0x90b   : > { %5399 = vmatprep.mubr.msk.bf16.mxu0 %vm4319_vm1, %v4222_v28  ;;  %v4188_v60 = vsel %vm621_vm0, %v6402_v1, %v6403_v15  ;;  %v4214_v3 = vmax.f32 %v4128_v51, %v6403_v15 }
 0x90c   : > { %v6406_v16 = vpop.permute.xlu1 %6405  ;;  %4378 = vmatmul.mubr.bf16.gmra.mrb[88].mxu0 %v4221_v24  ;;  %v4213_v22 = vmax.f32 %v9119_v31, %v4188_v60 }
 0x90d   : > { %v6408_v41 = vunpack.i.h.bf16 %v6406_v16  ;;  %v6407_v46 = vunpack.i.l.bf16 %v6406_v16 }
 0x90f   : > { %v4216_v0 = vmax.f32 %v4134_v57, %v6408_v41  ;;  %v4189_v23 = vsel %vm621_vm0, %v6407_v46, %v6408_v41 }
 0x910   : > { %v6411_v30 = vpop.permute.xlu0 %6410  ;;  %v4215_v26 = vmax.f32 %v9123_v53, %v4189_v23 }
 0x911   : > { %v4224_v37 = vpack.c.bf16 %v4216_v0, %v4214_v3  ;;  %v6413_v6 = vunpack.i.h.bf16 %v6411_v30  ;;  %v6412_v56 = vunpack.i.l.bf16 %v6411_v30 }
 0x912   : > { %v4223_v61 = vpack.c.bf16 %v4215_v26, %v4213_v22 }
 0x913   : > { %v4218_v63 = vmax.f32 %v4140_v40, %v6413_v6  ;;  %5400 = vmatprep.mubr.msk.bf16.mxu0 %vm4319_vm1, %v4224_v37  ;;  %v4190_v10 = vsel %vm621_vm0, %v6412_v56, %v6413_v6  ;;  %vm9499_vm0 = vmmov %vm9490_vm6 }
 0x914   : > { %4386 = vmatmul.mubr.bf16.gmra.mrb[92].mxu0 %v4223_v61  ;;  %v4217_v51 = vmax.f32 %v4138_v38, %v4190_v10  ;;  %vm9500_vm12 = vmmov %vm9499_vm0 }
 0x915   : > { %v4226_v25 = vpack.c.bf16 %v4218_v63, %v4218_v63  ;;  %vm9501_vm13 = vmmov %vm9499_vm0 }
 0x916   : > { %v4225_v54 = vpack.c.bf16 %v4217_v51, %v4217_v51  ;;  %vm9502_vm9 = vmmov %vm9499_vm0 }
 0x917   : > { %5401 = vmatprep.mubr.msk.bf16.mxu0 %vm4319_vm1, %v4226_v25  ;;  %vm9503_vm1 = vmmov %vm9499_vm0 }
 0x91c   : > { %4394 = vmatmul.mubr.bf16.gmra.mrb[96].mxu0 %v4225_v54 }
 0x9d7   : > { %v4371_v2 = vpop.f32.mrb[84].mxu0 }
 0x9d8   : > { %vm4401_vm4 = vcmp.ge.f32.partialorder %v4371_v2, 0.0  ;;  %v4408_v31 = vmul.f32 0.01, %v4371_v2  ;;  %v4373_v53 = vpop.f32.mrb[85].mxu0 }
 0x9d9   : > { %v4374_v47 = vpop.f32.mrb[86].mxu0 }
 0x9da   : > { %v9144_v57 = vsel %vm4401_vm4, %v4371_v2, %v4408_v31  ;;  %vm4402_vm5 = vcmp.ge.f32.partialorder %v4374_v47, 0.0  ;;  %v4409_v55 = vmul.f32 0.01, %v4374_v47  ;;  %v4376_v21 = vpop.f32.mrb[87].mxu0 }
 0x9db   : > { %v4511_v34 = vrot.slane %v9144_v57, 2  ;;  %v4443_v38 = vrot.slane %v9144_v57, 6  ;;  %v4477_v40 = vrot.slane %v9144_v57, 4 }
 0x9dc   : > { %v9146_v48 = vsel %vm4402_vm5, %v4374_v47, %v4409_v55  ;;  %vm9504_vm5 = vmmov %vm9499_vm0 }
 0x9dd   : > { %v4444_v4 = vrot.slane %v9146_v48, 6  ;;  %v4478_v44 = vrot.slane %v9146_v48, 4  ;;  %v4512_v18 = vrot.slane %v9146_v48, 2  ;;  %v6439_v32 = vpack.i.bf16 %v9146_v48, %v9144_v57 }
 0x9de   : > { %v9158_v29 = vpack.c.bf16 %v9146_v48, %v9144_v57  ;;  %v4568_v57 = vld [vmem:[%s9435_s11] sm:$0xff]  ;;  %v4570_v48 = vld [vmem:[%s9435_s11 + $0x10] sm:$0xff] }
 0x9df   : > { %v4379_v52 = vpop.f32.mrb[88].mxu0  ;;  %v4513_v19 = vsel %vm9499_vm0, %v4511_v34, %v4512_v18  ;;  %v4445_v33 = vsel %vm704_vm2, %v4443_v38, %v4444_v4  ;;  %v4479_v59 = vsel %vm711_vm3, %v4477_v40, %v4478_v44 }
 0x9e0   : > { %vm4403_vm14 = vcmp.ge.f32.partialorder %v4379_v52, 0.0  ;;  %v4410_v9 = vmul.f32 0.01, %v4379_v52  ;;  %v4381_v11 = vpop.f32.mrb[89].mxu0  ;;  %v9163_v27 = vpack.i.bf16 %v4513_v19, %v4511_v34  ;;  %v9165_v13 = vpack.i.bf16 %v4445_v33, %v4443_v38 }
 0x9e1   : > { %v4382_v50 = vpop.f32.mrb[90].mxu0  ;;  %v9167_v49 = vpack.i.bf16 %v4479_v59, %v4477_v40 }
 0x9e2   : > { %v9169_v17 = vsel %vm4403_vm14, %v4379_v52, %v4410_v9  ;;  %vm4404_vm10 = vcmp.ge.f32.partialorder %v4382_v50, 0.0  ;;  %v4411_v12 = vmul.f32 0.01, %v4382_v50  ;;  %v4384_v62 = vpop.f32.mrb[91].mxu0 }
 0x9e3   : > { %v4446_v42 = vrot.slane %v9169_v17, 6  ;;  %v4480_v43 = vrot.slane %v9169_v17, 4  ;;  %v4514_v58 = vrot.slane %v9169_v17, 2  ;;  %v4425_v62 = vld [vmem:[#allocation8 + $0x18] sm:$0xff] }
 0x9e4   : > { %v9174_v7 = vsel %vm4404_vm10, %v4382_v50, %v4411_v12  ;;  %v4423_v12 = vld [vmem:[#allocation8 + $0x8] sm:$0xff]  ;;  %5404 = vmatprep.mubr.msk.f32.mxu1 %vm4009_vm7, %v4425_v62 }
 0x9e5   : > { %v4448_v39 = vrot.slane %v9174_v7, 6  ;;  %v4482_v8 = vrot.slane %v9174_v7, 4  ;;  %v4516_v35 = vrot.slane %v9174_v7, 2  ;;  %v4515_v45 = vsel %vm9500_vm12, %v4512_v18, %v4514_v58  ;;  %5403 = vmatprep.mubr.msk.f32.mxu0 %vm4009_vm7, %v4423_v12 }
 0x9e6   : > { %v4447_v5 = vsel %vm704_vm2, %v4444_v4, %v4446_v42  ;;  %v6449_v36 = vpack.i.bf16 %v9174_v7, %v9169_v17  ;;  %v9184_v28 = vsel %vm711_vm3, %v4478_v44, %v4480_v43  ;;  %v9188_v15 = vpack.c.bf16 %v9174_v7, %v9169_v17 }
 0x9e7   : > { %v4387_v1 = vpop.f32.mrb[92].mxu0  ;;  %v4517_v24 = vsel %vm9501_vm13, %v4514_v58, %v4516_v35  ;;  %v4449_v16 = vsel %vm704_vm2, %v4446_v42, %v4448_v39  ;;  %v9193_v60 = vsel %vm711_vm3, %v4480_v43, %v4482_v8  ;;  %v4571_v42 = vld [vmem:[%s9435_s11 + $0x18] sm:$0xff]  ;;  %v4574_v43 = vld [vmem:[%s9435_s11 + $0x30] sm:$0x3]  ;;  %v4573_v58 = vld [vmem:[%s9435_s11 + $0x28] sm:$0xff] }
 0x9e8   : > { %vm4405_vm6 = vcmp.ge.f32.partialorder %v4387_v1, 0.0  ;;  %v4412_v41 = vmul.f32 0.01, %v4387_v1  ;;  %v4389_v46 = vpop.f32.mrb[93].mxu0  ;;  %v6424_v3 = vpack.i.bf16 %v4517_v24, %v4515_v45  ;;  %v6444_v0 = vpack.i.bf16 %v4449_v16, %v4447_v5 }
 0x9e9   : > { %v4390_v23 = vpop.f32.mrb[94].mxu0  ;;  %v6469_v30 = vpack.i.bf16 %v9193_v60, %v9184_v28 }
 0x9ea   : > { %v4419_v22 = vsel %vm4405_vm6, %v4387_v1, %v4412_v41  ;;  %vm4406_vm11 = vcmp.ge.f32.partialorder %v4390_v23, 0.0  ;;  %v4413_v26 = vmul.f32 0.01, %v4390_v23  ;;  %v4392_v37 = vpop.f32.mrb[95].mxu0  ;;  %vm4952_vm6 = vcmask 345088  }
 0x9eb   : > { %v4450_v6 = vrot.slane %v4419_v22, 6  ;;  %v4484_v56 = vrot.slane %v4419_v22, 4  ;;  %v4518_v61 = vrot.slane %v4419_v22, 2 }
 0x9ec   : > { %v4420_v63 = vsel %vm4406_vm11, %v4390_v23, %v4413_v26  ;;  %vm4992_vm11 = vcmask 7168  }
 0x9ed   : > { %v4452_v10 = vrot.slane %v4420_v63, 6  ;;  %v4486_v25 = vrot.slane %v4420_v63, 4  ;;  %v4520_v51 = vrot.slane %v4420_v63, 2  ;;  %v4485_v54 = vsel %vm711_vm3, %v4482_v8, %v4484_v56 }
 0x9ee   : > { %v4519_v2 = vsel %vm9502_vm9, %v4516_v35, %v4518_v61  ;;  %v4451_v31 = vsel %vm704_vm2, %v4448_v39, %v4450_v6  ;;  %v6464_v53 = vpack.i.bf16 %v4420_v63, %v4419_v22  ;;  %v9200_v47 = vpack.c.bf16 %v4420_v63, %v4419_v22 }
 0x9ef   : > { %v4395_v55 = vpop.f32.mrb[96].mxu0  ;;  %v4487_v21 = vsel %vm711_vm3, %v4484_v56, %v4486_v25  ;;  %v4521_v34 = vsel %vm9503_vm1, %v4518_v61, %v4520_v51  ;;  %v4453_v38 = vsel %vm704_vm2, %v4450_v6, %v4452_v10  ;;  %vm5000_vm9 = vcmask 15360  }
 0x9f0   : > { %vm4407_vm4 = vcmp.ge.f32.partialorder %v4395_v55, 0.0  ;;  %v4414_v40 = vmul.f32 0.01, %v4395_v55  ;;  %v4397_v4 = vpop.f32.mrb[97].mxu0  ;;  %v6414_v44 = vpack.i.bf16 %v4487_v21, %v4485_v54  ;;  %v6434_v18 = vpack.i.bf16 %v4521_v34, %v4519_v2 }
 0x9f1   : > { %v4398_v52 = vpop.f32.mrb[98].mxu0  ;;  %v6454_v19 = vpack.i.bf16 %v4453_v38, %v4451_v31  ;;  %vm5012_vm1 = vcmask 9216  }
 0x9f2   : > { %v9205_v33 = vsel %vm4407_vm4, %v4395_v55, %v4414_v40  ;;  %6415 = vrot.lane.b32.xlu1 %v6414_v44, %s6967_s21  ;;  %v4399_v59 = vpop.f32.mrb[99].mxu0  ;;  %vm5023_vm4 = vcmask 8192  }
 0x9f3   : > { %v4488_v9 = vrot.slane %v9205_v33, 4  ;;  %v4522_v50 = vrot.slane %v9205_v33, 2 }
 0x9f5   : > { %v4489_v11 = vsel %vm711_vm3, %v4486_v25, %v4488_v9  ;;  %v4523_v17 = vsel %vm9504_vm5, %v4520_v51, %v4522_v50 }
 0x9f6   : > { %6420 = vrot.lane.b32.xlu1 %v9163_v27, %s6968_s29  ;;  %4502 = vrot.lane.b32.xlu0 %v4489_v11, %s6967_s21  ;;  %v4454_v27 = vrot.slane %v9205_v33, 6 }
 0x9fa   : > { %6430 = vrot.lane.b32.xlu1 %v9165_v13, %s6966_s28  ;;  %6425 = vrot.lane.b32.xlu0 %v6424_v3, %s6968_s29  ;;  %v4455_v13 = vsel %vm704_vm2, %v4452_v10, %v4454_v27 }
 0x9fe   : > { %6445 = vrot.lane.b32.xlu1 %v6444_v0, %s6966_s28  ;;  %6435 = vrot.lane.b32.xlu0 %v6434_v18, %s6968_s29 }
 0xa02   : > { %4536 = vrot.lane.b32.xlu1 %v4523_v17, %s6968_s29  ;;  %6440 = vrot.lane.b32.xlu0 %v6439_v32, %s6969_s25  ;;  %v4569_v32 = vld [vmem:[%s9435_s11 + $0x8] sm:$0xff] }
 0xa06   : > { %6455 = vrot.lane.b32.xlu1 %v6454_v19, %s6966_s28  ;;  %6450 = vrot.lane.b32.xlu0 %v6449_v36, %s6969_s25 }
 0xa0a   : > { %6460 = vrot.lane.b32.xlu1 %v9167_v49, %s6967_s21  ;;  %4468 = vrot.lane.b32.xlu0 %v4455_v13, %s6966_s28  ;;  %v4572_v49 = vld [vmem:[%s9435_s11 + $0x20] sm:$0xff] }
 0xa0e   : > { %4557 = vrot.lane.b32.xlu1 %v9205_v33, %s6969_s25  ;;  %6465 = vrot.lane.b32.xlu0 %v6464_v53, %s6969_s25 }
 0xa12   : > { %4577 = vperm.xlu1 %6008, %v4568_v57   ;;  %6470 = vrot.lane.b32.xlu0 %v6469_v30, %s6967_s21  ;;  %s545_s21 = scalar_lea.vmem [#allocation10], %s544_s7 }
 0xa13   : > { %s5038_s16 = sshll.u32 %s545_s21, 4  ;;  %s9384_s16 = int_to_ptr.vmem [resolvable:$true] %s5038_s16 }
 0xa14   : > { %s6879_s24 = scalar_lea.vmem %s9384_s16, 16 }
 0xa15   : > { %p6880_p2 = scmp.ne.s32.totalorder %s9384_s16, %s6879_s24 }
 0xa16   : > { %4587 = vperm.xlu1 %6008, %v4570_v48   ;;  %4582 = vperm.xlu0 %6007, %v4569_v32   ;;  %v4422_v48 = vld [vmem:[#allocation8] sm:$0xff]  ;;  %v4424_v32 = vld [vmem:[#allocation8 + $0x10] sm:$0xff] }
 0xa17   : > { %p6881_p4 = pnand %p6880_p2, %p9510_p3 }
 0xa19   : > { %p6882_p7 = pneg %p6881_p4 }
 0xa1a   : > { %4597 = vperm.xlu1 %6008, %v4572_v49   ;;  %4592 = vperm.xlu0 %6007, %v4571_v42   ;;  %v4427_v49 = vld [vmem:[#allocation8 + $0x28] sm:$0xff]  ;;  %v4426_v42 = vld [vmem:[#allocation8 + $0x20] sm:$0xff] }
 0xa1e   : > { %4607 = vperm.xlu1 %6008, %v4574_v43   ;;  %4602 = vperm.xlu0 %6007, %v4573_v58   ;;  %v4429_v43 = vld [vmem:[#allocation8 + $0x38] sm:$0xff]  ;;  %v4428_v58 = vld [vmem:[#allocation8 + $0x30] sm:$0xff] }
 0xa64   : > { %v6416_v7 = vpop.permute.xlu1 %6415 }
 0xa65   : > { %v6418_v39 = vunpack.i.h.bf16 %v6416_v7  ;;  %v6417_v8 = vunpack.i.l.bf16 %v6416_v7  ;;  %v4431_v7 = vld [vmem:[#allocation8 + $0x48] sm:$0xff] }
 0xa67   : > { %v5788_v35 = vpack.c.bf16 %v6418_v39, %v6417_v8  ;;  %v4433_v39 = vld [vmem:[#allocation8 + $0x58] sm:$0xff]  ;;  %v4432_v8 = vld [vmem:[#allocation8 + $0x50] sm:$0xff] }
 0xa68   : > { %v6421_v45 = vpop.permute.xlu1 %6420  ;;  %v4503_v5 = vpop.permute.xlu0 %4502 }
 0xa69   : > { %v6423_v36 = vunpack.i.h.bf16 %v6421_v45  ;;  %v6422_v28 = vunpack.i.l.bf16 %v6421_v45  ;;  %5789 = vmatprep.subr.bf16.mxu0 %v5788_v35  ;;  %5821 = vmatprep.subr.bf16.mxu1 %v5788_v35  ;;  %v4435_v35 = vld [vmem:[#allocation8 + $0x68] sm:$0x3]  ;;  %v4434_v45 = vld [vmem:[#allocation8 + $0x60] sm:$0x3] }
 0xa6a   : > { %5791 = vmatpush3.bf16.msra.mxu0 %v9158_v29  ;;  %5829 = vmatpush3.bf16.msra.mxu1 %v9158_v29 }
 0xa6b   : > { %v4567_v1 = vsel %vm9499_vm0, %v4503_v5, %v6422_v28  ;;  %v6761_v5 = vld [vmem:[%s9436_s12] sm:$0xff]   ;;  %v6763_v28 = vld [vmem:[%s9436_s12 + $0x10] sm:$0xff]  }
 0xa6c   : > { %v5792_v24 = vpack.c.bf16 %v6423_v36, %v4567_v1  ;;  %v6431_v16 = vpop.permute.xlu1 %6430  ;;  %v6426_v60 = vpop.permute.xlu0 %6425  ;;  %v6762_v36 = vld [vmem:[%s9436_s12 + $0x8] sm:$0xff]   ;;  %v6764_v1 = vld [vmem:[%s9436_s12 + $0x18] sm:$0xff]  }
 0xa6d   : > { %v6428_v41 = vunpack.i.h.bf16 %v6426_v60  ;;  %v6427_v46 = vunpack.i.l.bf16 %v6426_v60  ;;  %v6432_v3 = vunpack.i.l.bf16 %v6431_v16  ;;  %v6433_v22 = vunpack.i.h.bf16 %v6431_v16 }
 0xa6e   : > { %5793 = vmatprep.subr.bf16.mxu0 %v5792_v24  ;;  %5822 = vmatprep.subr.bf16.mxu1 %v5792_v24  ;;  %v6765_v24 = vld [vmem:[%s9436_s12 + $0x20] sm:$0xff]  }
 0xa6f   : > { %v5796_v0 = vpack.c.bf16 %v6428_v41, %v6427_v46  ;;  %5795 = vmatpush3.bf16.msra.mxu0 %v9188_v15  ;;  %5830 = vmatpush3.bf16.msra.mxu1 %v9188_v15  ;;  %v4565_v37 = vsel %vm704_vm2, %v9205_v33, %v6432_v3 }
 0xa70   : > { %v6446_v23 = vpop.permute.xlu1 %6445  ;;  %v6436_v30 = vpop.permute.xlu0 %6435  ;;  %v5802_v15 = vpack.c.bf16 %v6433_v22, %v4565_v37 }
 0xa71   : > { %v6438_v26 = vunpack.i.h.bf16 %v6436_v30  ;;  %v6437_v29 = vunpack.i.l.bf16 %v6436_v30  ;;  %5797 = vmatprep.subr.bf16.mxu0 %v5796_v0  ;;  %5823 = vmatprep.subr.bf16.mxu1 %v5796_v0  ;;  %v6448_v56 = vunpack.i.h.bf16 %v6446_v23  ;;  %v6447_v61 = vunpack.i.l.bf16 %v6446_v23 }
 0xa73   : > { %v5800_v6 = vpack.c.bf16 %v6438_v26, %v6437_v29  ;;  %5799 = vmatpush3.bf16.msra.mxu0 %v9200_v47  ;;  %5831 = vmatpush3.bf16.msra.mxu1 %v9200_v47  ;;  %v5806_v54 = vpack.c.bf16 %v6448_v56, %v6447_v61  ;;  %v6766_v61 = vld [vmem:[%s9436_s12 + $0x28] ss:$0 sps:$4 sm:$0x77]  }
 0xa74   : > { %v4537_v63 = vpop.permute.xlu1 %4536  ;;  %v6441_v10 = vpop.permute.xlu0 %6440 }
 0xa75   : > { %v6442_v25 = vunpack.i.l.bf16 %v6441_v10  ;;  %5801 = vmatprep.subr.bf16.mxu0 %v5800_v6  ;;  %5824 = vmatprep.subr.bf16.mxu1 %v5800_v6  ;;  %v6443_v53 = vunpack.i.h.bf16 %v6441_v10 }
 0xa77   : > { %v5804_v51 = vpack.c.bf16 %v6442_v25, %v4537_v63  ;;  %5803 = vmatpush3.bf16.msra.mxu0 %v5802_v15  ;;  %5832 = vmatpush3.bf16.msra.mxu1 %v5802_v15  ;;  %v4829_v63 = vsel %vm704_vm2, 4294967295, %v6973_v20  ;;  %vm4816_vm2 = vcmask 695296  }
 0xa78   : > { %v6456_v2 = vpop.permute.xlu1 %6455  ;;  %v6451_v31 = vpop.permute.xlu0 %6450  ;;  %v4830_v15 = vsel %vm2641_vm15, %v4829_v63, 0 }
 0xa79   : > { %v6458_v55 = vunpack.i.h.bf16 %v6456_v2  ;;  %v6457_v21 = vunpack.i.l.bf16 %v6456_v2  ;;  %v6452_v34 = vunpack.i.l.bf16 %v6451_v31  ;;  %5805 = vmatprep.subr.bf16.mxu0 %v5804_v51  ;;  %5825 = vmatprep.subr.bf16.mxu1 %v5804_v51  ;;  %v6453_v19 = vunpack.i.h.bf16 %v6451_v31 }
 0xa7a   : > { %v4832_v51 = vand.u32 %v6766_v61, %v4830_v15 }
 0xa7b   : > { %v5808_v47 = vpack.c.bf16 %v6452_v34, %v6443_v53  ;;  %5807 = vmatpush3.bf16.msra.mxu0 %v5806_v54  ;;  %5833 = vmatpush3.bf16.msra.mxu1 %v5806_v54  ;;  %v5810_v4 = vpack.c.bf16 %v6458_v55, %v6457_v21 }
 0xa7c   : > { %v6461_v38 = vpop.permute.xlu1 %6460  ;;  %v4469_v40 = vpop.permute.xlu0 %4468 }
 0xa7d   : > { %v6462_v44 = vunpack.i.l.bf16 %v6461_v38  ;;  %5809 = vmatprep.subr.bf16.mxu0 %v5808_v47  ;;  %5826 = vmatprep.subr.bf16.mxu1 %v5808_v47  ;;  %v6463_v18 = vunpack.i.h.bf16 %v6461_v38 }
 0xa7f   : > { %5811 = vmatpush3.bf16.msra.mxu0 %v5810_v4  ;;  %5834 = vmatpush3.bf16.msra.mxu1 %v5810_v4  ;;  %v4566_v33 = vsel %vm711_vm3, %v4469_v40, %v6462_v44 }
 0xa80   : > { %v6466_v52 = vpop.permute.xlu0 %6465  ;;  %v5814_v50 = vpack.c.bf16 %v6463_v18, %v4566_v33  ;;  %v4558_v17 = vpop.permute.xlu1 %4557 }
 0xa81   : > { %v6468_v59 = vunpack.i.h.bf16 %v6466_v52  ;;  %v6467_v9 = vunpack.i.l.bf16 %v6466_v52 }
 0xa83   : > { %v5812_v11 = vpack.c.bf16 %v6467_v9, %v6453_v19  ;;  %v5816_v13 = vpack.c.bf16 %v4558_v17, %v6468_v59 }
 0xa84   : > { %v6471_v27 = vpop.permute.xlu0 %6470 }
 0xa85   : > { %v6473_v12 = vunpack.i.h.bf16 %v6471_v27  ;;  %v6472_v62 = vunpack.i.l.bf16 %v6471_v27  ;;  %5813 = vmatprep.subr.bf16.mxu0 %v5812_v11  ;;  %5827 = vmatprep.subr.bf16.mxu1 %v5812_v11 }
 0xa86   : > { %5815 = vmatpush3.bf16.msra.mxu0 %v5814_v50  ;;  %5835 = vmatpush3.bf16.msra.mxu1 %v5814_v50 }
 0xa87   : > { %v5819_v57 = vpack.c.bf16 %v6473_v12, %v6472_v62  ;;  %5818 = vmatprep.subr.msk.bf16.mxu0 %vm7319_vm8, %v5816_v13  ;;  %5828 = vmatprep.subr.msk.bf16.mxu1 %vm7319_vm8, %v5816_v13 }
 0xa8a   : > { %5820 = vmatpush3.bf16.msra.mxu0 %v5819_v57  ;;  %5836 = vmatpush3.bf16.msra.mxu1 %v5819_v57 }
 0xa8b   : > { %5625 = vmatprep.subr.bf16.mxu1 %v6761_v5 }
 0xa8d   : > { %4698 = vmatmul.mubr.f32.vlgmr.msra.gmra.mrb[82].mxu0 %v4422_v48  ;;  %4703 = vmatmul.mubr.f32.vlgmr.msra.gmra.mrb[32].mxu1 %v4424_v32 }
 0xa8e   : > { %5405 = vmatprep.mubr.msk.f32.mxu1 %vm4009_vm7, %v4427_v49  ;;  %5626 = vmatpush3.bf16.msra.mxu1 %v6761_v5 }
 0xa8f   : > { %5627 = vmatprep.subr.bf16.mxu1 %v6762_v36 }
 0xa91   : > { %4708 = vmatmul.mubr.f32.gmra.mrb[34].mxu1 %v4426_v42  ;;  %v4578_v23 = vpop.permute.xlu1 %4577 }
 0xa92   : > { %5406 = vmatprep.mubr.msk.f32.mxu1 %vm4009_vm7, %v4429_v43  ;;  %5628 = vmatpush3.bf16.msra.mxu1 %v6762_v36 }
 0xa93   : > { %5629 = vmatprep.subr.bf16.mxu1 %v6763_v28 }
 0xa95   : > { %4713 = vmatmul.mubr.f32.gmra.mrb[36].mxu1 %v4428_v58  ;;  %v4583_v30 = vpop.permute.xlu0 %4582  ;;  %v4588_v2 = vpop.permute.xlu1 %4587 }
 0xa96   : > { %5407 = vmatprep.mubr.msk.f32.mxu1 %vm4009_vm7, %v4431_v7  ;;  %5630 = vmatpush3.bf16.msra.mxu1 %v6763_v28 }
 0xa97   : > { %5631 = vmatprep.subr.bf16.mxu1 %v6764_v1 }
 0xa99   : > { %4718 = vmatmul.mubr.f32.gmra.mrb[38].mxu1 %v4430_v14  ;;  %v4593_v31 = vpop.permute.xlu0 %4592  ;;  %v4598_v20 = vpop.permute.xlu1 %4597 }
 0xa9a   : > { %5408 = vmatprep.mubr.msk.f32.mxu1 %vm4009_vm7, %v4433_v39  ;;  %5632 = vmatpush3.bf16.msra.mxu1 %v6764_v1 }
 0xa9b   : > { %5633 = vmatprep.subr.bf16.mxu1 %v6765_v24 }
 0xa9d   : > { %4723 = vmatmul.mubr.f32.gmra.mrb[40].mxu1 %v4432_v8  ;;  %v4603_v18 = vpop.permute.xlu0 %4602  ;;  %v4608_v50 = vpop.permute.xlu1 %4607 }
 0xa9e   : > { %5409 = vmatprep.mubr.msk.f32.mxu1 %vm4009_vm7, %v4435_v35  ;;  %5634 = vmatpush3.bf16.msra.mxu1 %v6765_v24  ;;  %vm4933_vm7 = vcmask 351232  }
 0xa9f   : > { %5635 = vmatprep.subr.bf16.mxu1 %v4832_v51 }
 0xaa1   : > { %4728 = vmatmul.mubr.f32.gmra.mrb[42].mxu1 %v4434_v45 }
 0xaa2   : > { %5636 = vmatpush3.bf16.msra.mxu1 %v4832_v51 }
 0xb60   : > { %v5541_v16 = vpop.f32.mrb[82].mxu0  ;;  %v5544_v60 = vpop.f32.mrb[32].mxu1 }
 0xb61   : > { %v5542_v41 = vpop.f32.mrb[83].mxu0  ;;  %v5545_v46 = vpop.f32.mrb[33].mxu1 }
 0xb62   : > { %v5543_v3 = vadd.f32 %v5542_v41, %v5541_v16  ;;  %v5546_v0 = vadd.f32 %v5545_v46, %v5544_v60  ;;  %v5422_v41 = vld [vmem:[%s9437_s13 + $0x48] sm:$0xff] }
 0xb64   : > { %v4700_v22 = vadd.f32 %v5543_v3, %v4578_v23  ;;  %v4705_v26 = vadd.f32 %v5546_v0, %v4583_v30  ;;  %v5547_v29 = vpop.f32.mrb[34].mxu1  ;;  %v4921_v0 = vld [vmem:[%s9437_s13 + $0x10] sm:$0xff] }
 0xb65   : > { %v5548_v37 = vpop.f32.mrb[35].mxu1 }
 0xb66   : > { %v6474_v6 = vpack.i.bf16 %v4705_v26, %v4700_v22  ;;  %v5549_v56 = vadd.f32 %v5548_v37, %v5547_v29 }
 0xb68   : > { %v5550_v10 = vpop.f32.mrb[36].mxu1  ;;  %6475 = vrot.lane.b32.xlu0 %v6474_v6, %s6966_s28  ;;  %v4710_v53 = vadd.f32 %v5549_v56, %v4588_v2  ;;  %v4922_v56 = vld [vmem:[%s9437_s13 + $0x18] sm:$0xff] }
 0xb69   : > { %v5551_v25 = vpop.f32.mrb[37].mxu1 }
 0xb6a   : > { %v5552_v54 = vadd.f32 %v5551_v25, %v5550_v10 }
 0xb6c   : > { %v4715_v55 = vadd.f32 %v5552_v54, %v4593_v31  ;;  %v5553_v21 = vpop.f32.mrb[38].mxu1  ;;  %v5420_v54 = vld [vmem:[%s9437_s13 + $0x38] sm:$0xff]  ;;  %v4920_v31 = vld [vmem:[%s9437_s13 + $0x8] sm:$0xff] }
 0xb6d   : > { %v5554_v34 = vpop.f32.mrb[39].mxu1 }
 0xb6e   : > { %v6479_v47 = vpack.i.bf16 %v4715_v55, %v4710_v53  ;;  %v5555_v38 = vadd.f32 %v5554_v34, %v5553_v21 }
 0xb70   : > { %v5556_v40 = vpop.f32.mrb[40].mxu1  ;;  %6480 = vrot.lane.b32.xlu1 %v6479_v47, %s6966_s28  ;;  %v4720_v52 = vadd.f32 %v5555_v38, %v4598_v20 }
 0xb71   : > { %v5557_v4 = vpop.f32.mrb[41].mxu1 }
 0xb72   : > { %v5558_v44 = vadd.f32 %v5557_v4, %v5556_v40  ;;  %v5423_v4 = vld [vmem:[%s9437_s13 + $0x50] sm:$0xff] }
 0xb74   : > { %v4725_v19 = vadd.f32 %v5558_v44, %v4603_v18  ;;  %v5559_v33 = vpop.f32.mrb[42].mxu1  ;;  %v4923_v18 = vld [vmem:[%s9437_s13 + $0x20] sm:$0xff] }
 0xb75   : > { %v5560_v59 = vpop.f32.mrb[43].mxu1 }
 0xb76   : > { %v6484_v9 = vpack.i.bf16 %v4725_v19, %v4720_v52  ;;  %v5561_v11 = vadd.f32 %v5560_v59, %v5559_v33 }
 0xb78   : > { %v4730_v17 = vadd.f32 %v5561_v11, %v4608_v50  ;;  %6485 = vrot.lane.b32.xlu0 %v6484_v9, %s6966_s28  ;;  %v5421_v50 = vld [vmem:[%s9437_s13 + $0x40] sm:$0xff] }
 0xb7a   : > { %4752 = vrot.lane.b32.xlu1 %v4730_v17, %s6966_s28  ;;  %s5427_s28 = sshll.u32 %s7078_s22, 4  ;;  %s6976_s22 = smov [#allocation10]  }
 0xb7b   : > { %s9382_s29 = scalar_lea.hbm %s9508_s20, %s5427_s28  ;;  %s6883_s18 = sshll.u32 %s6976_s22, 4  ;;  %s6884_s18 = int_to_ptr.vmem [resolvable:$false] %s6883_s18 }
 0xb7c   : > { %s6885_s14 = scalar_lea.vmem %s6884_s18, 32  ;;  %p6886_p8 = scmp.lt.s32.totalorder %s9384_s16, %s6884_s18 }
 0xb7d   : > { %p6887_p11 = scmp.lt.s32.totalorder %s6885_s14, %s6879_s24 }
 0xb7f   : > { %p6888_p5 = por %p6887_p11, %p6886_p8 }
 0xb81   : > { %p6889_p0 = pnand %p6888_p5, %p6882_p7 }
 0xbda   : > { %v6476_v27 = vpop.permute.xlu0 %6475 }
 0xbdb   : > { %v6478_v13 = vunpack.i.h.bf16 %v6476_v27  ;;  %v6477_v12 = vunpack.i.l.bf16 %v6476_v27 }
 0xbdd   : > { %v4762_v62 = vmax.f32 %v4705_v26, %v6478_v13  ;;  %v4761_v57 = vmax.f32 %v4700_v22, %v6477_v12  ;;  %v4919_v26 = vld [vmem:[%s9437_s13] sm:$0xff]  ;;  %v4924_v13 = vld [vmem:[%s9437_s13 + $0x28] sm:$0xff] }
 0xbdf   : > { %v4768_v48 = vpack.c.bf16 %v4762_v62, %v4761_v57 }
 0xbe1   : > { %5637 = vmatprep.mubr.msk.bf16.mxu1 %vm4816_vm2, %v4768_v48 }
 0xbe2   : > { %v6481_v32 = vpop.permute.xlu1 %6480 }
 0xbe3   : > { %v6483_v49 = vunpack.i.h.bf16 %v6481_v32  ;;  %v6482_v42 = vunpack.i.l.bf16 %v6481_v32  ;;  %v5424_v32 = vld [vmem:[%s9437_s13 + $0x58] sm:$0xff] }
 0xbe5   : > { %v4764_v43 = vmax.f32 %v4715_v55, %v6483_v49  ;;  %v4763_v58 = vmax.f32 %v4710_v53, %v6482_v42  ;;  %v4925_v42 = vld [vmem:[%s9437_s13 + $0x30] sm:$0x3] }
 0xbe7   : > { %v4769_v7 = vpack.c.bf16 %v4764_v43, %v4763_v58 }
 0xbe9   : > { %5638 = vmatmul.mubr.msk.bf16.vlgmr.msra.gmra.mrb[44].mxu1 %vm4816_vm2, %v4769_v7  ;;  %v5425_v7 = vld [vmem:[%s9437_s13 + $0x60] sm:$0xff] }
 0xbea   : > { %v6486_v14 = vpop.permute.xlu0 %6485 }
 0xbeb   : > { %v6488_v39 = vunpack.i.h.bf16 %v6486_v14  ;;  %v6487_v8 = vunpack.i.l.bf16 %v6486_v14 }
 0xbec   : > { %v4753_v35 = vpop.permute.xlu1 %4752 }
 0xbed   : > { %v4766_v45 = vmax.f32 %v4725_v19, %v6488_v39  ;;  %v4765_v5 = vmax.f32 %v4720_v52, %v6487_v8  ;;  %v4767_v36 = vmax.f32 %v4730_v17, %v4753_v35 }
 0xbef   : > { %v4770_v28 = vpack.c.bf16 %v4766_v45, %v4765_v5  ;;  %v4771_v1 = vpack.c.bf16 %v4767_v36, %v4767_v36  ;;  %v5426_v5 = vld [vmem:[%s9437_s13 + $0x68] sm:$0x3] }
 0xbf1   : > { %5641 = vmatprep.mubr.msk.bf16.mxu1 %vm4816_vm2, %v4770_v28 }
 0xbf2   : > { %5642 = vmatmul.mubr.msk.bf16.gmra.mrb[48].mxu1 %vm4816_vm2, %v4771_v1 }
 0xcbc   : > { %v5639_v24 = vpop.f32.mrb[44].mxu1 }
 0xcbd   : > { %vm4900_vm3 = vcmp.ge.f32.partialorder %v5639_v24, 0.0  ;;  %v4907_v16 = vmul.f32 0.01, %v5639_v24  ;;  %v4868_v60 = vpop.f32.mrb[45].mxu1 }
 0xcbe   : > { %vm4898_vm8 = vcmp.ge.f32.partialorder %v4868_v60, 0.0  ;;  %v4905_v46 = vmul.f32 0.01, %v4868_v60  ;;  %v5640_v3 = vpop.f32.mrb[46].mxu1 }
 0xcbf   : > { %v4914_v23 = vsel %vm4900_vm3, %v5639_v24, %v4907_v16  ;;  %vm4901_vm15 = vcmp.ge.f32.partialorder %v5640_v3, 0.0  ;;  %v4908_v30 = vmul.f32 0.01, %v5640_v3  ;;  %v4871_v22 = vpop.f32.mrb[47].mxu1 }
 0xcc0   : > { %v4912_v29 = vsel %vm4898_vm8, %v4868_v60, %v4905_v46  ;;  %v4906_v37 = vmul.f32 0.01, %v4871_v22  ;;  %v4966_v6 = vmul.f32 %v5422_v41, %v4914_v23  ;;  %vm4899_vm14 = vcmp.ge.f32.partialorder %v4871_v22, 0.0 }
 0xcc1   : > { %v4915_v61 = vsel %vm4901_vm15, %v5640_v3, %v4908_v30  ;;  %v4928_v63 = vmul.f32 %v4921_v0, %v4914_v23  ;;  %v4926_v15 = vmul.f32 %v4919_v26, %v4912_v29  ;;  %v4964_v34 = vmul.f32 %v5420_v54, %v4912_v29 }
 0xcc2   : > { %v4977_v10 = vsel %vm4933_vm7, %v4966_v6, 0.0  ;;  %v4929_v51 = vmul.f32 %v4922_v56, %v4915_v61  ;;  %v4913_v2 = vsel %vm4899_vm14, %v4871_v22, %v4906_v37  ;;  %v4967_v59 = vmul.f32 %v5423_v4, %v4915_v61 }
 0xcc3   : > { %4978 = vadd.xlane.f32.xlu0 %v4977_v10  ;;  %v4940_v25 = vsel %vm4933_vm7, %v4928_v63, 0.0  ;;  %v4934_v21 = vsel %vm4933_vm7, %v4926_v15, 0.0  ;;  %v4927_v20 = vmul.f32 %v4920_v31, %v4913_v2  ;;  %v4971_v33 = vsel %vm4933_vm7, %v4964_v34, 0.0 }
 0xcc4   : > { %4941 = vadd.xlane.f32.xlu1 %v4940_v25  ;;  %v4943_v38 = vsel %vm4933_vm7, %v4929_v51, 0.0  ;;  %v4980_v12 = vsel %vm4933_vm7, %v4967_v59, 0.0  ;;  %v4965_v62 = vmul.f32 %v5421_v50, %v4913_v2 }
 0xcc5   : > { %v5643_v53 = vpop.f32.mrb[48].mxu1  ;;  %v4937_v9 = vsel %vm4933_vm7, %v4927_v20, 0.0 }
 0xcc6   : > { %v4884_v55 = vpop.f32.mrb[49].mxu1  ;;  %v4911_v17 = vmul.f32 0.01, %v5643_v53  ;;  %vm4904_vm13 = vcmp.ge.f32.partialorder %v5643_v53, 0.0  ;;  %v4974_v43 = vsel %vm4933_vm7, %v4965_v62, 0.0 }
 0xcc7   : > { %vm4902_vm10 = vcmp.ge.f32.partialorder %v4884_v55, 0.0  ;;  %v4909_v47 = vmul.f32 0.01, %v4884_v55  ;;  %4935 = vadd.xlane.f32.xlu0 %v4934_v21  ;;  %v5644_v40 = vpop.f32.mrb[50].mxu1 }
 0xcc8   : > { %4944 = vadd.xlane.f32.xlu1 %v4943_v38  ;;  %v4887_v44 = vpop.f32.mrb[51].mxu1  ;;  %v4918_v49 = vsel %vm4904_vm13, %v5643_v53, %v4911_v17 }
 0xcc9   : > { %v4916_v52 = vsel %vm4902_vm10, %v4884_v55, %v4909_v47  ;;  %vm4903_vm12 = vcmp.ge.f32.partialorder %v4887_v44, 0.0  ;;  %v4910_v19 = vmul.f32 0.01, %v4887_v44  ;;  %v4932_v39 = vmul.f32 %v4925_v42, %v4918_v49 }
 0xcca   : > { %v4930_v11 = vmul.f32 %v4923_v18, %v4916_v52  ;;  %v4968_v58 = vmul.f32 %v5424_v32, %v4916_v52  ;;  %v4970_v28 = vmul.f32 %v5426_v5, %v4918_v49 }
 0xccb   : > { %4972 = vadd.xlane.f32.xlu0 %v4971_v33  ;;  %v4917_v27 = vsel %vm4903_vm12, %v4887_v44, %v4910_v19  ;;  %v4953_v45 = vsel %vm4952_vm6, %v4932_v39, 0.0 }
 0xccc   : > { %4938 = vadd.xlane.f32.xlu1 %v4937_v9  ;;  %v4931_v57 = vmul.f32 %v4924_v13, %v4917_v27  ;;  %v4946_v48 = vsel %vm4933_vm7, %v4930_v11, 0.0  ;;  %v4969_v8 = vmul.f32 %v5425_v7, %v4917_v27  ;;  %v4983_v35 = vsel %vm4933_vm7, %v4968_v58, 0.0  ;;  %v5021_v9 = vld [vmem:[%s9507_s23] sm:$0x1] }
 0xccd   : > { %v4989_v1 = vsel %vm4952_vm6, %v4970_v28, 0.0 }
 0xcce   : > { %v4949_v14 = vsel %vm4933_vm7, %v4931_v57, 0.0  ;;  %v4986_v36 = vsel %vm4933_vm7, %v4969_v8, 0.0 }
 0xccf   : > { %4981 = vadd.xlane.f32.xlu0 %v4980_v12 }
 0xcd0   : > { %4947 = vadd.xlane.f32.xlu1 %v4946_v48 }
 0xcd3   : > { %4975 = vadd.xlane.f32.xlu0 %v4974_v43 }
 0xcd4   : > { %4950 = vadd.xlane.f32.xlu1 %v4949_v14 }
 0xcd7   : > { %4984 = vadd.xlane.f32.xlu0 %v4983_v35 }
 0xcd8   : > { %4954 = vadd.xlane.f32.xlu1 %v4953_v45 }
 0xcdb   : > { %4987 = vadd.xlane.f32.xlu0 %v4986_v36 }
 0xcdf   : > { %4990 = vadd.xlane.f32.xlu0 %v4989_v1 }
 0xd50   : > { %v4979_v24 = vpop.xlane.xlu0 %4978 }
 0xd51   : > { %v4942_v16 = vpop.xlane.xlu1 %4941 }
 0xd52   : > { %v4995_v26 = vsel %vm4992_vm11, %v4942_v16, %v4979_v24 }
 0xd53   : > { %v5004_v63 = vsel %vm5000_vm9, %v4995_v26, 0.0 }
 0xd54   : > { %v4936_v60 = vpop.xlane.xlu0 %4935 }
 0xd55   : > { %v4945_v41 = vpop.xlane.xlu1 %4944 }
 0xd58   : > { %v4973_v46 = vpop.xlane.xlu0 %4972 }
 0xd59   : > { %v4939_v3 = vpop.xlane.xlu1 %4938  ;;  %v4993_v23 = vsel %vm4992_vm11, %v4936_v60, %v4973_v46 }
 0xd5a   : > { %v5001_v37 = vsel %vm5000_vm9, %v4993_v23, 0.0 }
 0xd5c   : > { %v4982_v0 = vpop.xlane.xlu0 %4981 }
 0xd5d   : > { %v4948_v30 = vpop.xlane.xlu1 %4947  ;;  %v4996_v56 = vsel %vm4992_vm11, %v4945_v41, %v4982_v0 }
 0xd5e   : > { %v5006_v51 = vsel %vm5000_vm9, %v4996_v56, 0.0 }
 0xd60   : > { %v4976_v22 = vpop.xlane.xlu0 %4975 }
 0xd61   : > { %v4994_v29 = vsel %vm4992_vm11, %v4939_v3, %v4976_v22  ;;  %v4951_v54 = vpop.xlane.xlu1 %4950 }
 0xd62   : > { %v5002_v6 = vsel %vm5000_vm9, %v4994_v29, 0.0 }
 0xd63   : > { %v5003_v61 = vadd.f32 %v5002_v6, %v5001_v37 }
 0xd64   : > { %v4985_v10 = vpop.xlane.xlu0 %4984 }
 0xd65   : > { %v5005_v15 = vadd.f32 %v5004_v63, %v5003_v61  ;;  %v4997_v25 = vsel %vm4992_vm11, %v4948_v30, %v4985_v10  ;;  %v4955_v47 = vpop.xlane.xlu1 %4954 }
 0xd66   : > { %v5008_v31 = vsel %vm5000_vm9, %v4997_v25, 0.0 }
 0xd67   : > { %v5007_v2 = vadd.f32 %v5006_v51, %v5005_v15 }
 0xd68   : > { %v4988_v53 = vpop.xlane.xlu0 %4987 }
 0xd69   : > { %v5009_v55 = vadd.f32 %v5008_v31, %v5007_v2  ;;  %v4998_v21 = vsel %vm4992_vm11, %v4951_v54, %v4988_v53 }
 0xd6a   : > { %v5010_v34 = vsel %vm5000_vm9, %v4998_v21, 0.0 }
 0xd6b   : > { %v5011_v40 = vadd.f32 %v5010_v34, %v5009_v55 }
 0xd6c   : > { %v4991_v38 = vpop.xlane.xlu0 %4990 }
 0xd6d   : > { %v4999_v20 = vsel %vm4992_vm11, %v4955_v47, %v4991_v38 }
 0xd6e   : > { %v5013_v4 = vsel %vm5012_vm1, %v4999_v20, 0.0 }
 0xd6f   : > { %v5014_v44 = vadd.f32 %v5013_v4, %v5011_v40 }
 0xd71   : > { %v5015_v18 = vrot.slane %v5014_v44, 4 }
 0xd73   : > { %v5016_v52 = vadd.f32 %v5015_v18, %v5014_v44 }
 0xd75   : > { %v5017_v19 = vrot.slane %v5016_v52, 2 }
 0xd77   : > { %v5018_v33 = vadd.f32 %v5017_v19, %v5016_v52 }
 0xd79   : > { %v5019_v59 = vrot.slane %v5018_v33, 1 }
 0xd7b   : > { %v5020_v11 = vadd.f32 %v5019_v59, %v5018_v33 }
 0xd7d   : > { %v5022_v50 = vadd.f32 %v5021_v9, %v5020_v11 }
 0xd7f   : > { %5024 = vst.msk [vmem:[%s545_s21] sm:$0x1] %vm5023_vm4, %v5022_v50 }
 0xd80   : > { %6892 = shalt.err (!%p6889_p0)
}
 0xd81   : > { %s6893_s7 = scalar_lea.hbm %s9382_s29, 16  ;;  %s6897_s23 = scalar_lea.hbm %s9509_s17, 32 }
 0xd82   : > { %p6894_p6 = scmp.ne.s32.totalorder %s9382_s29, %s6893_s7  ;;  %p6898_p13 = scmp.lt.u32.totalorder %s9382_s29, %s9509_s17 }
 0xd83   : > { %p6899_p12 = scmp.lt.u32.totalorder %s6897_s23, %s6893_s7  ;;  %p6901_p2 = scmp.lt.u32.totalorder %s6893_s7, %s9382_s29 }
 0xd84   : > { %p6895_p9 = pnand %p6894_p6, %p9510_p3 }
 0xd85   : > { %p6900_p1 = por %p6899_p12, %p6898_p13 }
 0xd86   : > { %p6896_p10 = pneg %p6895_p9 }
 0xd87   : > { %p6902_p4 = por %p6901_p2, %p6900_p1 }
 0xd89   : > { %p6903_p7 = pnand %p6902_p4, %p6896_p10 }
 0xd8b   : > { %6906 = shalt.err (!%p6903_p7)
}
 0xd8c   : > { %5886 = dma.vmem_to_hbm [thread:$0]  (%p9510_p3), %s9384_s16, 16, %s9382_s29, %s5026_s26  }
 0xd8d PF: > { %s9511_s15 = sld [smem:[#allocation18_spill]]  ;;  %s9512_s19 = sld [smem:[#allocation15_spill]] }
 0xd8e   : > { %s9513_s20 = sld [smem:[#allocation22_spill]] }
 0xd93   : > { %p5913_p8 = scmp.ge.s32.totalorder %s9511_s15, 2  ;;  %s5050_s24 = sand.u32 1, %s9512_s19  }
 0xd94   : > { %p9514_p11 = scmp.ne.s32.totalorder %s9513_s20, 0  ;;  %s5051_s22 = scalar_lea.sflag [#allocation4], %s5050_s24 }
 0xd96   : > { %p5902_p5 = pnand %p5913_p8, %p9514_p11 }
 0xd98   : > { %6936 = dma.done.wait (!%p5902_p5), %s5051_s22, 16  }
 0xd99   : > { %6938 = vsyncadd (!%p5902_p5), %s5051_s22, 4294967280  ;;  %s9515_s21 = sld [smem:[#allocation19_spill]]  ;;  %s9516_s18 = sld [smem:[#allocation16_spill]] }
 0xd9a   : > { %s9517_s19 = sld [smem:[#allocation17_spill]]  ;;  %s9518_s20 = sld [smem:[#allocation20_spill]] }
 0xd9f   : > { %p28_p0 = scmp.ge.s32.totalorder %s9515_s21, 4  }
 0xda1   :  { %30 = sbr.rel (!%p28_p0) target bundleno = 10 (0xa), region = 133 }
 0xda8   :  { %5055 = vsyncpa [#allocation3], 1 }
 0xda9   :  { %5057 = vsyncpa [#allocation3 + $0x1], 1 }
 0xdaa   :  { %5058 = vsyncpa [#allocation6], 1 }
 0xdab   :  { %5059 = vsyncpa [#allocation9], 1 }
 0xdac   :  { %5060 = vsyncpa [#allocation4], 1 }
 0xdad   :  { %5062 = vsyncpa [#allocation4 + $0x1], 1 }

</bundles_post_ra>
